<compile_context>
chip_gen: v7x
topology: tpu7x:2x2x1
jax: 0.10.0
libtpu: 0.0.40
codegen_flags: <defaults>
</compile_context>

<pallas_src>
import functools

import jax
import jax.numpy as jnp
from jax.experimental import pallas as pl
from jax.experimental.pallas import tpu as pltpu


_VMEM_LIMIT = 16 * 1024 * 1024


def _compiler_params(n_grid_dims):
    return pltpu.CompilerParams(
        dimension_semantics=("parallel",) * n_grid_dims,
        vmem_limit_bytes=_VMEM_LIMIT,
    )


# ----------------------------- Pallas kernels -----------------------------

def _conv_pool_kernel(a_ref, w_ref, b_ref, o_ref, *, q):
    """Fused conv-as-GEMM + (BN-folded) bias + ReLU + 2x2 max-pool.

    a_ref: (1, 4*q, K) bf16 — im2col rows grouped into the 4 pool quadrants
           (h%2, w%2) = (0,0),(0,1),(1,0),(1,1), each in pooled raster order.
    w_ref: (K, Cout) bf16; b_ref: (1, Cout) f32; o_ref: (1, q, Cout) bf16.
    """
    wmat = w_ref[...]

    def quad(k):
        return jnp.dot(a_ref[0, pl.ds(k * q, q), :], wmat,
                       preferred_element_type=jnp.float32)

    m = jnp.maximum(jnp.maximum(quad(0), quad(1)),
                    jnp.maximum(quad(2), quad(3)))
    m = jnp.maximum(m + b_ref[...], 0.0)   # relu(max(x)+b) == max(relu(x+b))
    o_ref[0] = m.astype(o_ref.dtype)


def _linear_kernel(a_ref, w_ref, b_ref, o_ref, *, relu):
    acc = jnp.dot(a_ref[...], w_ref[...], preferred_element_type=jnp.float32)
    acc = acc + b_ref[...]
    if relu:
        acc = jnp.maximum(acc, 0.0)
    o_ref[...] = acc.astype(o_ref.dtype)


# ----------------------------- Wrappers ------------------------------------

def conv_bn_relu_pool(a, w, bias, *, h, wdim):
    """a: (N, h*wdim, K) im2col rows in pool-quadrant order.

    Returns the pooled feature map (N, (h//2)*(wdim//2), Cout) in bf16 with the
    REAL channel count (no lane padding carried to the next layer).
    """
    n, hw, k = a.shape
    cout = w.shape[1]
    q = (h // 2) * (wdim // 2)
    assert hw == 4 * q
    return pl.pallas_call(
        functools.partial(_conv_pool_kernel, q=q),
        out_shape=jax.ShapeDtypeStruct((n, q, cout), jnp.bfloat16),
        grid=(n,),                                   # one image per grid step
        in_specs=[
            pl.BlockSpec((1, hw, k), lambda i: (i, 0, 0)),
            pl.BlockSpec((k, cout), lambda i: (0, 0)),
            pl.BlockSpec((1, cout), lambda i: (0, 0)),
        ],
        out_specs=pl.BlockSpec((1, q, cout), lambda i: (i, 0, 0)),
        compiler_params=_compiler_params(1),
    )(a, w, bias)


def fused_linear(a, w, bias, *, relu, out_dtype):
    """out = maybe_relu(a @ w + bias). a: (M, K); w: (K, N) bf16; bias: (1, N) f32."""
    m, k = a.shape
    n = w.shape[1]
    # Output-feature tile: 256-wide when possible (v6e/v7x MXU), else 128, else full.
    if n % 256 == 0:
        tn = 256
    elif n % 128 == 0:
        tn = 128
    else:
        tn = n
    # M tile: full when small, else 512-row sublane-aligned tiles (pad M if needed).
    if m <= 512:
        tm, mp = m, m
    else:
        tm = 512
        mp = -(-m // tm) * tm
        if mp != m:
            a = jnp.pad(a, ((0, mp - m), (0, 0)))
    out = pl.pallas_call(
        functools.partial(_linear_kernel, relu=relu),
        out_shape=jax.ShapeDtypeStruct((mp, n), out_dtype),
        grid=(mp // tm, n // tn),
        in_specs=[
            pl.BlockSpec((tm, k), lambda i, j: (i, 0)),
            pl.BlockSpec((k, tn), lambda i, j: (0, j)),
            pl.BlockSpec((1, tn), lambda i, j: (0, j)),
        ],
        out_specs=pl.BlockSpec((tm, tn), lambda i, j: (i, j)),
        compiler_params=_compiler_params(2),
    )(a.astype(jnp.bfloat16), w, bias)
    return out if mp == m else out[:m]


def im2col_pool_order(x, kh, kw):
    """x: (N, H, W, C) -> (N, H*W, kh*kw*C); stride 1, 'same' padding (odd kernels).

    Rows are grouped into the four 2x2-pool quadrants, each quadrant in pooled
    raster order, so the conv kernel fuses max-pool with contiguous slab slices.
    """
    n, h, w, c = x.shape
    ph, pw = kh // 2, kw // 2
    xp = jnp.pad(x, ((0, 0), (ph, ph), (pw, pw), (0, 0)))
    taps = [xp[:, i:i + h, j:j + w, :] for i in range(kh) for j in range(kw)]
    pat = jnp.stack(taps, axis=3).reshape(n, h, w, kh * kw * c)   # (N, H, W, K)
    quads = [pat[:, a::2, b::2, :] for a in (0, 1) for b in (0, 1)]
    return jnp.stack(quads, axis=1).reshape(n, h * w, kh * kw * c)


# ----------------------------- Parameters ----------------------------------

def init_params(key):
    ks = jax.random.split(key, 6)
    f32 = jnp.float32
    return {
        "w1": jax.random.normal(ks[0], (8, 1, 3, 3), f32) * 0.1,
        "b1": jax.random.normal(ks[1], (8,), f32) * 0.01,
        "g1": jnp.ones((8,), f32), "be1": jnp.zeros((8,), f32),
        "m1": jnp.zeros((8,), f32), "v1": jnp.ones((8,), f32),
        "w2": jax.random.normal(ks[2], (32, 8, 5, 5), f32) * 0.05,
        "b2": jax.random.normal(ks[3], (32,), f32) * 0.01,
        "g2": jnp.ones((32,), f32), "be2": jnp.zeros((32,), f32),
        "m2": jnp.zeros((32,), f32), "v2": jnp.ones((32,), f32),
        # PyTorch layout: fc1 input features are CHW-flattened (32, 7, 7).
        "fc1_w": jax.random.normal(ks[4], (1568, 600), f32) * 0.02,
        "fc1_b": jnp.zeros((600,), f32),
        "fc2_w": jax.random.normal(ks[5], (600, 10), f32) * 0.02,
        "fc2_b": jnp.zeros((10,), f32),
    }


def prepare_params(p, eps=1e-5):
    """One-time weight pre-pack (BN fold, layout remap, pads, bf16) — not in hot path."""
    def fold_conv(w, b, g, beta, mean, var):
        cout = w.shape[0]
        scale = g / jnp.sqrt(var + eps)
        wm = jnp.transpose(w, (2, 3, 1, 0)).reshape(-1, cout) * scale[None, :]
        bias = (b - mean) * scale + beta
        return wm.astype(jnp.bfloat16), bias.reshape(1, cout).astype(jnp.float32)

    w1, b1 = fold_conv(p["w1"], p["b1"], p["g1"], p["be1"], p["m1"], p["v1"])  # (9, 8)
    w2, b2 = fold_conv(p["w2"], p["b2"], p["g2"], p["be2"], p["m2"], p["v2"])  # (200, 32)

    # fc1: remap PyTorch CHW feature rows to our HWC order; pad out 600 -> 640.
    fc1_w = p["fc1_w"].reshape(32, 7, 7, 600).transpose(1, 2, 0, 3).reshape(1568, 600)
    fc1_w = jnp.pad(fc1_w, ((0, 0), (0, 40))).astype(jnp.bfloat16)             # (1568, 640)
    fc1_b = jnp.pad(p["fc1_b"], (0, 40)).reshape(1, 640).astype(jnp.float32)

    # fc2: pad K 600 -> 640 with zero rows (matches fc1's zero padded columns).
    fc2_w = jnp.pad(p["fc2_w"], ((0, 40), (0, 0))).astype(jnp.bfloat16)        # (640, 10)
    fc2_b = p["fc2_b"].reshape(1, 10).astype(jnp.float32)

    return {"w1": w1, "b1": b1, "w2": w2, "b2": b2,
            "fc1_w": fc1_w, "fc1_b": fc1_b, "fc2_w": fc2_w, "fc2_b": fc2_b}


# ----------------------------- Model ---------------------------------------

def cnn_forward(x, pp):
    """x: (N, 1, 28, 28) NCHW (PyTorch layout) -> logits (N, 10)."""
    n = x.shape[0]
    x = jnp.transpose(x, (0, 2, 3, 1))                        # (N, 28, 28, 1)

    # conv1(3x3) + bn1 + relu + maxpool(2): one fused Pallas call, K = 9.
    a1 = im2col_pool_order(x, 3, 3).astype(jnp.bfloat16)      # (N, 784, 9)
    y1 = conv_bn_relu_pool(a1, pp["w1"], pp["b1"], h=28, wdim=28)   # (N, 196, 8)

    # conv2(5x5) + bn2 + relu + maxpool(2): real 8 input channels -> K = 200.
    a2 = im2col_pool_order(y1.reshape(n, 14, 14, 8), 5, 5)    # (N, 196, 200) bf16
    y2 = conv_bn_relu_pool(a2, pp["w2"], pp["b2"], h=14, wdim=14)   # (N, 49, 32)

    # Flatten in HWC order (fc1 weights were remapped to match) and run the FCs.
    z = y2.reshape(n, 49 * 32)                                # (N, 1568)
    z = fused_linear(z, pp["fc1_w"], pp["fc1_b"], relu=True,
                     out_dtype=jnp.bfloat16)                  # (N, 640)
    # TODO(synk): Dropout(p=0.5) is identity in inference mode (no masking).
    logits = fused_linear(z, pp["fc2_w"], pp["fc2_b"], relu=False,
                          out_dtype=jnp.float32)              # (N, 10)
    return logits


if __name__ == "__main__":
    key = jax.random.PRNGKey(0)
    k_x, k_p = jax.random.split(key)
    # Input must be (N, 1, 28, 28) so that 32 * 7 * 7 == 1568 for fc1.
    x = jax.random.normal(k_x, (2, 1, 28, 28), jnp.float32)
    params = init_params(k_p)
    packed = prepare_params(params)      # one-time weight pre-pack (outside hot path)

    fwd = jax.jit(cnn_forward)
    logits = jax.block_until_ready(fwd(x, packed))

    assert logits.shape == (2, 10), logits.shape
    assert bool(jnp.all(jnp.isfinite(logits)))
    print("KERNEL_OK")
</pallas_src>

<mosaic_0001>
module attributes {stable_mosaic.version = 11 : i64} {
  func.func @_conv_pool_kernel(%arg0: i32, %arg1: memref<1x784x9xbf16, #tpu.memory_space<vmem>>, %arg2: memref<9x8xbf16, #tpu.memory_space<vmem>>, %arg3: memref<1x8xf32, #tpu.memory_space<vmem>>, %arg4: memref<1x196x8xbf16, #tpu.memory_space<vmem>>) attributes {dimension_semantics = [#tpu.dimension_semantics<parallel>], iteration_bounds = array<i64: 2>, scalar_prefetch = 0 : i64, scratch_operands = 0 : i64, tpu.core_type = #tpu.core_type<tc>, window_params = [{transform_indices = @transform_0, window_bounds = array<i64: 1, 784, 9>}, {pipeline_mode = #tpu.pipeline_mode<synchronous>, transform_indices = @transform_1, window_bounds = array<i64: 9, 8>}, {pipeline_mode = #tpu.pipeline_mode<synchronous>, transform_indices = @transform_2, window_bounds = array<i64: 1, 8>}, {transform_indices = @transform_3, window_bounds = array<i64: 1, 196, 8>}]} {
    %c0 = arith.constant 0 : index
    %c0_0 = arith.constant 0 : index
    %0 = vector.load %arg2[%c0, %c0_0] : memref<9x8xbf16, #tpu.memory_space<vmem>>, vector<9x8xbf16>
    %c0_1 = arith.constant 0 : index
    %c0_2 = arith.constant 0 : index
    %c0_3 = arith.constant 0 : index
    %1 = vector.load %arg1[%c0_1, %c0_2, %c0_3] : memref<1x784x9xbf16, #tpu.memory_space<vmem>>, vector<1x196x9xbf16>
    %2 = vector.shape_cast %1 : vector<1x196x9xbf16> to vector<196x9xbf16>
    %cst = arith.constant dense<0.000000e+00> : vector<196x8xf32>
    %3 = tpu.matmul %2, %0, %cst {dimension_numbers = #tpu.dot_dimension_numbers<[1], [0], [0], [1], [0, 0, 1, 1], [], []>} : vector<196x9xbf16>, vector<9x8xbf16>, vector<196x8xf32> -> vector<196x8xf32>
    %c0_4 = arith.constant 0 : index
    %c196 = arith.constant 196 : index
    %c0_5 = arith.constant 0 : index
    %4 = vector.load %arg1[%c0_4, %c196, %c0_5] : memref<1x784x9xbf16, #tpu.memory_space<vmem>>, vector<1x196x9xbf16>
    %5 = vector.shape_cast %4 : vector<1x196x9xbf16> to vector<196x9xbf16>
    %cst_6 = arith.constant dense<0.000000e+00> : vector<196x8xf32>
    %6 = tpu.matmul %5, %0, %cst_6 {dimension_numbers = #tpu.dot_dimension_numbers<[1], [0], [0], [1], [0, 0, 1, 1], [], []>} : vector<196x9xbf16>, vector<9x8xbf16>, vector<196x8xf32> -> vector<196x8xf32>
    %7 = arith.maximumf %3, %6 : vector<196x8xf32>
    %c0_7 = arith.constant 0 : index
    %c392 = arith.constant 392 : index
    %c0_8 = arith.constant 0 : index
    %8 = vector.load %arg1[%c0_7, %c392, %c0_8] : memref<1x784x9xbf16, #tpu.memory_space<vmem>>, vector<1x196x9xbf16>
    %9 = vector.shape_cast %8 : vector<1x196x9xbf16> to vector<196x9xbf16>
    %cst_9 = arith.constant dense<0.000000e+00> : vector<196x8xf32>
    %10 = tpu.matmul %9, %0, %cst_9 {dimension_numbers = #tpu.dot_dimension_numbers<[1], [0], [0], [1], [0, 0, 1, 1], [], []>} : vector<196x9xbf16>, vector<9x8xbf16>, vector<196x8xf32> -> vector<196x8xf32>
    %c0_10 = arith.constant 0 : index
    %c588 = arith.constant 588 : index
    %c0_11 = arith.constant 0 : index
    %11 = vector.load %arg1[%c0_10, %c588, %c0_11] : memref<1x784x9xbf16, #tpu.memory_space<vmem>>, vector<1x196x9xbf16>
    %12 = vector.shape_cast %11 : vector<1x196x9xbf16> to vector<196x9xbf16>
    %cst_12 = arith.constant dense<0.000000e+00> : vector<196x8xf32>
    %13 = tpu.matmul %12, %0, %cst_12 {dimension_numbers = #tpu.dot_dimension_numbers<[1], [0], [0], [1], [0, 0, 1, 1], [], []>} : vector<196x9xbf16>, vector<9x8xbf16>, vector<196x8xf32> -> vector<196x8xf32>
    %14 = arith.maximumf %10, %13 : vector<196x8xf32>
    %15 = arith.maximumf %7, %14 : vector<196x8xf32>
    %c0_13 = arith.constant 0 : index
    %c0_14 = arith.constant 0 : index
    %16 = vector.load %arg3[%c0_13, %c0_14] : memref<1x8xf32, #tpu.memory_space<vmem>>, vector<1x8xf32>
    %17 = vector.broadcast %16 : vector<1x8xf32> to vector<196x8xf32>
    %18 = arith.addf %15, %17 : vector<196x8xf32>
    %cst_15 = arith.constant 0.000000e+00 : f32
    %19 = vector.broadcast %cst_15 : f32 to vector<196x8xf32>
    %20 = arith.maximumf %18, %19 : vector<196x8xf32>
    %21 = arith.truncf %20 : vector<196x8xf32> to vector<196x8xbf16>
    %c0_16 = arith.constant 0 : index
    %c0_17 = arith.constant 0 : index
    %c0_18 = arith.constant 0 : index
    %22 = vector.load %arg4[%c0_16, %c0_17, %c0_18] : memref<1x196x8xbf16, #tpu.memory_space<vmem>>, vector<1x196x8xbf16>
    %23 = vector.shape_cast %22 : vector<1x196x8xbf16> to vector<196x8xbf16>
    %24 = vector.shape_cast %21 : vector<196x8xbf16> to vector<1x196x8xbf16>
    tpu.vector_store %arg4[%c0_16, %c0_17, %c0_18], %24 {strides = array<i32>} : memref<1x196x8xbf16, #tpu.memory_space<vmem>>, vector<1x196x8xbf16>,
    return
  }
  func.func @transform_0(%arg0: i32) -> (i32, i32, i32) {
    %c0_i32 = arith.constant 0 : i32
    %c0_i32_0 = arith.constant 0 : i32
    %c0_i32_1 = arith.constant 0 : i32
    return %arg0, %c0_i32, %c0_i32_0 : i32, i32, i32
  }
  func.func @transform_1(%arg0: i32) -> (i32, i32) {
    %c0_i32 = arith.constant 0 : i32
    %c0_i32_0 = arith.constant 0 : i32
    %c0_i32_1 = arith.constant 0 : i32
    return %c0_i32, %c0_i32_0 : i32, i32
  }
  func.func @transform_2(%arg0: i32) -> (i32, i32) {
    %c0_i32 = arith.constant 0 : i32
    %c0_i32_0 = arith.constant 0 : i32
    %c0_i32_1 = arith.constant 0 : i32
    return %c0_i32, %c0_i32_0 : i32, i32
  }
  func.func @transform_3(%arg0: i32) -> (i32, i32, i32) {
    %c0_i32 = arith.constant 0 : i32
    %c0_i32_0 = arith.constant 0 : i32
    %c0_i32_1 = arith.constant 0 : i32
    return %arg0, %c0_i32, %c0_i32_0 : i32, i32, i32
  }
}

module attributes {stable_mosaic.version = 11 : i64} {
  func.func @_conv_pool_kernel(%arg0: i32, %arg1: memref<1x196x200xbf16, #tpu.memory_space<vmem>>, %arg2: memref<200x32xbf16, #tpu.memory_space<vmem>>, %arg3: memref<1x32xf32, #tpu.memory_space<vmem>>, %arg4: memref<1x49x32xbf16, #tpu.memory_space<vmem>>) attributes {dimension_semantics = [#tpu.dimension_semantics<parallel>], iteration_bounds = array<i64: 2>, scalar_prefetch = 0 : i64, scratch_operands = 0 : i64, tpu.core_type = #tpu.core_type<tc>, window_params = [{transform_indices = @transform_0, window_bounds = array<i64: 1, 196, 200>}, {pipeline_mode = #tpu.pipeline_mode<synchronous>, transform_indices = @transform_1, window_bounds = array<i64: 200, 32>}, {pipeline_mode = #tpu.pipeline_mode<synchronous>, transform_indices = @transform_2, window_bounds = array<i64: 1, 32>}, {transform_indices = @transform_3, window_bounds = array<i64: 1, 49, 32>}]} {
    %c0 = arith.constant 0 : index
    %c0_0 = arith.constant 0 : index
    %0 = vector.load %arg2[%c0, %c0_0] : memref<200x32xbf16, #tpu.memory_space<vmem>>, vector<200x32xbf16>
    %c0_1 = arith.constant 0 : index
    %c0_2 = arith.constant 0 : index
    %c0_3 = arith.constant 0 : index
    %1 = vector.load %arg1[%c0_1, %c0_2, %c0_3] : memref<1x196x200xbf16, #tpu.memory_space<vmem>>, vector<1x49x200xbf16>
    %2 = vector.shape_cast %1 : vector<1x49x200xbf16> to vector<49x200xbf16>
    %cst = arith.constant dense<0.000000e+00> : vector<49x32xf32>
    %3 = tpu.matmul %2, %0, %cst {dimension_numbers = #tpu.dot_dimension_numbers<[1], [0], [0], [1], [0, 0, 1, 1], [], []>} : vector<49x200xbf16>, vector<200x32xbf16>, vector<49x32xf32> -> vector<49x32xf32>
    %c0_4 = arith.constant 0 : index
    %c49 = arith.constant 49 : index
    %c0_5 = arith.constant 0 : index
    %4 = vector.load %arg1[%c0_4, %c49, %c0_5] : memref<1x196x200xbf16, #tpu.memory_space<vmem>>, vector<1x49x200xbf16>
    %5 = vector.shape_cast %4 : vector<1x49x200xbf16> to vector<49x200xbf16>
    %cst_6 = arith.constant dense<0.000000e+00> : vector<49x32xf32>
    %6 = tpu.matmul %5, %0, %cst_6 {dimension_numbers = #tpu.dot_dimension_numbers<[1], [0], [0], [1], [0, 0, 1, 1], [], []>} : vector<49x200xbf16>, vector<200x32xbf16>, vector<49x32xf32> -> vector<49x32xf32>
    %7 = arith.maximumf %3, %6 : vector<49x32xf32>
    %c0_7 = arith.constant 0 : index
    %c98 = arith.constant 98 : index
    %c0_8 = arith.constant 0 : index
    %8 = vector.load %arg1[%c0_7, %c98, %c0_8] : memref<1x196x200xbf16, #tpu.memory_space<vmem>>, vector<1x49x200xbf16>
    %9 = vector.shape_cast %8 : vector<1x49x200xbf16> to vector<49x200xbf16>
    %cst_9 = arith.constant dense<0.000000e+00> : vector<49x32xf32>
    %10 = tpu.matmul %9, %0, %cst_9 {dimension_numbers = #tpu.dot_dimension_numbers<[1], [0], [0], [1], [0, 0, 1, 1], [], []>} : vector<49x200xbf16>, vector<200x32xbf16>, vector<49x32xf32> -> vector<49x32xf32>
    %c0_10 = arith.constant 0 : index
    %c147 = arith.constant 147 : index
    %c0_11 = arith.constant 0 : index
    %11 = vector.load %arg1[%c0_10, %c147, %c0_11] : memref<1x196x200xbf16, #tpu.memory_space<vmem>>, vector<1x49x200xbf16>
    %12 = vector.shape_cast %11 : vector<1x49x200xbf16> to vector<49x200xbf16>
    %cst_12 = arith.constant dense<0.000000e+00> : vector<49x32xf32>
    %13 = tpu.matmul %12, %0, %cst_12 {dimension_numbers = #tpu.dot_dimension_numbers<[1], [0], [0], [1], [0, 0, 1, 1], [], []>} : vector<49x200xbf16>, vector<200x32xbf16>, vector<49x32xf32> -> vector<49x32xf32>
    %14 = arith.maximumf %10, %13 : vector<49x32xf32>
    %15 = arith.maximumf %7, %14 : vector<49x32xf32>
    %c0_13 = arith.constant 0 : index
    %c0_14 = arith.constant 0 : index
    %16 = vector.load %arg3[%c0_13, %c0_14] : memref<1x32xf32, #tpu.memory_space<vmem>>, vector<1x32xf32>
    %17 = vector.broadcast %16 : vector<1x32xf32> to vector<49x32xf32>
    %18 = arith.addf %15, %17 : vector<49x32xf32>
    %cst_15 = arith.constant 0.000000e+00 : f32
    %19 = vector.broadcast %cst_15 : f32 to vector<49x32xf32>
    %20 = arith.maximumf %18, %19 : vector<49x32xf32>
    %21 = arith.truncf %20 : vector<49x32xf32> to vector<49x32xbf16>
    %c0_16 = arith.constant 0 : index
    %c0_17 = arith.constant 0 : index
    %c0_18 = arith.constant 0 : index
    %22 = vector.load %arg4[%c0_16, %c0_17, %c0_18] : memref<1x49x32xbf16, #tpu.memory_space<vmem>>, vector<1x49x32xbf16>
    %23 = vector.shape_cast %22 : vector<1x49x32xbf16> to vector<49x32xbf16>
    %24 = vector.shape_cast %21 : vector<49x32xbf16> to vector<1x49x32xbf16>
    tpu.vector_store %arg4[%c0_16, %c0_17, %c0_18], %24 {strides = array<i32>} : memref<1x49x32xbf16, #tpu.memory_space<vmem>>, vector<1x49x32xbf16>,
    return
  }
  func.func @transform_0(%arg0: i32) -> (i32, i32, i32) {
    %c0_i32 = arith.constant 0 : i32
    %c0_i32_0 = arith.constant 0 : i32
    %c0_i32_1 = arith.constant 0 : i32
    return %arg0, %c0_i32, %c0_i32_0 : i32, i32, i32
  }
  func.func @transform_1(%arg0: i32) -> (i32, i32) {
    %c0_i32 = arith.constant 0 : i32
    %c0_i32_0 = arith.constant 0 : i32
    %c0_i32_1 = arith.constant 0 : i32
    return %c0_i32, %c0_i32_0 : i32, i32
  }
  func.func @transform_2(%arg0: i32) -> (i32, i32) {
    %c0_i32 = arith.constant 0 : i32
    %c0_i32_0 = arith.constant 0 : i32
    %c0_i32_1 = arith.constant 0 : i32
    return %c0_i32, %c0_i32_0 : i32, i32
  }
  func.func @transform_3(%arg0: i32) -> (i32, i32, i32) {
    %c0_i32 = arith.constant 0 : i32
    %c0_i32_0 = arith.constant 0 : i32
    %c0_i32_1 = arith.constant 0 : i32
    return %arg0, %c0_i32, %c0_i32_0 : i32, i32, i32
  }
}

module attributes {stable_mosaic.version = 11 : i64} {
  func.func @_linear_kernel(%arg0: i32, %arg1: i32, %arg2: memref<2x1568xbf16, #tpu.memory_space<vmem>>, %arg3: memref<1568x128xbf16, #tpu.memory_space<vmem>>, %arg4: memref<1x128xf32, #tpu.memory_space<vmem>>, %arg5: memref<2x128xbf16, #tpu.memory_space<vmem>>) attributes {dimension_semantics = [#tpu.dimension_semantics<parallel>, #tpu.dimension_semantics<parallel>], iteration_bounds = array<i64: 1, 5>, scalar_prefetch = 0 : i64, scratch_operands = 0 : i64, tpu.core_type = #tpu.core_type<tc>, window_params = [{transform_indices = @transform_0, window_bounds = array<i64: 2, 1568>}, {transform_indices = @transform_1, window_bounds = array<i64: 1568, 128>}, {transform_indices = @transform_2, window_bounds = array<i64: 1, 128>}, {transform_indices = @transform_3, window_bounds = array<i64: 2, 128>}]} {
    %c0 = arith.constant 0 : index
    %c0_0 = arith.constant 0 : index
    %0 = vector.load %arg2[%c0, %c0_0] : memref<2x1568xbf16, #tpu.memory_space<vmem>>, vector<2x1568xbf16>
    %c0_1 = arith.constant 0 : index
    %c0_2 = arith.constant 0 : index
    %1 = vector.load %arg3[%c0_1, %c0_2] : memref<1568x128xbf16, #tpu.memory_space<vmem>>, vector<1568x128xbf16>
    %cst = arith.constant dense<0.000000e+00> : vector<2x128xf32>
    %2 = tpu.matmul %0, %1, %cst {dimension_numbers = #tpu.dot_dimension_numbers<[1], [0], [0], [1], [0, 0, 1, 1], [], []>} : vector<2x1568xbf16>, vector<1568x128xbf16>, vector<2x128xf32> -> vector<2x128xf32>
    %c0_3 = arith.constant 0 : index
    %c0_4 = arith.constant 0 : index
    %3 = vector.load %arg4[%c0_3, %c0_4] : memref<1x128xf32, #tpu.memory_space<vmem>>, vector<1x128xf32>
    %4 = vector.broadcast %3 : vector<1x128xf32> to vector<2x128xf32>
    %5 = arith.addf %2, %4 : vector<2x128xf32>
    %cst_5 = arith.constant 0.000000e+00 : f32
    %6 = vector.broadcast %cst_5 : f32 to vector<2x128xf32>
    %7 = arith.maximumf %5, %6 : vector<2x128xf32>
    %8 = arith.truncf %7 : vector<2x128xf32> to vector<2x128xbf16>
    %c0_6 = arith.constant 0 : index
    %c0_7 = arith.constant 0 : index
    %9 = vector.load %arg5[%c0_6, %c0_7] : memref<2x128xbf16, #tpu.memory_space<vmem>>, vector<2x128xbf16>
    tpu.vector_store %arg5[%c0_6, %c0_7], %8 {strides = array<i32>} : memref<2x128xbf16, #tpu.memory_space<vmem>>, vector<2x128xbf16>,
    return
  }
  func.func @transform_0(%arg0: i32, %arg1: i32) -> (i32, i32) {
    %c0_i32 = arith.constant 0 : i32
    %c0_i32_0 = arith.constant 0 : i32
    return %arg0, %c0_i32 : i32, i32
  }
  func.func @transform_1(%arg0: i32, %arg1: i32) -> (i32, i32) {
    %c0_i32 = arith.constant 0 : i32
    %c0_i32_0 = arith.constant 0 : i32
    return %c0_i32, %arg1 : i32, i32
  }
  func.func @transform_2(%arg0: i32, %arg1: i32) -> (i32, i32) {
    %c0_i32 = arith.constant 0 : i32
    %c0_i32_0 = arith.constant 0 : i32
    return %c0_i32, %arg1 : i32, i32
  }
  func.func @transform_3(%arg0: i32, %arg1: i32) -> (i32, i32) {
    %c0_i32 = arith.constant 0 : i32
    return %arg0, %arg1 : i32, i32
  }
}

module attributes {stable_mosaic.version = 11 : i64} {
  func.func @_linear_kernel(%arg0: i32, %arg1: i32, %arg2: memref<2x640xbf16, #tpu.memory_space<vmem>>, %arg3: memref<640x10xbf16, #tpu.memory_space<vmem>>, %arg4: memref<1x10xf32, #tpu.memory_space<vmem>>, %arg5: memref<2x10xf32, #tpu.memory_space<vmem>>) attributes {dimension_semantics = [#tpu.dimension_semantics<parallel>, #tpu.dimension_semantics<parallel>], iteration_bounds = array<i64: 1, 1>, scalar_prefetch = 0 : i64, scratch_operands = 0 : i64, tpu.core_type = #tpu.core_type<tc>, window_params = [{transform_indices = @transform_0, window_bounds = array<i64: 2, 640>}, {transform_indices = @transform_1, window_bounds = array<i64: 640, 10>}, {transform_indices = @transform_2, window_bounds = array<i64: 1, 10>}, {transform_indices = @transform_3, window_bounds = array<i64: 2, 10>}]} {
    %c0 = arith.constant 0 : index
    %c0_0 = arith.constant 0 : index
    %0 = vector.load %arg2[%c0, %c0_0] : memref<2x640xbf16, #tpu.memory_space<vmem>>, vector<2x640xbf16>
    %c0_1 = arith.constant 0 : index
    %c0_2 = arith.constant 0 : index
    %1 = vector.load %arg3[%c0_1, %c0_2] : memref<640x10xbf16, #tpu.memory_space<vmem>>, vector<640x10xbf16>
    %cst = arith.constant dense<0.000000e+00> : vector<2x10xf32>
    %2 = tpu.matmul %0, %1, %cst {dimension_numbers = #tpu.dot_dimension_numbers<[1], [0], [0], [1], [0, 0, 1, 1], [], []>} : vector<2x640xbf16>, vector<640x10xbf16>, vector<2x10xf32> -> vector<2x10xf32>
    %c0_3 = arith.constant 0 : index
    %c0_4 = arith.constant 0 : index
    %3 = vector.load %arg4[%c0_3, %c0_4] : memref<1x10xf32, #tpu.memory_space<vmem>>, vector<1x10xf32>
    %4 = vector.broadcast %3 : vector<1x10xf32> to vector<2x10xf32>
    %5 = arith.addf %2, %4 : vector<2x10xf32>
    %c0_5 = arith.constant 0 : index
    %c0_6 = arith.constant 0 : index
    %6 = vector.load %arg5[%c0_5, %c0_6] : memref<2x10xf32, #tpu.memory_space<vmem>>, vector<2x10xf32>
    tpu.vector_store %arg5[%c0_5, %c0_6], %5 {strides = array<i32>} : memref<2x10xf32, #tpu.memory_space<vmem>>, vector<2x10xf32>,
    return
  }
  func.func @transform_0(%arg0: i32, %arg1: i32) -> (i32, i32) {
    %c0_i32 = arith.constant 0 : i32
    %c0_i32_0 = arith.constant 0 : i32
    return %arg0, %c0_i32 : i32, i32
  }
  func.func @transform_1(%arg0: i32, %arg1: i32) -> (i32, i32) {
    %c0_i32 = arith.constant 0 : i32
    %c0_i32_0 = arith.constant 0 : i32
    return %c0_i32, %arg1 : i32, i32
  }
  func.func @transform_2(%arg0: i32, %arg1: i32) -> (i32, i32) {
    %c0_i32 = arith.constant 0 : i32
    %c0_i32_0 = arith.constant 0 : i32
    return %c0_i32, %arg1 : i32, i32
  }
  func.func @transform_3(%arg0: i32, %arg1: i32) -> (i32, i32) {
    %c0_i32 = arith.constant 0 : i32
    return %arg0, %arg1 : i32, i32
  }
}

</mosaic_0001>

<bundles_post_ra>
// kernel: cnn_forward.4
= control target key start
LH: loop header
LB: loop body
LE: loop exit
PB: predicated region body
PF: predicated region fallthrough
CT: control target
= control target key end

     0   :  { %s2139_s12 = smov 0   ;;  %s2707_s0 = inlined_call_operand.vmem [shape: bf16[2,784,9], index: 0, kind: input, shape index: {}]   ;;  %s2708_s1 = inlined_call_operand.vmem [shape: bf16[9,8], index: 1, kind: input, shape index: {}]   ;;  %s2709_s2 = inlined_call_operand.vmem [shape: f32[1,8], index: 2, kind: input, shape index: {}]   ;;  %s2710_s3 = inlined_call_operand.vmem [shape: bf16[2,196,8], index: 3, kind: output, shape index: {}]  }
   0x1 LB: > { %s1605_s13 = sadd.s32 4294967295, %s2114_s12   ;;  %p1609_p0 = scmp.ge.s32.totalorder %s2114_s12, 1  ;;  %s2114_s12 = sphi %s2139_s12, %s13_s12  }
   0x2   : > { %p137_p1 = scmp.lt.s32.totalorder %s2114_s12, 3 }
   0x4   : > { %p138_p2 = pnand %p1609_p0, %p137_p1 }
   0x6   : > { %141 = sbr.rel (%p138_p2) target bundleno = 447 (0x1bf), region = 32 }
   0xd   : > { %vm307_vm0 = vcmask 1043456   ;;  %v2116_v0 = vmov 0.0   ;;  %v2055_v1 = vld [vmem:[%s2708_s1] sm:$0x1f]   ;;  %vm308_vm1 = vcmask 1044480   ;;  %p161_p3 = scmp.lt.s32.totalorder %s1605_s13, 1 }
   0xe   : > { %1826 = vmatprep.subr.bf16.mxu0 %v2116_v0  ;;  %1880 = vmatprep.subr.bf16.mxu1 %v2116_v0  ;;  %v2117_v2 = vmov 65535   ;;  %vm2118_vm2 = vmmov 0   ;;  %vm267_vm3 = vcmask 72704   ;;  %vm538_vm4 = vcmask 1045504  }
   0xf   : > { %v309_v3 = vsel %vm307_vm0, 4294967295, %v2117_v2  ;;  %1828 = vmatprep.mubr.msk.bf16.mxu0 %vm2118_vm2, %v2116_v0  ;;  %1882 = vmatprep.mubr.msk.bf16.mxu1 %vm2118_vm2, %v2116_v0  ;;  %s2746_s13 = smov (!%p161_p3, %s1605_s13), 1  ;;  %vm1523_vm5 = vcmask 60416   ;;  %vm1548_vm6 = vcmask 58368  }
  0x10   : > { %v310_v4 = vsel %vm308_vm1, %v309_v3, 0  ;;  %s2042_s16 = smul.u32 392, %s2746_s13 }
  0x11   : > { %v312_v5 = vand.u32 %v2055_v1, %v310_v4  ;;  %s2043_s22 = smul.u32 100, %s2746_s13 }
  0x12   : > { %s2162_s19 = scalar_lea.vmem %s2707_s0, %s2042_s16 }
  0x13   : > { %1827 = vmatpush3.bf16.msra.mxu0 %v312_v5  ;;  %1881 = vmatpush3.bf16.msra.mxu1 %v312_v5  ;;  %v2056_v6 = vld [vmem:[%s2162_s19] sm:$0xff]   ;;  %v2058_v8 = vld [vmem:[%s2162_s19 + $0x68] sm:$0xff]   ;;  %v2060_v11 = vld [vmem:[%s2162_s19 + $0x70] sm:$0xff]   ;;  %s2561_s25 = scalar_lea.vmem %s2710_s3, %s2043_s22 }
  0x14   : > { %1934 = vmatprep.subr.bf16.mxu0 %v2116_v0  ;;  %1988 = vmatprep.subr.bf16.mxu1 %v2116_v0  ;;  %v2057_v7 = vld [vmem:[%s2162_s19 + $0x60] sm:$0xfc]   ;;  %v540_v10 = vrot.slane %v2058_v8, 2  ;;  %v2059_v13 = vld [vmem:[%s2162_s19 + $0x8] sm:$0xff]   ;;  %v542_v14 = vrot.slane %v2060_v11, 2  ;;  %v2062_v16 = vld [vmem:[%s2162_s19 + $0x78] sm:$0xff]  }
  0x15   : > { %v539_v9 = vrot.slane %v2057_v7, 2  ;;  %v2061_v17 = vld [vmem:[%s2162_s19 + $0x10] sm:$0xff]   ;;  %v544_v18 = vrot.slane %v2062_v16, 2  ;;  %v2064_v20 = vld [vmem:[%s2162_s19 + $0x80] sm:$0xff]   ;;  %v2063_v21 = vld [vmem:[%s2162_s19 + $0x18] sm:$0xff]  }
  0x16   : > { %1829 = vmatmul.mubr.msk.bf16.vlgmr.msra.gmra.mrb[0].mxu0 %vm267_vm3, %v2056_v6  ;;  %v543_v15 = vsel %vm538_vm4, %v540_v10, %v542_v14  ;;  %v546_v22 = vrot.slane %v2064_v20, 2  ;;  %v2066_v24 = vld [vmem:[%s2162_s19 + $0x88] sm:$0xff]   ;;  %v2065_v25 = vld [vmem:[%s2162_s19 + $0x20] sm:$0xff]   ;;  %v2068_v28 = vld [vmem:[%s2162_s19 + $0x90] sm:$0xff]  }
  0x17   : > { %1935 = vmatpush3.bf16.msra.mxu0 %v312_v5  ;;  %1832 = vmatprep.mubr.msk.bf16.mxu0 %vm2118_vm2, %v2116_v0  ;;  %v541_v12 = vsel %vm538_vm4, %v539_v9, %v540_v10  ;;  %v545_v19 = vsel %vm538_vm4, %v542_v14, %v544_v18  ;;  %v548_v26 = vrot.slane %v2066_v24, 2  ;;  %v2067_v29 = vld [vmem:[%s2162_s19 + $0x28] sm:$0xff]   ;;  %v550_v30 = vrot.slane %v2068_v28, 2  ;;  %v2070_v31 = vld [vmem:[%s2162_s19 + $0x98] sm:$0xff]   ;;  %v2069_v33 = vld [vmem:[%s2162_s19 + $0x30] sm:$0xff]  }
  0x18   : > { %1883 = vmatmul.mubr.msk.bf16.vlgmr.msra.gmra.mrb[0].mxu1 %vm267_vm3, %v541_v12  ;;  %v547_v23 = vsel %vm538_vm4, %v544_v18, %v546_v22  ;;  %v552_v34 = vrot.slane %v2070_v31, 2  ;;  %v2072_v36 = vld [vmem:[%s2162_s19 + $0xa0] sm:$0xff]   ;;  %v2071_v37 = vld [vmem:[%s2162_s19 + $0x38] sm:$0xff]   ;;  %v2074_v40 = vld [vmem:[%s2162_s19 + $0xa8] sm:$0xff]  }
  0x19   : > { %1989 = vmatpush3.bf16.msra.mxu1 %v312_v5  ;;  %1886 = vmatprep.mubr.msk.bf16.mxu1 %vm2118_vm2, %v2116_v0  ;;  %v549_v27 = vsel %vm538_vm4, %v546_v22, %v548_v26  ;;  %v551_v32 = vsel %vm538_vm4, %v548_v26, %v550_v30  ;;  %v554_v38 = vrot.slane %v2072_v36, 2  ;;  %v2073_v41 = vld [vmem:[%s2162_s19 + $0x40] sm:$0xff]   ;;  %v556_v42 = vrot.slane %v2074_v40, 2  ;;  %v2076_v44 = vld [vmem:[%s2162_s19 + $0xb0] sm:$0xff]   ;;  %v2075_v45 = vld [vmem:[%s2162_s19 + $0x48] sm:$0xff]  }
  0x1a   : > { %v553_v35 = vsel %vm538_vm4, %v550_v30, %v552_v34  ;;  %v558_v46 = vrot.slane %v2076_v44, 2  ;;  %v2078_v48 = vld [vmem:[%s2162_s19 + $0xb8] sm:$0xff]   ;;  %v2077_v49 = vld [vmem:[%s2162_s19 + $0x50] sm:$0xff]   ;;  %v2080_v52 = vld [vmem:[%s2162_s19 + $0xc0] ss:$0 sps:$4 sm:$0xff]  }
  0x1b   : > { %v555_v39 = vsel %vm538_vm4, %v552_v34, %v554_v38  ;;  %v557_v43 = vsel %vm538_vm4, %v554_v38, %v556_v42  ;;  %v560_v50 = vrot.slane %v2078_v48, 2  ;;  %v2079_v53 = vld [vmem:[%s2162_s19 + $0x58] sm:$0xff]   ;;  %v562_v54 = vrot.slane %v2080_v52, 2  ;;  %v2081_v56 = vld [vmem:[%s2162_s19 + $0x60] ss:$0 sps:$4 sm:$0x33]  }
  0x1c   : > { %v559_v47 = vsel %vm538_vm4, %v556_v42, %v558_v46  ;;  %v2083_v57 = vld [vmem:[%s2162_s19 + $0x124] sm:$0xfc]   ;;  %v2084_v58 = vld [vmem:[%s2162_s19 + $0x12c] sm:$0xff]   ;;  %v2086_v63 = vld [vmem:[%s2162_s19 + $0x134] sm:$0xff]  }
  0x1d   : > { %v561_v51 = vsel %vm538_vm4, %v558_v46, %v560_v50  ;;  %v563_v55 = vsel %vm538_vm4, %v560_v50, %v562_v54  ;;  %v2082_v59 = vld [vmem:[%s2162_s19 + $0xc4] sm:$0xff]   ;;  %v1115_v60 = vrot.slane %v2083_v57, 2  ;;  %v1116_v61 = vrot.slane %v2084_v58, 2  ;;  %v2085_v1 = vld [vmem:[%s2162_s19 + $0xcc] sm:$0xff]   ;;  %v2088_v4 = vld [vmem:[%s2162_s19 + $0x13c] sm:$0xff]  }
  0x1e   : > { %1833 = vmatmul.mubr.msk.bf16.gmra.mrb[4].mxu0 %vm267_vm3, %v2059_v13  ;;  %v1118_v2 = vrot.slane %v2086_v63, 2  ;;  %v2087_v5 = vld [vmem:[%s2162_s19 + $0xd4] sm:$0xff]   ;;  %v1120_v6 = vrot.slane %v2088_v4, 2  ;;  %v2090_v8 = vld [vmem:[%s2162_s19 + $0x144] sm:$0xff]   ;;  %v2089_v9 = vld [vmem:[%s2162_s19 + $0xdc] sm:$0xff]  }
  0x1f   : > { %1836 = vmatprep.mubr.msk.bf16.mxu0 %vm2118_vm2, %v2116_v0  ;;  %v1117_v62 = vsel %vm538_vm4, %v1115_v60, %v1116_v61  ;;  %v1122_v10 = vrot.slane %v2090_v8, 2  ;;  %v2092_v12 = vld [vmem:[%s2162_s19 + $0x14c] sm:$0xff]   ;;  %v2091_v13 = vld [vmem:[%s2162_s19 + $0xe4] sm:$0xff]   ;;  %v2094_v16 = vld [vmem:[%s2162_s19 + $0x154] sm:$0xff]  }
  0x20   : > { %1887 = vmatmul.mubr.msk.bf16.gmra.mrb[4].mxu1 %vm267_vm3, %v543_v15  ;;  %v1119_v3 = vsel %vm538_vm4, %v1116_v61, %v1118_v2  ;;  %v1121_v7 = vsel %vm538_vm4, %v1118_v2, %v1120_v6  ;;  %v1124_v14 = vrot.slane %v2092_v12, 2  ;;  %v1126_v18 = vrot.slane %v2094_v16, 2  ;;  %v2096_v20 = vld [vmem:[%s2162_s19 + $0x15c] sm:$0xff]   ;;  %v2098_v24 = vld [vmem:[%s2162_s19 + $0x164] sm:$0xff]   ;;  %v2100_v28 = vld [vmem:[%s2162_s19 + $0x16c] sm:$0xff]  }
  0x21   : > { %1890 = vmatprep.mubr.msk.bf16.mxu1 %vm2118_vm2, %v2116_v0  ;;  %v1123_v11 = vsel %vm538_vm4, %v1120_v6, %v1122_v10  ;;  %v1128_v22 = vrot.slane %v2096_v20, 2  ;;  %v1130_v26 = vrot.slane %v2098_v24, 2  ;;  %v1132_v30 = vrot.slane %v2100_v28, 2  ;;  %v2104_v36 = vld [vmem:[%s2162_s19 + $0x17c] sm:$0xff]   ;;  %v2106_v40 = vld [vmem:[%s2162_s19 + $0x184] ss:$0 sps:$4 sm:$0xff]  }
  0x22   : > { %v1125_v15 = vsel %vm538_vm4, %v1122_v10, %v1124_v14  ;;  %v1136_v38 = vrot.slane %v2104_v36, 2  ;;  %v1138_v42 = vrot.slane %v2106_v40, 2  ;;  %v2107_v44 = vld [vmem:[%s2162_s19 + $0x124] ss:$0 sps:$4 sm:$0x33]  }
  0x23   : > { %v1133_v31 = vsel %vm538_vm4, %v1130_v26, %v1132_v30 }
  0x26   : > { %1837 = vmatmul.mubr.msk.bf16.gmra.mrb[8].mxu0 %vm267_vm3, %v2061_v17  ;;  %v2093_v17 = vld [vmem:[%s2162_s19 + $0xec] sm:$0xff]  }
  0x27   : > { %1840 = vmatprep.mubr.msk.bf16.mxu0 %vm2118_vm2, %v2116_v0 }
  0x28   : > { %1891 = vmatmul.mubr.msk.bf16.gmra.mrb[8].mxu1 %vm267_vm3, %v545_v19  ;;  %v1127_v19 = vsel %vm538_vm4, %v1124_v14, %v1126_v18 }
  0x29   : > { %1894 = vmatprep.mubr.msk.bf16.mxu1 %vm2118_vm2, %v2116_v0 }
  0x2e   : > { %1841 = vmatmul.mubr.msk.bf16.gmra.mrb[12].mxu0 %vm267_vm3, %v2063_v21  ;;  %v2095_v21 = vld [vmem:[%s2162_s19 + $0xf4] sm:$0xff]  }
  0x2f   : > { %1844 = vmatprep.mubr.msk.bf16.mxu0 %vm2118_vm2, %v2116_v0 }
  0x30   : > { %1895 = vmatmul.mubr.msk.bf16.gmra.mrb[12].mxu1 %vm267_vm3, %v547_v23  ;;  %v1129_v23 = vsel %vm538_vm4, %v1126_v18, %v1128_v22 }
  0x31   : > { %1898 = vmatprep.mubr.msk.bf16.mxu1 %vm2118_vm2, %v2116_v0 }
  0x36   : > { %1845 = vmatmul.mubr.msk.bf16.gmra.mrb[16].mxu0 %vm267_vm3, %v2065_v25  ;;  %v2097_v25 = vld [vmem:[%s2162_s19 + $0xfc] sm:$0xff]  }
  0x37   : > { %1848 = vmatprep.mubr.msk.bf16.mxu0 %vm2118_vm2, %v2116_v0 }
  0x38   : > { %1899 = vmatmul.mubr.msk.bf16.gmra.mrb[16].mxu1 %vm267_vm3, %v549_v27  ;;  %v1131_v27 = vsel %vm538_vm4, %v1128_v22, %v1130_v26 }
  0x39   : > { %1902 = vmatprep.mubr.msk.bf16.mxu1 %vm2118_vm2, %v2116_v0 }
  0x3e   : > { %1849 = vmatmul.mubr.msk.bf16.gmra.mrb[20].mxu0 %vm267_vm3, %v2067_v29  ;;  %v2099_v29 = vld [vmem:[%s2162_s19 + $0x104] sm:$0xff]  }
  0x3f   : > { %1852 = vmatprep.mubr.msk.bf16.mxu0 %vm2118_vm2, %v2116_v0 }
  0x40   : > { %1903 = vmatmul.mubr.msk.bf16.gmra.mrb[20].mxu1 %vm267_vm3, %v551_v32  ;;  %v2102_v32 = vld [vmem:[%s2162_s19 + $0x174] sm:$0xff]  }
  0x41   : > { %1906 = vmatprep.mubr.msk.bf16.mxu1 %vm2118_vm2, %v2116_v0  ;;  %v1134_v34 = vrot.slane %v2102_v32, 2 }
  0x46   : > { %1853 = vmatmul.mubr.msk.bf16.gmra.mrb[24].mxu0 %vm267_vm3, %v2069_v33  ;;  %v2101_v33 = vld [vmem:[%s2162_s19 + $0x10c] sm:$0xff]  }
  0x47   : > { %1856 = vmatprep.mubr.msk.bf16.mxu0 %vm2118_vm2, %v2116_v0 }
  0x48   : > { %1907 = vmatmul.mubr.msk.bf16.gmra.mrb[24].mxu1 %vm267_vm3, %v553_v35  ;;  %v1135_v35 = vsel %vm538_vm4, %v1132_v30, %v1134_v34 }
  0x49   : > { %1910 = vmatprep.mubr.msk.bf16.mxu1 %vm2118_vm2, %v2116_v0 }
  0x4e   : > { %1857 = vmatmul.mubr.msk.bf16.gmra.mrb[28].mxu0 %vm267_vm3, %v2071_v37  ;;  %v2103_v37 = vld [vmem:[%s2162_s19 + $0x114] sm:$0xff]  }
  0x4f   : > { %1860 = vmatprep.mubr.msk.bf16.mxu0 %vm2118_vm2, %v2116_v0 }
  0x50   : > { %1911 = vmatmul.mubr.msk.bf16.gmra.mrb[28].mxu1 %vm267_vm3, %v555_v39  ;;  %v1137_v39 = vsel %vm538_vm4, %v1134_v34, %v1136_v38 }
  0x51   : > { %1914 = vmatprep.mubr.msk.bf16.mxu1 %vm2118_vm2, %v2116_v0 }
  0x56   : > { %1861 = vmatmul.mubr.msk.bf16.gmra.mrb[32].mxu0 %vm267_vm3, %v2073_v41  ;;  %v2105_v41 = vld [vmem:[%s2162_s19 + $0x11c] sm:$0xff]  }
  0x57   : > { %1864 = vmatprep.mubr.msk.bf16.mxu0 %vm2118_vm2, %v2116_v0 }
  0x58   : > { %1915 = vmatmul.mubr.msk.bf16.gmra.mrb[32].mxu1 %vm267_vm3, %v557_v43  ;;  %v1139_v43 = vsel %vm538_vm4, %v1136_v38, %v1138_v42 }
  0x59   : > { %1918 = vmatprep.mubr.msk.bf16.mxu1 %vm2118_vm2, %v2116_v0 }
  0x5e   : > { %1865 = vmatmul.mubr.msk.bf16.gmra.mrb[36].mxu0 %vm267_vm3, %v2075_v45 }
  0x5f   : > { %1868 = vmatprep.mubr.msk.bf16.mxu0 %vm2118_vm2, %v2116_v0 }
  0x60   : > { %1919 = vmatmul.mubr.msk.bf16.gmra.mrb[36].mxu1 %vm267_vm3, %v559_v47 }
  0x61   : > { %1922 = vmatprep.mubr.msk.bf16.mxu1 %vm2118_vm2, %v2116_v0 }
  0x66   : > { %1869 = vmatmul.mubr.msk.bf16.gmra.mrb[40].mxu0 %vm267_vm3, %v2077_v49 }
  0x67   : > { %1872 = vmatprep.mubr.msk.bf16.mxu0 %vm2118_vm2, %v2116_v0 }
  0x68   : > { %1923 = vmatmul.mubr.msk.bf16.gmra.mrb[40].mxu1 %vm267_vm3, %v561_v51 }
  0x69   : > { %1926 = vmatprep.mubr.msk.bf16.mxu1 %vm2118_vm2, %v2116_v0 }
  0x6e   : > { %1873 = vmatmul.mubr.msk.bf16.gmra.mrb[44].mxu0 %vm267_vm3, %v2079_v53 }
  0x6f   : > { %1876 = vmatprep.mubr.msk.bf16.mxu0 %vm2118_vm2, %v2116_v0 }
  0x70   : > { %1927 = vmatmul.mubr.msk.bf16.gmra.mrb[44].mxu1 %vm267_vm3, %v563_v55 }
  0x71   : > { %1930 = vmatprep.mubr.msk.bf16.mxu1 %vm2118_vm2, %v2116_v0 }
  0x76   : > { %1877 = vmatmul.mubr.msk.bf16.gmra.mrb[48].mxu0 %vm267_vm3, %v2081_v56 }
  0x77   : > { %1936 = vmatprep.mubr.msk.bf16.mxu0 %vm2118_vm2, %v2116_v0 }
  0x78   : > { %1931 = vmatmul.mubr.msk.bf16.gmra.mrb[48].mxu1 %vm267_vm3, %v562_v54 }
  0x79   : > { %1990 = vmatprep.mubr.msk.bf16.mxu1 %vm2118_vm2, %v2116_v0 }
  0x7e   : > { %1937 = vmatmul.mubr.msk.bf16.vlgmr.msra.gmra.mrb[52].mxu0 %vm267_vm3, %v2082_v59 }
  0x7f   : > { %1940 = vmatprep.mubr.msk.bf16.mxu0 %vm2118_vm2, %v2116_v0 }
  0x80   : > { %1991 = vmatmul.mubr.msk.bf16.vlgmr.msra.gmra.mrb[52].mxu1 %vm267_vm3, %v1117_v62 }
  0x81   : > { %1994 = vmatprep.mubr.msk.bf16.mxu1 %vm2118_vm2, %v2116_v0 }
  0x86   : > { %1941 = vmatmul.mubr.msk.bf16.gmra.mrb[56].mxu0 %vm267_vm3, %v2085_v1 }
  0x87   : > { %1944 = vmatprep.mubr.msk.bf16.mxu0 %vm2118_vm2, %v2116_v0 }
  0x88   : > { %1995 = vmatmul.mubr.msk.bf16.gmra.mrb[56].mxu1 %vm267_vm3, %v1119_v3 }
  0x89   : > { %1998 = vmatprep.mubr.msk.bf16.mxu1 %vm2118_vm2, %v2116_v0 }
  0x8e   : > { %1945 = vmatmul.mubr.msk.bf16.gmra.mrb[60].mxu0 %vm267_vm3, %v2087_v5 }
  0x8f   : > { %1948 = vmatprep.mubr.msk.bf16.mxu0 %vm2118_vm2, %v2116_v0 }
  0x90   : > { %1999 = vmatmul.mubr.msk.bf16.gmra.mrb[60].mxu1 %vm267_vm3, %v1121_v7 }
  0x91   : > { %2002 = vmatprep.mubr.msk.bf16.mxu1 %vm2118_vm2, %v2116_v0 }
  0x96   : > { %1949 = vmatmul.mubr.msk.bf16.gmra.mrb[64].mxu0 %vm267_vm3, %v2089_v9 }
  0x97   : > { %1952 = vmatprep.mubr.msk.bf16.mxu0 %vm2118_vm2, %v2116_v0 }
  0x98   : > { %2003 = vmatmul.mubr.msk.bf16.gmra.mrb[64].mxu1 %vm267_vm3, %v1123_v11 }
  0x99   : > { %2006 = vmatprep.mubr.msk.bf16.mxu1 %vm2118_vm2, %v2116_v0 }
  0x9e   : > { %1953 = vmatmul.mubr.msk.bf16.gmra.mrb[68].mxu0 %vm267_vm3, %v2091_v13 }
  0x9f   : > { %1956 = vmatprep.mubr.msk.bf16.mxu0 %vm2118_vm2, %v2116_v0 }
  0xa0   : > { %2007 = vmatmul.mubr.msk.bf16.gmra.mrb[68].mxu1 %vm267_vm3, %v1125_v15 }
  0xa1   : > { %2010 = vmatprep.mubr.msk.bf16.mxu1 %vm2118_vm2, %v2116_v0 }
  0xa6   : > { %1957 = vmatmul.mubr.msk.bf16.gmra.mrb[72].mxu0 %vm267_vm3, %v2093_v17 }
  0xa7   : > { %1960 = vmatprep.mubr.msk.bf16.mxu0 %vm2118_vm2, %v2116_v0 }
  0xa8   : > { %2011 = vmatmul.mubr.msk.bf16.gmra.mrb[72].mxu1 %vm267_vm3, %v1127_v19 }
  0xa9   : > { %2014 = vmatprep.mubr.msk.bf16.mxu1 %vm2118_vm2, %v2116_v0 }
  0xae   : > { %1961 = vmatmul.mubr.msk.bf16.gmra.mrb[76].mxu0 %vm267_vm3, %v2095_v21 }
  0xaf   : > { %1964 = vmatprep.mubr.msk.bf16.mxu0 %vm2118_vm2, %v2116_v0 }
  0xb0   : > { %2015 = vmatmul.mubr.msk.bf16.gmra.mrb[76].mxu1 %vm267_vm3, %v1129_v23 }
  0xb1   : > { %2018 = vmatprep.mubr.msk.bf16.mxu1 %vm2118_vm2, %v2116_v0 }
  0xb6   : > { %1965 = vmatmul.mubr.msk.bf16.gmra.mrb[80].mxu0 %vm267_vm3, %v2097_v25 }
  0xb7   : > { %1968 = vmatprep.mubr.msk.bf16.mxu0 %vm2118_vm2, %v2116_v0 }
  0xb8   : > { %2019 = vmatmul.mubr.msk.bf16.gmra.mrb[80].mxu1 %vm267_vm3, %v1131_v27 }
  0xb9   : > { %2022 = vmatprep.mubr.msk.bf16.mxu1 %vm2118_vm2, %v2116_v0 }
  0xbe   : > { %1969 = vmatmul.mubr.msk.bf16.gmra.mrb[84].mxu0 %vm267_vm3, %v2099_v29 }
  0xbf   : > { %1972 = vmatprep.mubr.msk.bf16.mxu0 %vm2118_vm2, %v2116_v0 }
  0xc0   : > { %2023 = vmatmul.mubr.msk.bf16.gmra.mrb[84].mxu1 %vm267_vm3, %v1133_v31 }
  0xc1   : > { %2026 = vmatprep.mubr.msk.bf16.mxu1 %vm2118_vm2, %v2116_v0 }
  0xc6   : > { %1973 = vmatmul.mubr.msk.bf16.gmra.mrb[88].mxu0 %vm267_vm3, %v2101_v33 }
  0xc7   : > { %1976 = vmatprep.mubr.msk.bf16.mxu0 %vm2118_vm2, %v2116_v0 }
  0xc8   : > { %2027 = vmatmul.mubr.msk.bf16.gmra.mrb[88].mxu1 %vm267_vm3, %v1135_v35 }
  0xc9   : > { %2030 = vmatprep.mubr.msk.bf16.mxu1 %vm2118_vm2, %v2116_v0 }
  0xce   : > { %1977 = vmatmul.mubr.msk.bf16.gmra.mrb[92].mxu0 %vm267_vm3, %v2103_v37 }
  0xcf   : > { %1980 = vmatprep.mubr.msk.bf16.mxu0 %vm2118_vm2, %v2116_v0 }
  0xd0   : > { %2031 = vmatmul.mubr.msk.bf16.gmra.mrb[92].mxu1 %vm267_vm3, %v1137_v39 }
  0xd1   : > { %2034 = vmatprep.mubr.msk.bf16.mxu1 %vm2118_vm2, %v2116_v0 }
  0xd6   : > { %1981 = vmatmul.mubr.msk.bf16.gmra.mrb[96].mxu0 %vm267_vm3, %v2105_v41 }
  0xd7   : > { %1984 = vmatprep.mubr.msk.bf16.mxu0 %vm2118_vm2, %v2116_v0 }
  0xd8   : > { %2035 = vmatmul.mubr.msk.bf16.gmra.mrb[96].mxu1 %vm267_vm3, %v1139_v43 }
  0xd9   : > { %2038 = vmatprep.mubr.msk.bf16.mxu1 %vm2118_vm2, %v2116_v0 }
  0xde   : > { %1985 = vmatmul.mubr.msk.bf16.gmra.mrb[100].mxu0 %vm267_vm3, %v2107_v44 }
  0xe0   : > { %2039 = vmatmul.mubr.msk.bf16.gmra.mrb[100].mxu1 %vm267_vm3, %v1138_v42 }
  0xe9   : > { %v2394_v45 = vpop.f32.mrb[0].mxu0 }
  0xea   : > { %v1830_v46 = vpop.f32.mrb[1].mxu0 }
  0xeb   : > { %v2396_v47 = vpop.f32.mrb[2].mxu0  ;;  %v2398_v49 = vpop.f32.mrb[0].mxu1 }
  0xec   : > { %v1831_v48 = vpop.f32.mrb[3].mxu0  ;;  %v1884_v51 = vpop.f32.mrb[1].mxu1 }
  0xed   : > { %v2402_v52 = vpop.f32.mrb[2].mxu1 }
  0xee   : > { %v1885_v53 = vpop.f32.mrb[3].mxu1 }
  0xf1   : > { %v2406_v54 = vpop.f32.mrb[4].mxu0 }
  0xf2   : > { %v1834_v55 = vpop.f32.mrb[5].mxu0 }
  0xf3   : > { %v2408_v56 = vpop.f32.mrb[6].mxu0  ;;  %v2410_v58 = vpop.f32.mrb[4].mxu1 }
  0xf4   : > { %v1835_v57 = vpop.f32.mrb[7].mxu0  ;;  %v1888_v60 = vpop.f32.mrb[5].mxu1 }
  0xf5   : > { %v2414_v61 = vpop.f32.mrb[6].mxu1 }
  0xf6   : > { %v1889_v63 = vpop.f32.mrb[7].mxu1 }
  0xf9   : > { %v2418_v1 = vpop.f32.mrb[8].mxu0 }
  0xfa   : > { %v1838_v2 = vpop.f32.mrb[9].mxu0 }
  0xfb   : > { %v2420_v3 = vpop.f32.mrb[10].mxu0  ;;  %v2422_v5 = vpop.f32.mrb[8].mxu1 }
  0xfc   : > { %v1839_v4 = vpop.f32.mrb[11].mxu0  ;;  %v1892_v7 = vpop.f32.mrb[9].mxu1 }
  0xfd   : > { %v2426_v8 = vpop.f32.mrb[10].mxu1 }
  0xfe   : > { %v1893_v10 = vpop.f32.mrb[11].mxu1 }
 0x101   : > { %v2430_v11 = vpop.f32.mrb[12].mxu0 }
 0x102   : > { %v1842_v12 = vpop.f32.mrb[13].mxu0 }
 0x103   : > { %v2432_v13 = vpop.f32.mrb[14].mxu0  ;;  %v2434_v15 = vpop.f32.mrb[12].mxu1 }
 0x104   : > { %v1843_v14 = vpop.f32.mrb[15].mxu0  ;;  %v1896_v17 = vpop.f32.mrb[13].mxu1 }
 0x105   : > { %v2438_v18 = vpop.f32.mrb[14].mxu1 }
 0x106   : > { %v1897_v20 = vpop.f32.mrb[15].mxu1 }
 0x109   : > { %v2442_v21 = vpop.f32.mrb[16].mxu0 }
 0x10a   : > { %v1846_v22 = vpop.f32.mrb[17].mxu0 }
 0x10b   : > { %v2444_v23 = vpop.f32.mrb[18].mxu0  ;;  %v2446_v25 = vpop.f32.mrb[16].mxu1 }
 0x10c   : > { %v1847_v24 = vpop.f32.mrb[19].mxu0  ;;  %v1900_v27 = vpop.f32.mrb[17].mxu1 }
 0x10d   : > { %v2450_v28 = vpop.f32.mrb[18].mxu1 }
 0x10e   : > { %v1901_v30 = vpop.f32.mrb[19].mxu1 }
 0x111   : > { %v2454_v31 = vpop.f32.mrb[20].mxu0 }
 0x112   : > { %v1850_v32 = vpop.f32.mrb[21].mxu0 }
 0x113   : > { %v2456_v33 = vpop.f32.mrb[22].mxu0  ;;  %v2458_v35 = vpop.f32.mrb[20].mxu1 }
 0x114   : > { %v1851_v34 = vpop.f32.mrb[23].mxu0  ;;  %v1904_v37 = vpop.f32.mrb[21].mxu1 }
 0x115   : > { %v2462_v38 = vpop.f32.mrb[22].mxu1 }
 0x116   : > { %v1905_v40 = vpop.f32.mrb[23].mxu1 }
 0x119   : > { %v2466_v41 = vpop.f32.mrb[24].mxu0 }
 0x11a   : > { %v1854_v42 = vpop.f32.mrb[25].mxu0 }
 0x11b   : > { %v2468_v43 = vpop.f32.mrb[26].mxu0  ;;  %v2470_v46 = vpop.f32.mrb[24].mxu1 }
 0x11c   : > { %v1855_v44 = vpop.f32.mrb[27].mxu0  ;;  %v1908_v51 = vpop.f32.mrb[25].mxu1 }
 0x11d   : > { %v2474_v53 = vpop.f32.mrb[26].mxu1 }
 0x11e   : > { %v1909_v57 = vpop.f32.mrb[27].mxu1 }
 0x121   : > { %v2478_v60 = vpop.f32.mrb[28].mxu0 }
 0x122   : > { %v1858_v63 = vpop.f32.mrb[29].mxu0 }
 0x123   : > { %v2480_v2 = vpop.f32.mrb[30].mxu0  ;;  %v2482_v7 = vpop.f32.mrb[28].mxu1 }
 0x124   : > { %v1859_v4 = vpop.f32.mrb[31].mxu0  ;;  %v1912_v12 = vpop.f32.mrb[29].mxu1 }
 0x125   : > { %v2486_v14 = vpop.f32.mrb[30].mxu1 }
 0x126   : > { %v1913_v20 = vpop.f32.mrb[31].mxu1 }
 0x129   : > { %v2490_v22 = vpop.f32.mrb[32].mxu0 }
 0x12a   : > { %v1862_v24 = vpop.f32.mrb[33].mxu0 }
 0x12b   : > { %v2492_v27 = vpop.f32.mrb[34].mxu0  ;;  %v2494_v32 = vpop.f32.mrb[32].mxu1 }
 0x12c   : > { %v1863_v30 = vpop.f32.mrb[35].mxu0  ;;  %v1916_v37 = vpop.f32.mrb[33].mxu1 }
 0x12d   : > { %v2498_v40 = vpop.f32.mrb[34].mxu1 }
 0x12e   : > { %v1917_v44 = vpop.f32.mrb[35].mxu1 }
 0x131   : > { %v2502_v51 = vpop.f32.mrb[36].mxu0 }
 0x132   : > { %v1866_v57 = vpop.f32.mrb[37].mxu0 }
 0x133   : > { %v2504_v63 = vpop.f32.mrb[38].mxu0  ;;  %v2506_v12 = vpop.f32.mrb[36].mxu1 }
 0x134   : > { %v1867_v4 = vpop.f32.mrb[39].mxu0  ;;  %v1920_v24 = vpop.f32.mrb[37].mxu1 }
 0x135   : > { %v2510_v30 = vpop.f32.mrb[38].mxu1 }
 0x136   : > { %v1921_v34 = vpop.f32.mrb[39].mxu1 }
 0x139   : > { %v2514_v42 = vpop.f32.mrb[40].mxu0 }
 0x13a   : > { %v1870_v44 = vpop.f32.mrb[41].mxu0 }
 0x13b   : > { %v2516_v17 = vpop.f32.mrb[42].mxu0  ;;  %v2518_v10 = vpop.f32.mrb[40].mxu1 }
 0x13c   : > { %v1871_v57 = vpop.f32.mrb[43].mxu0  ;;  %v1924_v55 = vpop.f32.mrb[41].mxu1 }
 0x13d   : > { %v2522_v20 = vpop.f32.mrb[42].mxu1 }
 0x13e   : > { %v1925_v48 = vpop.f32.mrb[43].mxu1 }
 0x141   : > { %v2526_v37 = vpop.f32.mrb[44].mxu0 }
 0x142   : > { %v1874_v34 = vpop.f32.mrb[45].mxu0 }
 0x143   : > { %v2528_v39 = vpop.f32.mrb[46].mxu0  ;;  %v2530_v36 = vpop.f32.mrb[44].mxu1 }
 0x144   : > { %v1875_v44 = vpop.f32.mrb[47].mxu0  ;;  %v1928_v29 = vpop.f32.mrb[45].mxu1 }
 0x145   : > { %v2534_v4 = vpop.f32.mrb[46].mxu1 }
 0x146   : > { %2714 = vst [vmem:[#allocation2_spill] sm:$0xff] %v2534_v4  ;;  %v1929_v26 = vpop.f32.mrb[47].mxu1 }
 0x149   : > { %v2538_v24 = vpop.f32.mrb[48].mxu0 }
 0x14a   : > { %2715 = vst [vmem:[#allocation3_spill] sm:$0xff] %v2538_v24  ;;  %v1878_v48 = vpop.f32.mrb[49].mxu0 }
 0x14b   : > { %v447_v19 = vpop.f32.mrb[50].mxu0  ;;  %v2540_v16 = vpop.f32.mrb[48].mxu1 }
 0x14c   : > { %v1879_v34 = vpop.f32.mrb[51].mxu0  ;;  %2716 = vst [vmem:[#allocation4_spill] sm:$0xff] %v2540_v16  ;;  %v1932_v9 = vpop.f32.mrb[49].mxu1  ;;  %v2547_v19 = vld [vmem:[%s2709_s2] ss:$0 sm:$0xff] }
 0x14d   : > { %v736_v57 = vpop.f32.mrb[50].mxu1  ;;  %v2717_v34 = vmax.f32 %v2394_v45, %v2398_v49 }
 0x14e   : > { %v1933_v29 = vpop.f32.mrb[51].mxu1 }
 0x151   : > { %v925_v6 = vpop.f32.mrb[52].mxu0 }
 0x152   : > { %v1938_v62 = vpop.f32.mrb[53].mxu0 }
 0x153   : > { %v928_v59 = vpop.f32.mrb[54].mxu0  ;;  %v1213_v55 = vpop.f32.mrb[52].mxu1 }
 0x154   : > { %v1939_v0 = vpop.f32.mrb[55].mxu0  ;;  %v1315_v26 = vmax.f32 %v925_v6, %v1213_v55  ;;  %v1992_v50 = vpop.f32.mrb[53].mxu1 }
 0x155   : > { %v1216_v48 = vpop.f32.mrb[54].mxu1  ;;  %v2718_v50 = vmax.f32 %v2396_v47, %v2402_v52 }
 0x156   : > { %v1340_v9 = vmax.f32 %v2717_v34, %v1315_v26  ;;  %v1316_v44 = vmax.f32 %v928_v59, %v1216_v48  ;;  %v1993_v57 = vpop.f32.mrb[55].mxu1 }
 0x158   : > { %v1372_v0 = vadd.f32 %v2547_v19, %v1340_v9  ;;  %v1341_v6 = vmax.f32 %v2718_v50, %v1316_v44 }
 0x159   : > { %v933_v29 = vpop.f32.mrb[56].mxu0 }
 0x15a   : > { %v1942_v62 = vpop.f32.mrb[57].mxu0  ;;  %v1397_v24 = vmax.f32 %v1372_v0, 0.0  ;;  %v1373_v4 = vadd.f32 %v2547_v19, %v1341_v6 }
 0x15b   : > { %v936_v55 = vpop.f32.mrb[58].mxu0  ;;  %v1221_v45 = vpop.f32.mrb[56].mxu1 }
 0x15c   : > { %v1943_v16 = vpop.f32.mrb[59].mxu0  ;;  %v1745_v49 = vpack.c.bf16 %v1397_v24, %v1397_v24  ;;  %v1398_v59 = vmax.f32 %v1373_v4, 0.0  ;;  %v1317_v26 = vmax.f32 %v933_v29, %v1221_v45  ;;  %v1996_v48 = vpop.f32.mrb[57].mxu1  ;;  %v2720_v4 = vmax.f32 %v2408_v56, %v2414_v61 }
 0x15d   : > { %v1224_v47 = vpop.f32.mrb[58].mxu1  ;;  %v2719_v16 = vmax.f32 %v2406_v54, %v2410_v58 }
 0x15e   : > { %1524 = vst.msk [vmem:[%s2561_s25] sm:$0xf] %vm1523_vm5, %v1745_v49  ;;  %v1746_v52 = vpack.c.bf16 %v1398_v59, %v1398_v59  ;;  %v1318_v34 = vmax.f32 %v936_v55, %v1224_v47  ;;  %v1997_v9 = vpop.f32.mrb[59].mxu1  ;;  %v2721_v47 = vmax.f32 %v2418_v1, %v2422_v5 }
 0x15f   : > { %v1342_v44 = vmax.f32 %v2719_v16, %v1317_v26  ;;  %v2722_v9 = vmax.f32 %v2420_v3, %v2426_v8 }
 0x160   : > { %1525 = vst.msk [vmem:[%s2561_s25 + $0x4] sm:$0xf] %vm1523_vm5, %v1746_v52  ;;  %v1343_v29 = vmax.f32 %v2720_v4, %v1318_v34 }
 0x161   : > { %v941_v57 = vpop.f32.mrb[60].mxu0  ;;  %v1374_v24 = vadd.f32 %v2547_v19, %v1342_v44 }
 0x162   : > { %v1946_v62 = vpop.f32.mrb[61].mxu0  ;;  %v1375_v54 = vadd.f32 %v2547_v19, %v1343_v29 }
 0x163   : > { %v944_v0 = vpop.f32.mrb[62].mxu0  ;;  %v1399_v6 = vmax.f32 %v1374_v24, 0.0  ;;  %v1229_v58 = vpop.f32.mrb[60].mxu1 }
 0x164   : > { %v1947_v50 = vpop.f32.mrb[63].mxu0  ;;  %v1400_v45 = vmax.f32 %v1375_v54, 0.0  ;;  %v1319_v49 = vmax.f32 %v941_v57, %v1229_v58  ;;  %v2000_v59 = vpop.f32.mrb[61].mxu1 }
 0x165   : > { %v1747_v55 = vpack.c.bf16 %v1399_v6, %v1399_v6  ;;  %v1232_v26 = vpop.f32.mrb[62].mxu1 }
 0x166   : > { %v1748_v48 = vpack.c.bf16 %v1400_v45, %v1400_v45  ;;  %v1344_v56 = vmax.f32 %v2721_v47, %v1319_v49  ;;  %v1320_v61 = vmax.f32 %v944_v0, %v1232_v26  ;;  %v2001_v52 = vpop.f32.mrb[63].mxu1 }
 0x167   : > { %1526 = vst.msk [vmem:[%s2561_s25 + $0x8] sm:$0xf] %vm1523_vm5, %v1747_v55  ;;  %v2723_v55 = vmax.f32 %v2430_v11, %v2434_v15 }
 0x168   : > { %1527 = vst.msk [vmem:[%s2561_s25 + $0xc] sm:$0xf] %vm1523_vm5, %v1748_v48  ;;  %v1376_v34 = vadd.f32 %v2547_v19, %v1344_v56  ;;  %v1345_v57 = vmax.f32 %v2722_v9, %v1320_v61  ;;  %v2724_v48 = vmax.f32 %v2432_v13, %v2438_v18 }
 0x169   : > { %v949_v16 = vpop.f32.mrb[64].mxu0 }
 0x16a   : > { %v1950_v44 = vpop.f32.mrb[65].mxu0  ;;  %v1401_v4 = vmax.f32 %v1376_v34, 0.0  ;;  %v1377_v1 = vadd.f32 %v2547_v19, %v1345_v57 }
 0x16b   : > { %v952_v62 = vpop.f32.mrb[66].mxu0  ;;  %v1237_v5 = vpop.f32.mrb[64].mxu1 }
 0x16c   : > { %v1951_v24 = vpop.f32.mrb[67].mxu0  ;;  %v1749_v29 = vpack.c.bf16 %v1401_v4, %v1401_v4  ;;  %v1402_v0 = vmax.f32 %v1377_v1, 0.0  ;;  %v1321_v50 = vmax.f32 %v949_v16, %v1237_v5  ;;  %v2004_v6 = vpop.f32.mrb[65].mxu1 }
 0x16d   : > { %v1240_v54 = vpop.f32.mrb[66].mxu1  ;;  %v2725_v24 = vmax.f32 %v2442_v21, %v2446_v25 }
 0x16e   : > { %1528 = vst.msk [vmem:[%s2561_s25 + $0x10] sm:$0xf] %vm1523_vm5, %v1749_v29  ;;  %v1750_v58 = vpack.c.bf16 %v1402_v0, %v1402_v0  ;;  %v1346_v3 = vmax.f32 %v2723_v55, %v1321_v50  ;;  %v1322_v8 = vmax.f32 %v952_v62, %v1240_v54  ;;  %v2005_v45 = vpop.f32.mrb[67].mxu1  ;;  %v2726_v0 = vmax.f32 %v2444_v23, %v2450_v28 }
 0x170   : > { %1529 = vst.msk [vmem:[%s2561_s25 + $0x14] sm:$0xf] %vm1523_vm5, %v1750_v58  ;;  %v1378_v26 = vadd.f32 %v2547_v19, %v1346_v3  ;;  %v1347_v47 = vmax.f32 %v2724_v48, %v1322_v8 }
 0x171   : > { %v957_v49 = vpop.f32.mrb[68].mxu0 }
 0x172   : > { %v1954_v59 = vpop.f32.mrb[69].mxu0  ;;  %v1403_v52 = vmax.f32 %v1378_v26, 0.0  ;;  %v1379_v11 = vadd.f32 %v2547_v19, %v1347_v47  ;;  %v2727_v26 = vmax.f32 %v2454_v31, %v2458_v35 }
 0x173   : > { %v960_v56 = vpop.f32.mrb[70].mxu0  ;;  %v1245_v15 = vpop.f32.mrb[68].mxu1 }
 0x174   : > { %v1955_v61 = vpop.f32.mrb[71].mxu0  ;;  %v1751_v16 = vpack.c.bf16 %v1403_v52, %v1403_v52  ;;  %v1404_v44 = vmax.f32 %v1379_v11, 0.0  ;;  %v1323_v34 = vmax.f32 %v957_v49, %v1245_v15  ;;  %v2008_v9 = vpop.f32.mrb[69].mxu1  ;;  %v2728_v52 = vmax.f32 %v2456_v33, %v2462_v38 }
 0x175   : > { %v1248_v57 = vpop.f32.mrb[70].mxu1 }
 0x176   : > { %1530 = vst.msk [vmem:[%s2561_s25 + $0x18] sm:$0xf] %vm1523_vm5, %v1751_v16  ;;  %v1752_v62 = vpack.c.bf16 %v1404_v44, %v1404_v44  ;;  %v1348_v13 = vmax.f32 %v2725_v24, %v1323_v34  ;;  %v1324_v18 = vmax.f32 %v960_v56, %v1248_v57  ;;  %v2009_v4 = vpop.f32.mrb[71].mxu1 }
 0x178   : > { %1531 = vst.msk [vmem:[%s2561_s25 + $0x1c] sm:$0xf] %vm1523_vm5, %v1752_v62  ;;  %v1380_v29 = vadd.f32 %v2547_v19, %v1348_v13  ;;  %v1349_v50 = vmax.f32 %v2726_v0, %v1324_v18  ;;  %v2729_v18 = vmax.f32 %v2466_v41, %v2470_v46  ;;  %v2730_v0 = vmax.f32 %v2468_v43, %v2474_v53 }
 0x179   : > { %v965_v1 = vpop.f32.mrb[72].mxu0 }
 0x17a   : > { %v1958_v5 = vpop.f32.mrb[73].mxu0  ;;  %v1405_v58 = vmax.f32 %v1380_v29, 0.0  ;;  %v1381_v21 = vadd.f32 %v2547_v19, %v1349_v50 }
 0x17b   : > { %v968_v6 = vpop.f32.mrb[74].mxu0  ;;  %v1253_v25 = vpop.f32.mrb[72].mxu1 }
 0x17c   : > { %v1959_v54 = vpop.f32.mrb[75].mxu0  ;;  %v1753_v55 = vpack.c.bf16 %v1405_v58, %v1405_v58  ;;  %v1406_v3 = vmax.f32 %v1381_v21, 0.0  ;;  %v1325_v8 = vmax.f32 %v965_v1, %v1253_v25  ;;  %v2012_v45 = vpop.f32.mrb[73].mxu1 }
 0x17d   : > { %v1256_v49 = vpop.f32.mrb[74].mxu1 }
 0x17e   : > { %1532 = vst.msk [vmem:[%s2561_s25 + $0x20] sm:$0xf] %vm1523_vm5, %v1753_v55  ;;  %v1754_v59 = vpack.c.bf16 %v1406_v3, %v1406_v3  ;;  %v1350_v23 = vmax.f32 %v2727_v26, %v1325_v8  ;;  %v1326_v28 = vmax.f32 %v968_v6, %v1256_v49  ;;  %v2013_v48 = vpop.f32.mrb[75].mxu1  ;;  %v2731_v49 = vmax.f32 %v2478_v60, %v2482_v7 }
 0x17f   : > { %v2732_v48 = vmax.f32 %v2480_v2, %v2486_v14 }
 0x180   : > { %1533 = vst.msk [vmem:[%s2561_s25 + $0x24] sm:$0xf] %vm1523_vm5, %v1754_v59  ;;  %v1382_v61 = vadd.f32 %v2547_v19, %v1350_v23  ;;  %v1351_v11 = vmax.f32 %v2728_v52, %v1326_v28 }
 0x181   : > { %v973_v47 = vpop.f32.mrb[76].mxu0 }
 0x182   : > { %v1962_v56 = vpop.f32.mrb[77].mxu0  ;;  %v1407_v44 = vmax.f32 %v1382_v61, 0.0  ;;  %v1383_v31 = vadd.f32 %v2547_v19, %v1351_v11 }
 0x183   : > { %v976_v15 = vpop.f32.mrb[78].mxu0  ;;  %v1261_v35 = vpop.f32.mrb[76].mxu1 }
 0x184   : > { %v1963_v16 = vpop.f32.mrb[79].mxu0  ;;  %v1755_v34 = vpack.c.bf16 %v1407_v44, %v1407_v44  ;;  %v1408_v9 = vmax.f32 %v1383_v31, 0.0  ;;  %v1327_v57 = vmax.f32 %v973_v47, %v1261_v35  ;;  %v2016_v62 = vpop.f32.mrb[77].mxu1 }
 0x185   : > { %v1264_v24 = vpop.f32.mrb[78].mxu1 }
 0x186   : > { %1534 = vst.msk [vmem:[%s2561_s25 + $0x28] sm:$0xf] %vm1523_vm5, %v1755_v34  ;;  %v1756_v13 = vpack.c.bf16 %v1408_v9, %v1408_v9  ;;  %v1352_v33 = vmax.f32 %v2729_v18, %v1327_v57  ;;  %v1328_v38 = vmax.f32 %v976_v15, %v1264_v24  ;;  %v2017_v4 = vpop.f32.mrb[79].mxu1  ;;  %v2733_v34 = vmax.f32 %v2490_v22, %v2494_v32 }
 0x188   : > { %1535 = vst.msk [vmem:[%s2561_s25 + $0x2c] sm:$0xf] %vm1523_vm5, %v1756_v13  ;;  %v1384_v29 = vadd.f32 %v2547_v19, %v1352_v33  ;;  %v1353_v50 = vmax.f32 %v2730_v0, %v1328_v38  ;;  %v2734_v13 = vmax.f32 %v2492_v27, %v2498_v40 }
 0x189   : > { %v981_v1 = vpop.f32.mrb[80].mxu0 }
 0x18a   : > { %v1966_v5 = vpop.f32.mrb[81].mxu0  ;;  %v1409_v58 = vmax.f32 %v1384_v29, 0.0  ;;  %v1385_v41 = vadd.f32 %v2547_v19, %v1353_v50 }
 0x18b   : > { %v984_v6 = vpop.f32.mrb[82].mxu0  ;;  %v1269_v46 = vpop.f32.mrb[80].mxu1 }
 0x18c   : > { %v1967_v54 = vpop.f32.mrb[83].mxu0  ;;  %v1757_v21 = vpack.c.bf16 %v1409_v58, %v1409_v58  ;;  %v1410_v25 = vmax.f32 %v1385_v41, 0.0  ;;  %v1329_v55 = vmax.f32 %v981_v1, %v1269_v46  ;;  %v2020_v3 = vpop.f32.mrb[81].mxu1 }
 0x18d   : > { %v1272_v8 = vpop.f32.mrb[82].mxu1  ;;  %v2735_v54 = vmax.f32 %v2502_v51, %v2506_v12 }
 0x18e   : > { %1536 = vst.msk [vmem:[%s2561_s25 + $0x30] sm:$0xf] %vm1523_vm5, %v1757_v21  ;;  %v1758_v45 = vpack.c.bf16 %v1410_v25, %v1410_v25  ;;  %v1354_v43 = vmax.f32 %v2731_v49, %v1329_v55  ;;  %v1330_v53 = vmax.f32 %v984_v6, %v1272_v8  ;;  %v2021_v59 = vpop.f32.mrb[83].mxu1  ;;  %v2736_v25 = vmax.f32 %v2504_v63, %v2510_v30 }
 0x190   : > { %1537 = vst.msk [vmem:[%s2561_s25 + $0x34] sm:$0xf] %vm1523_vm5, %v1758_v45  ;;  %v1386_v28 = vadd.f32 %v2547_v19, %v1354_v43  ;;  %v1355_v47 = vmax.f32 %v2732_v48, %v1330_v53 }
 0x191   : > { %v989_v26 = vpop.f32.mrb[84].mxu0 }
 0x192   : > { %v1970_v23 = vpop.f32.mrb[85].mxu0  ;;  %v1411_v52 = vmax.f32 %v1386_v28, 0.0  ;;  %v1387_v60 = vadd.f32 %v2547_v19, %v1355_v47  ;;  %v2737_v28 = vmax.f32 %v2514_v42, %v2518_v10 }
 0x193   : > { %v992_v56 = vpop.f32.mrb[86].mxu0  ;;  %v1277_v7 = vpop.f32.mrb[84].mxu1 }
 0x194   : > { %v1971_v61 = vpop.f32.mrb[87].mxu0  ;;  %v1759_v11 = vpack.c.bf16 %v1411_v52, %v1411_v52  ;;  %v1412_v15 = vmax.f32 %v1387_v60, 0.0  ;;  %v1331_v16 = vmax.f32 %v989_v26, %v1277_v7  ;;  %v2024_v44 = vpop.f32.mrb[85].mxu1  ;;  %v2738_v52 = vmax.f32 %v2516_v17, %v2522_v20 }
 0x195   : > { %v1280_v31 = vpop.f32.mrb[86].mxu1 }
 0x196   : > { %1538 = vst.msk [vmem:[%s2561_s25 + $0x38] sm:$0xf] %vm1523_vm5, %v1759_v11  ;;  %v1760_v35 = vpack.c.bf16 %v1412_v15, %v1412_v15  ;;  %v1356_v2 = vmax.f32 %v2733_v34, %v1331_v16  ;;  %v1332_v14 = vmax.f32 %v992_v56, %v1280_v31  ;;  %v2025_v9 = vpop.f32.mrb[87].mxu1 }
 0x198   : > { %1539 = vst.msk [vmem:[%s2561_s25 + $0x3c] sm:$0xf] %vm1523_vm5, %v1760_v35  ;;  %v1388_v24 = vadd.f32 %v2547_v19, %v1356_v2  ;;  %v1357_v18 = vmax.f32 %v2734_v13, %v1332_v14  ;;  %v2739_v14 = vmax.f32 %v2526_v37, %v2530_v36  ;;  %v2740_v13 = vld [vmem:[#allocation2_spill] sm:$0xff] }
 0x199   : > { %v997_v57 = vpop.f32.mrb[88].mxu0 }
 0x19a   : > { %v1974_v62 = vpop.f32.mrb[89].mxu0  ;;  %v1413_v4 = vmax.f32 %v1388_v24, 0.0  ;;  %v1389_v22 = vadd.f32 %v2547_v19, %v1357_v18  ;;  %v2741_v18 = vmax.f32 %v2528_v39, %v2740_v13 }
 0x19b   : > { %v1000_v33 = vpop.f32.mrb[90].mxu0  ;;  %v1285_v32 = vpop.f32.mrb[88].mxu1 }
 0x19c   : > { %v1975_v38 = vpop.f32.mrb[91].mxu0  ;;  %v1761_v1 = vpack.c.bf16 %v1413_v4, %v1413_v4  ;;  %v1414_v5 = vmax.f32 %v1389_v22, 0.0  ;;  %v1333_v29 = vmax.f32 %v997_v57, %v1285_v32  ;;  %v2028_v0 = vpop.f32.mrb[89].mxu1 }
 0x19d   : > { %v1288_v50 = vpop.f32.mrb[90].mxu1 }
 0x19e   : > { %1540 = vst.msk [vmem:[%s2561_s25 + $0x40] sm:$0xf] %vm1523_vm5, %v1761_v1  ;;  %v1762_v6 = vpack.c.bf16 %v1414_v5, %v1414_v5  ;;  %v1358_v27 = vmax.f32 %v2735_v54, %v1333_v29  ;;  %v1334_v40 = vmax.f32 %v1000_v33, %v1288_v50  ;;  %v2029_v58 = vpop.f32.mrb[91].mxu1  ;;  %v2743_v54 = vld [vmem:[#allocation4_spill] sm:$0xff] }
 0x1a0   : > { %1541 = vst.msk [vmem:[%s2561_s25 + $0x44] sm:$0xf] %vm1523_vm5, %v1762_v6  ;;  %v1390_v21 = vadd.f32 %v2547_v19, %v1358_v27  ;;  %v1359_v55 = vmax.f32 %v2736_v25, %v1334_v40  ;;  %v2742_v6 = vld [vmem:[#allocation3_spill] sm:$0xff] }
 0x1a1   : > { %v1005_v41 = vpop.f32.mrb[92].mxu0  ;;  %v2744_v39 = vmax.f32 %v2742_v6, %v2743_v54 }
 0x1a2   : > { %v1978_v46 = vpop.f32.mrb[93].mxu0  ;;  %v1415_v45 = vmax.f32 %v1390_v21, 0.0  ;;  %v1391_v51 = vadd.f32 %v2547_v19, %v1359_v55 }
 0x1a3   : > { %v1008_v3 = vpop.f32.mrb[94].mxu0  ;;  %v1293_v12 = vpop.f32.mrb[92].mxu1 }
 0x1a4   : > { %v1979_v8 = vpop.f32.mrb[95].mxu0  ;;  %v1763_v49 = vpack.c.bf16 %v1415_v45, %v1415_v45  ;;  %v1416_v43 = vmax.f32 %v1391_v51, 0.0  ;;  %v1335_v53 = vmax.f32 %v1005_v41, %v1293_v12  ;;  %v2032_v59 = vpop.f32.mrb[93].mxu1 }
 0x1a5   : > { %v1296_v26 = vpop.f32.mrb[94].mxu1 }
 0x1a6   : > { %1542 = vst.msk [vmem:[%s2561_s25 + $0x48] sm:$0xf] %vm1523_vm5, %v1763_v49  ;;  %v1764_v23 = vpack.c.bf16 %v1416_v43, %v1416_v43  ;;  %v1360_v63 = vmax.f32 %v2737_v28, %v1335_v53  ;;  %v1336_v30 = vmax.f32 %v1008_v3, %v1296_v26  ;;  %v2033_v48 = vpop.f32.mrb[95].mxu1 }
 0x1a8   : > { %1543 = vst.msk [vmem:[%s2561_s25 + $0x4c] sm:$0xf] %vm1523_vm5, %v1764_v23  ;;  %v1392_v61 = vadd.f32 %v2547_v19, %v1360_v63  ;;  %v1361_v60 = vmax.f32 %v2738_v52, %v1336_v30 }
 0x1a9   : > { %v1013_v47 = vpop.f32.mrb[96].mxu0 }
 0x1aa   : > { %v1982_v56 = vpop.f32.mrb[97].mxu0  ;;  %v1417_v15 = vmax.f32 %v1392_v61, 0.0  ;;  %v1393_v10 = vadd.f32 %v2547_v19, %v1361_v60 }
 0x1ab   : > { %v1016_v7 = vpop.f32.mrb[98].mxu0  ;;  %v1301_v42 = vpop.f32.mrb[96].mxu1 }
 0x1ac   : > { %v1983_v11 = vpop.f32.mrb[99].mxu0  ;;  %v1765_v16 = vpack.c.bf16 %v1417_v15, %v1417_v15  ;;  %v1418_v44 = vmax.f32 %v1393_v10, 0.0  ;;  %v1337_v31 = vmax.f32 %v1013_v47, %v1301_v42  ;;  %v2036_v35 = vpop.f32.mrb[97].mxu1 }
 0x1ad   : > { %v1304_v34 = vpop.f32.mrb[98].mxu1 }
 0x1ae   : > { %1544 = vst.msk [vmem:[%s2561_s25 + $0x50] sm:$0xf] %vm1523_vm5, %v1765_v16  ;;  %v1766_v2 = vpack.c.bf16 %v1418_v44, %v1418_v44  ;;  %v1362_v17 = vmax.f32 %v2739_v14, %v1337_v31  ;;  %v1338_v20 = vmax.f32 %v1016_v7, %v1304_v34  ;;  %v2037_v9 = vpop.f32.mrb[99].mxu1 }
 0x1b0   : > { %1545 = vst.msk [vmem:[%s2561_s25 + $0x54] sm:$0xf] %vm1523_vm5, %v1766_v2  ;;  %v1394_v24 = vadd.f32 %v2547_v19, %v1362_v17  ;;  %v1363_v33 = vmax.f32 %v2741_v18, %v1338_v20 }
 0x1b1   : > { %v1021_v57 = vpop.f32.mrb[100].mxu0 }
 0x1b2   : > { %v1986_v62 = vpop.f32.mrb[101].mxu0  ;;  %v1419_v22 = vmax.f32 %v1394_v24, 0.0  ;;  %v1395_v36 = vadd.f32 %v2547_v19, %v1363_v33 }
 0x1b3   : > { %v1024_v38 = vpop.f32.mrb[102].mxu0  ;;  %v1309_v37 = vpop.f32.mrb[100].mxu1 }
 0x1b4   : > { %v1987_v4 = vpop.f32.mrb[103].mxu0  ;;  %v1767_v32 = vpack.c.bf16 %v1419_v22, %v1419_v22  ;;  %v1420_v1 = vmax.f32 %v1395_v36, 0.0  ;;  %v1339_v5 = vmax.f32 %v1021_v57, %v1309_v37  ;;  %v2040_v29 = vpop.f32.mrb[101].mxu1 }
 0x1b5   : > { %v1312_v0 = vpop.f32.mrb[102].mxu1 }
 0x1b6   : > { %1546 = vst.msk [vmem:[%s2561_s25 + $0x58] sm:$0xf] %vm1523_vm5, %v1767_v32  ;;  %v1768_v50 = vpack.c.bf16 %v1420_v1, %v1420_v1  ;;  %v1364_v27 = vmax.f32 %v2744_v39, %v1339_v5  ;;  %v2041_v40 = vpop.f32.mrb[103].mxu1 }
 0x1b8   : > { %1547 = vst.msk [vmem:[%s2561_s25 + $0x5c] sm:$0xf] %vm1523_vm5, %v1768_v50  ;;  %v1396_v58 = vadd.f32 %v2547_v19, %v1364_v27 }
 0x1ba   : > { %v1421_v41 = vmax.f32 %v1396_v58, 0.0 }
 0x1bc   : > { %v1769_v46 = vpack.c.bf16 %v1421_v41, %v1421_v41 }
 0x1be   : > { %1549 = vst.msk [vmem:[%s2561_s25 + $0x60] sm:$0x3] %vm1548_vm6, %v1769_v46 }
 0x1bf PF: > { %s13_s12 = sadd.s32 1, %s2114_s12  }
 0x1c0   : > { %p10_p4 = scmp.ge.s32.totalorder %s13_s12, 4  }
 0x1c2   :  { %12 = sbr.rel (!%p10_p4) target bundleno = 1 (0x1), region = 62 }

// kernel: cnn_forward.5
= control target key start
LH: loop header
LB: loop body
LE: loop exit
PB: predicated region body
PF: predicated region fallthrough
CT: control target
= control target key end

     0   :  { %s1209_s12 = smov 0   ;;  %s1541_s0 = inlined_call_operand.vmem [shape: bf16[2,196,200], index: 0, kind: input, shape index: {}]   ;;  %s1542_s1 = inlined_call_operand.vmem [shape: bf16[200,32], index: 1, kind: input, shape index: {}]   ;;  %s1543_s2 = inlined_call_operand.vmem [shape: f32[1,32], index: 2, kind: input, shape index: {}]   ;;  %s1544_s3 = inlined_call_operand.vmem [shape: bf16[2,49,32], index: 3, kind: output, shape index: {}]  }
   0x1 LB: > { %s1027_s13 = sadd.s32 4294967295, %s1186_s12   ;;  %p1031_p0 = scmp.ge.s32.totalorder %s1186_s12, 1  ;;  %s1186_s12 = sphi %s1209_s12, %s13_s12  }
   0x2   : > { %p137_p1 = scmp.lt.s32.totalorder %s1186_s12, 3 }
   0x4   : > { %p138_p2 = pnand %p1031_p0, %p137_p1 }
   0x5   : > { %v1220_v0 = vld [vmem:[%s1542_s1] sm:$0xff] (!%p138_p2)   ;;  %v1188_v1 = vmov (!%p138_p2), 0   ;;  %v1229_v2 = vld [vmem:[%s1542_s1 + $0x8] sm:$0xff] (!%p138_p2)   ;;  %p161_p3 = scmp.lt.s32.totalorder (!%p138_p2), %s1027_s13, 1  ;;  %v1240_v3 = vld [vmem:[%s1542_s1 + $0x10] sm:$0xff] (!%p138_p2)   ;;  %vm312_vm0 = vcmask (!%p138_p2), 588800  }
   0x6   : > { %141 = sbr.rel (%p138_p2) target bundleno = 358 (0x166), region = 32  ;;  %329 = vmatprep.subr.bf16.mxu0 (!%p138_p2), %v1188_v1  ;;  %506 = vmatprep.subr.bf16.mxu1 (!%p138_p2), %v1188_v1  ;;  %v1250_v4 = vld [vmem:[%s1542_s1 + $0x18] sm:$0xff] (!%p138_p2)   ;;  %v1262_v5 = vld [vmem:[%s1542_s1 + $0x20] sm:$0xff] (!%p138_p2)   ;;  %v1280_v12 = vld [vmem:[%s1542_s1 + $0x28] sm:$0xff] (!%p138_p2)   ;;  %vm429_vm1 = vsmask.f32 (!%p138_p2), 7424 }
   0x7   : > { %330 = vmatpush1.bf16.msra.mxu0 (!%p138_p2), %v1220_v0  ;;  %507 = vmatpush1.bf16.msra.mxu1 (!%p138_p2), %v1220_v0  ;;  %v1289_v16 = vld [vmem:[%s1542_s1 + $0x30] sm:$0xff] (!%p138_p2)   ;;  %v1300_v18 = vld [vmem:[%s1542_s1 + $0x38] sm:$0xff] (!%p138_p2)   ;;  %v1309_v19 = vld [vmem:[%s1542_s1 + $0x40] sm:$0xff] (!%p138_p2)   ;;  %vm325_vm2 = vcmask (!%p138_p2), 1043456   ;;  %vm613_vm3 = vcmask (!%p138_p2), 1046528   ;;  %vm959_vm5 = vcmask (!%p138_p2), 257024  }
   0x8   : > { %331 = vmatprep.subr.bf16.mxu0 (!%p138_p2), %v1188_v1  ;;  %508 = vmatprep.subr.bf16.mxu1 (!%p138_p2), %v1188_v1  ;;  %v1318_v20 = vld [vmem:[%s1542_s1 + $0x48] sm:$0xff] (!%p138_p2)   ;;  %v1328_v22 = vld [vmem:[%s1542_s1 + $0x50] sm:$0xff] (!%p138_p2)   ;;  %v1339_v26 = vld [vmem:[%s1542_s1 + $0x58] sm:$0xff] (!%p138_p2)   ;;  %vm744_vm4 = vsmask.f32 (!%p138_p2), 6400  ;;  %vm966_vm6 = vcmask (!%p138_p2), 253952  }
   0x9   : > { %v1135_v30 = vld [vmem:[%s1542_s1 + $0x60] ss:$0 sps:$4 sm:$0xff] (!%p138_p2)   ;;  %vm967_vm7 = vsmask.f32 (!%p138_p2), 256 }
   0xa   : > { %v1353_v37 = vsel (!%p138_p2), %vm325_vm2, %v1135_v30, 0  ;;  %vm968_vm8 = vmand (!%p138_p2), %vm966_vm6, %vm967_vm7 }
   0xb   : > { %332 = vmatpush1.bf16.msra.mxu0 (!%p138_p2), %v1229_v2  ;;  %509 = vmatpush1.bf16.msra.mxu1 (!%p138_p2), %v1229_v2 }
   0xc   : > { %333 = vmatprep.subr.bf16.mxu0 (!%p138_p2), %v1188_v1  ;;  %510 = vmatprep.subr.bf16.mxu1 (!%p138_p2), %v1188_v1 }
   0xd   : > { %s1546_s13 = smov (!%p161_p3, %s1027_s13), 1 }
   0xe   : > { %s1112_s20 = smul.u32 200, %s1546_s13 }
   0xf   : > { %334 = vmatpush1.bf16.msra.mxu0 %v1240_v3  ;;  %511 = vmatpush1.bf16.msra.mxu1 %v1240_v3  ;;  %s1113_s21 = smul.u32 28, %s1546_s13 }
  0x10   : > { %335 = vmatprep.subr.bf16.mxu0 %v1188_v1  ;;  %512 = vmatprep.subr.bf16.mxu1 %v1188_v1  ;;  %s1257_s25 = scalar_lea.vmem %s1541_s0, %s1112_s20 }
  0x11   : > { %v1138_v6 = vld [vmem:[%s1257_s25 + $0x4] ss:$8 sps:$4 sm:$0xff]   ;;  %v1139_v7 = vld [vmem:[%s1257_s25 + $0x34] ss:$8 sps:$4 sm:$0xff]   ;;  %v1143_v21 = vld [vmem:[%s1257_s25 + $0x30] ss:$8 sps:$4 sm:$0xff]   ;;  %s1508_s24 = scalar_lea.vmem %s1544_s3, %s1113_s21 }
  0x12   : > { %v1271_v8 = vld [vmem:[%s1257_s25 + $0x44] ss:$8 sps:$4 sm:$0xff]   ;;  %1055 = vmatprep.mubr.msk.bf16.mxu0 %vm312_vm0, %v1138_v6  ;;  %v443_v9 = vshrl.u32 %v1139_v7, 16  ;;  %v445_v10 = vshll.u32 %v1139_v7, 16  ;;  %v1144_v23 = vld [vmem:[%s1257_s25 + $0x40] ss:$8 sps:$4 sm:$0xff]  }
  0x13   : > { %336 = vmatpush1.bf16.msra.mxu0 %v1250_v4  ;;  %513 = vmatpush1.bf16.msra.mxu1 %v1250_v4  ;;  %v450_v11 = vshll.u32 %v1271_v8, 16  ;;  %v433_v24 = vshll.u32 %v1143_v21, 16  ;;  %v1147_v25 = vld [vmem:[%s1257_s25 + $0x54] ss:$8 sps:$4 sm:$0xff]   ;;  %v431_v27 = vshrl.u32 %v1143_v21, 16  ;;  %v438_v29 = vshll.u32 %v1144_v23, 16 }
  0x14   : > { %337 = vmatprep.subr.bf16.mxu0 %v1188_v1  ;;  %514 = vmatprep.subr.bf16.mxu1 %v1188_v1  ;;  %v447_v13 = vrot.slane %v445_v10, 1  ;;  %v462_v31 = vshrl.u32 %v1271_v8, 16  ;;  %v466_v32 = vshll.u32 %v1147_v25, 16  ;;  %v1150_v35 = vld [vmem:[%s1257_s25 + $0x50] ss:$8 sps:$4 sm:$0xff]   ;;  %v454_v43 = vshrl.u32 %v1144_v23, 16 }
  0x15   : > { %v452_v14 = vrot.slane %v450_v11, 1  ;;  %v435_v28 = vrot.slane %v433_v24, 1  ;;  %v440_v34 = vrot.slane %v438_v29, 1  ;;  %v399_v36 = vld [vmem:[%s1257_s25 + $0x60] sm:$0x11]  ;;  %v458_v44 = vshll.u32 %v1150_v35, 16 }
  0x16   : > { %v448_v15 = vor.u32 %v447_v13, %v443_v9  ;;  %v1136_v38 = vld [vmem:[%s1257_s25] ss:$8 sps:$4 sm:$0xff]   ;;  %v468_v40 = vrot.slane %v466_v32, 1  ;;  %v1356_v41 = vcombine.high %v399_v36, %v399_v36  ;;  %v1145_v45 = vld [vmem:[%s1257_s25 + $0x14] ss:$8 sps:$4 sm:$0xff]   ;;  %v478_v47 = vshrl.u32 %v1147_v25, 16 }
  0x17   : > { %338 = vmatpush1.bf16.msra.mxu0 %v1262_v5  ;;  %515 = vmatpush1.bf16.msra.mxu1 %v1262_v5  ;;  %v436_v33 = vor.u32 %v435_v28, %v431_v27  ;;  %v464_v39 = vor.u32 %v462_v31, %v452_v14  ;;  %v456_v49 = vor.u32 %v454_v43, %v440_v34  ;;  %v460_v50 = vrot.slane %v458_v44, 1  ;;  %v1149_v52 = vld [vmem:[%s1257_s25 + $0x10] ss:$8 sps:$4 sm:$0xff]   ;;  %v1151_v58 = vld [vmem:[%s1257_s25 + $0x24] ss:$8 sps:$4 sm:$0xff]  }
  0x18   : > { %339 = vmatprep.subr.bf16.mxu0 %v1188_v1  ;;  %516 = vmatprep.subr.bf16.mxu1 %v1188_v1  ;;  %v453_v17 = vsel %vm429_vm1, %v448_v15, %v452_v14  ;;  %v482_v48 = vshll.u32 %v1356_v41, 16  ;;  %v1368_v51 = vcombine.low %v399_v36, %v399_v36  ;;  %v480_v53 = vor.u32 %v478_v47, %v468_v40  ;;  %v1166_v60 = vld [vmem:[%s1257_s25 + $0x94] ss:$8 sps:$4 sm:$0xfe]   ;;  %v1169_v61 = vld [vmem:[%s1257_s25 + $0xa4] ss:$8 sps:$4 sm:$0xff]  }
  0x19   : > { %1067 = vmatprep.mubr.msk.bf16.mxu1 %vm312_vm0, %v453_v17  ;;  %v441_v42 = vsel %vm429_vm1, %v436_v33, %v440_v34  ;;  %v469_v46 = vsel %vm429_vm1, %v464_v39, %v468_v40  ;;  %v461_v55 = vsel %vm429_vm1, %v456_v49, %v460_v50  ;;  %v470_v56 = vshrl.u32 %v1150_v35, 16  ;;  %v1160_v13 = vld [vmem:[%s1257_s25 + $0x64] ss:$8 sps:$4 sm:$0xfe]   ;;  %v1401_v14 = vld [vmem:[%s1257_s25 + $0x74] ss:$8 sps:$4 sm:$0xff]  }
  0x1a   : > { %v484_v54 = vrot.slane %v482_v48, 1  ;;  %v474_v57 = vshll.u32 %v1368_v51, 16  ;;  %v763_v6 = vshrl.u32 %v1166_v60, 16  ;;  %v766_v7 = vshll.u32 %v1166_v60, 16  ;;  %v1172_v31 = vld [vmem:[%s1257_s25 + $0xb4] ss:$8 sps:$4 sm:$0xff]  }
  0x1b   : > { %340 = vmatpush1.bf16.msra.mxu0 %v1280_v12  ;;  %517 = vmatpush1.bf16.msra.mxu1 %v1280_v12  ;;  %v472_v62 = vor.u32 %v470_v56, %v460_v50  ;;  %v771_v8 = vshrl.u32 %v1169_v61, 16  ;;  %v774_v9 = vshll.u32 %v1169_v61, 16  ;;  %v488_v11 = vshrl.u32 %v1356_v41, 16  ;;  %v1158_v36 = vld [vmem:[%s1257_s25 + $0x60] ss:$8 sps:$4 sm:$0xfe]  }
  0x1c   : > { %341 = vmatprep.subr.bf16.mxu0 %v1188_v1  ;;  %518 = vmatprep.subr.bf16.mxu1 %v1188_v1  ;;  %v485_v59 = vsel %vm429_vm1, %v480_v53, %v484_v54  ;;  %v476_v63 = vrot.slane %v474_v57, 1  ;;  %v765_v15 = vrot.slane %v763_v6, 1  ;;  %v768_v17 = vrot.slane %v766_v7, 2  ;;  %v1161_v39 = vld [vmem:[%s1257_s25 + $0x70] ss:$8 sps:$4 sm:$0xff]  }
  0x1d   : > { %v773_v21 = vrot.slane %v771_v8, 1  ;;  %v776_v23 = vrot.slane %v774_v9, 2  ;;  %v486_v24 = vshrl.u32 %v1368_v51, 16  ;;  %v617_v25 = vrot.slane %v1160_v13, 1  ;;  %v1170_v40 = vld [vmem:[%s1257_s25 + $0x84] ss:$8 sps:$4 sm:$0xff]  }
  0x1e   : > { %v618_v27 = vrot.slane %v1401_v14, 1  ;;  %v769_v28 = vor.u32 %v768_v17, %v765_v15  ;;  %v789_v34 = vshrl.u32 %v1172_v31, 16  ;;  %v792_v35 = vshll.u32 %v1172_v31, 16  ;;  %v1175_v44 = vld [vmem:[%s1257_s25 + $0xb0] ss:$8 sps:$4 sm:$0xff]  }
  0x1f   : > { %342 = vmatpush1.bf16.msra.mxu0 %v1289_v16  ;;  %519 = vmatpush1.bf16.msra.mxu1 %v1289_v16  ;;  %v1411_v29 = vor.u32 %v776_v23, %v773_v21  ;;  %v614_v48 = vrot.slane %v1158_v36, 1  ;;  %v615_v49 = vrot.slane %v1161_v39, 1  ;;  %v622_v50 = vrot.slane %v1170_v40, 1  ;;  %v583_v57 = vld [vmem:[%s1257_s25 + $0x90] sm:$0x33] }
  0x20   : > { %343 = vmatprep.subr.bf16.mxu0 %v1188_v1  ;;  %520 = vmatprep.subr.bf16.mxu1 %v1188_v1  ;;  %v783_v53 = vshll.u32 %v1175_v44, 16  ;;  %v1174_v60 = vld [vmem:[%s1257_s25 + $0x80] ss:$8 sps:$4 sm:$0xff]   ;;  %v1077_v14 = vcombine.low %v583_v57, %v583_v57 }
  0x21   : > { %v778_v30 = vsel %vm744_vm4, %v769_v28, %v1411_v29  ;;  %v620_v7 = vrot.slane %v1174_v60, 1 }
  0x23   : > { %344 = vmatpush1.bf16.msra.mxu0 %v1300_v18  ;;  %521 = vmatpush1.bf16.msra.mxu1 %v1300_v18 }
  0x24   : > { %345 = vmatprep.subr.bf16.mxu0 %v1188_v1  ;;  %522 = vmatprep.subr.bf16.mxu1 %v1188_v1 }
  0x27   : > { %346 = vmatpush1.bf16.msra.mxu0 %v1309_v19  ;;  %523 = vmatpush1.bf16.msra.mxu1 %v1309_v19 }
  0x28   : > { %347 = vmatprep.subr.bf16.mxu0 %v1188_v1  ;;  %524 = vmatprep.subr.bf16.mxu1 %v1188_v1 }
  0x2b   : > { %348 = vmatpush1.bf16.msra.mxu0 %v1318_v20  ;;  %525 = vmatpush1.bf16.msra.mxu1 %v1318_v20 }
  0x2c   : > { %349 = vmatprep.subr.bf16.mxu0 %v1188_v1  ;;  %526 = vmatprep.subr.bf16.mxu1 %v1188_v1 }
  0x2f   : > { %350 = vmatpush1.bf16.msra.mxu0 %v1328_v22  ;;  %527 = vmatpush1.bf16.msra.mxu1 %v1328_v22 }
  0x30   : > { %351 = vmatprep.subr.bf16.mxu0 %v1188_v1  ;;  %528 = vmatprep.subr.bf16.mxu1 %v1188_v1 }
  0x33   : > { %352 = vmatpush1.bf16.msra.mxu0 %v1339_v26  ;;  %529 = vmatpush1.bf16.msra.mxu1 %v1339_v26 }
  0x34   : > { %353 = vmatprep.subr.bf16.mxu0 %v1188_v1  ;;  %530 = vmatprep.subr.bf16.mxu1 %v1188_v1 }
  0x37   : > { %354 = vmatpush1.bf16.msra.mxu0 %v1353_v37  ;;  %531 = vmatpush1.bf16.msra.mxu1 %v1353_v37 }
  0x38   : > { %644 = vmatprep.subr.bf16.mxu0 %v1188_v1  ;;  %831 = vmatprep.subr.bf16.mxu1 %v1188_v1 }
  0x3a   : > { %362 = vmatmul.mubr.bf16.vlgmr.msra.gmra.mrb[0].mxu0 %v1136_v38  ;;  %539 = vmatmul.mubr.bf16.vlgmr.msra.gmra.mrb[0].mxu1 %v441_v42  ;;  %v714_v38 = vld [vmem:[%s1257_s25 + $0xc0] sm:$0x33] }
  0x3b   : > { %645 = vmatpush1.bf16.msra.mxu0 %v1220_v0  ;;  %832 = vmatpush1.bf16.msra.mxu1 %v1220_v0  ;;  %v1154_v0 = vld [vmem:[%s1257_s25 + $0x20] ss:$8 sps:$4 sm:$0xff]   ;;  %v1090_v47 = vcombine.high %v714_v38, %v714_v38 }
  0x3c   : > { %646 = vmatprep.subr.bf16.mxu0 %v1188_v1  ;;  %833 = vmatprep.subr.bf16.mxu1 %v1188_v1 }
  0x3d   : > { %1056 = vmatprep.mubr.msk.bf16.mxu0 %vm312_vm0, %v1145_v45  ;;  %1068 = vmatprep.mubr.msk.bf16.mxu1 %vm312_vm0, %v469_v46  ;;  %v791_v45 = vrot.slane %v789_v34, 1  ;;  %v794_v46 = vrot.slane %v792_v35, 2  ;;  %v810_v56 = vshll.u32 %v1090_v47, 16 }
  0x3f   : > { %647 = vmatpush1.bf16.msra.mxu0 %v1229_v2  ;;  %834 = vmatpush1.bf16.msra.mxu1 %v1229_v2  ;;  %v203_v2 = vld [vmem:[%s1257_s25 + $0x30] sm:$0x11]  ;;  %v795_v54 = vor.u32 %v794_v46, %v791_v45  ;;  %v812_v6 = vrot.slane %v810_v56, 2 }
  0x40   : > { %648 = vmatprep.subr.bf16.mxu0 %v1188_v1  ;;  %835 = vmatprep.subr.bf16.mxu1 %v1188_v1  ;;  %v1041_v10 = vcombine.high %v203_v2, %v203_v2 }
  0x42   : > { %370 = vmatmul.mubr.bf16.gmra.mrb[4].mxu0 %v1149_v52  ;;  %547 = vmatmul.mubr.bf16.gmra.mrb[4].mxu1 %v461_v55  ;;  %v780_v52 = vshrl.u32 %v1175_v44, 16  ;;  %v807_v55 = vshrl.u32 %v1090_v47, 16 }
  0x43   : > { %649 = vmatpush1.bf16.msra.mxu0 %v1240_v3  ;;  %836 = vmatpush1.bf16.msra.mxu1 %v1240_v3  ;;  %v477_v3 = vsel %vm429_vm1, %v472_v62, %v476_v63  ;;  %v785_v62 = vrot.slane %v783_v53, 2  ;;  %v796_v63 = vsel %vm744_vm4, %v1411_v29, %v795_v54 }
  0x44   : > { %650 = vmatprep.subr.bf16.mxu0 %v1188_v1  ;;  %837 = vmatprep.subr.bf16.mxu1 %v1188_v1  ;;  %v782_v61 = vrot.slane %v780_v52, 1 }
  0x45   : > { %1057 = vmatprep.mubr.msk.bf16.mxu0 %vm312_vm0, %v1151_v58  ;;  %1069 = vmatprep.mubr.msk.bf16.mxu1 %vm312_vm0, %v485_v59  ;;  %v616_v58 = vsel %vm613_vm3, %v614_v48, %v615_v49  ;;  %v623_v59 = vsel %vm613_vm3, %v618_v27, %v622_v50 }
  0x46   : > { %v786_v8 = vor.u32 %v785_v62, %v782_v61 }
  0x47   : > { %651 = vmatpush1.bf16.msra.mxu0 %v1250_v4  ;;  %838 = vmatpush1.bf16.msra.mxu1 %v1250_v4  ;;  %v1040_v4 = vcombine.low %v203_v2, %v203_v2  ;;  %v809_v2 = vrot.slane %v807_v55, 1 }
  0x48   : > { %652 = vmatprep.subr.bf16.mxu0 %v1188_v1  ;;  %839 = vmatprep.subr.bf16.mxu1 %v1188_v1 }
  0x4a   : > { %378 = vmatmul.mubr.bf16.gmra.mrb[8].mxu0 %v1154_v0  ;;  %555 = vmatmul.mubr.bf16.gmra.mrb[8].mxu1 %v477_v3  ;;  %v1078_v0 = vcombine.high %v583_v57, %v583_v57 }
  0x4b   : > { %653 = vmatpush1.bf16.msra.mxu0 %v1262_v5  ;;  %840 = vmatpush1.bf16.msra.mxu1 %v1262_v5  ;;  %v619_v5 = vsel %vm613_vm3, %v617_v25, %v618_v27 }
  0x4c   : > { %654 = vmatprep.subr.bf16.mxu0 %v1188_v1  ;;  %841 = vmatprep.subr.bf16.mxu1 %v1188_v1  ;;  %v626_v3 = vrot.slane %v1078_v0, 1  ;;  %v1500_v0 = vld [vmem:[%s1543_s2] ss:$0 sm:$0xff] }
  0x4d   : > { %1058 = vmatprep.mubr.msk.bf16.mxu0 %vm312_vm0, %v1041_v10  ;;  %1070 = vmatprep.mubr.msk.bf16.mxu1 %vm312_vm0, %v488_v11  ;;  %v813_v10 = vor.u32 %v812_v6, %v809_v2  ;;  %v621_v11 = vsel %vm613_vm3, %v615_v49, %v620_v7 }
  0x4e   : > { %v627_v21 = vsel %vm613_vm3, %v622_v50, %v626_v3 }
  0x4f   : > { %655 = vmatpush1.bf16.msra.mxu0 %v1280_v12  ;;  %842 = vmatpush1.bf16.msra.mxu1 %v1280_v12  ;;  %v1164_v12 = vld [vmem:[%s1257_s25 + $0x90] ss:$8 sps:$4 sm:$0xfe]   ;;  %v814_v23 = vsel %vm744_vm4, %v795_v54, %v813_v10 }
  0x50   : > { %656 = vmatprep.subr.bf16.mxu0 %v1188_v1  ;;  %843 = vmatprep.subr.bf16.mxu1 %v1188_v1  ;;  %v749_v32 = vshll.u32 %v1164_v12, 16 }
  0x52   : > { %386 = vmatmul.mubr.bf16.gmra.mrb[12].mxu0 %v1040_v4  ;;  %563 = vmatmul.mubr.bf16.gmra.mrb[12].mxu1 %v486_v24  ;;  %v751_v41 = vrot.slane %v749_v32, 2  ;;  %v624_v4 = vrot.slane %v1077_v14, 1 }
  0x53   : > { %657 = vmatpush1.bf16.msra.mxu0 %v1289_v16  ;;  %844 = vmatpush1.bf16.msra.mxu1 %v1289_v16  ;;  %v1167_v16 = vld [vmem:[%s1257_s25 + $0xa0] ss:$8 sps:$4 sm:$0xff]  }
  0x54   : > { %658 = vmatprep.subr.bf16.mxu0 %v1188_v1  ;;  %845 = vmatprep.subr.bf16.mxu1 %v1188_v1  ;;  %v754_v33 = vshrl.u32 %v1167_v16, 16  ;;  %v625_v25 = vsel %vm613_vm3, %v620_v7, %v624_v4 }
  0x55   : > { %1079 = vmatprep.mubr.msk.bf16.mxu0 %vm312_vm0, %v619_v5  ;;  %1091 = vmatprep.mubr.msk.bf16.mxu1 %vm312_vm0, %v778_v30 }
  0x56   : > { %v756_v42 = vrot.slane %v754_v33, 1 }
  0x57   : > { %659 = vmatpush1.bf16.msra.mxu0 %v1300_v18  ;;  %846 = vmatpush1.bf16.msra.mxu1 %v1300_v18  ;;  %v746_v18 = vshrl.u32 %v1164_v12, 16 }
  0x58   : > { %660 = vmatprep.subr.bf16.mxu0 %v1188_v1  ;;  %847 = vmatprep.subr.bf16.mxu1 %v1188_v1 }
  0x5b   : > { %661 = vmatpush1.bf16.msra.mxu0 %v1309_v19  ;;  %848 = vmatpush1.bf16.msra.mxu1 %v1309_v19  ;;  %v757_v19 = vshll.u32 %v1167_v16, 16 }
  0x5c   : > { %662 = vmatprep.subr.bf16.mxu0 %v1188_v1  ;;  %849 = vmatprep.subr.bf16.mxu1 %v1188_v1 }
  0x5d   : > { %v759_v43 = vrot.slane %v757_v19, 2 }
  0x5f   : > { %663 = vmatpush1.bf16.msra.mxu0 %v1318_v20  ;;  %850 = vmatpush1.bf16.msra.mxu1 %v1318_v20  ;;  %v748_v20 = vrot.slane %v746_v18, 1  ;;  %v760_v51 = vor.u32 %v759_v43, %v756_v42 }
  0x60   : > { %664 = vmatprep.subr.bf16.mxu0 %v1188_v1  ;;  %851 = vmatprep.subr.bf16.mxu1 %v1188_v1 }
  0x61   : > { %v787_v13 = vsel %vm744_vm4, %v760_v51, %v786_v8 }
  0x63   : > { %665 = vmatpush1.bf16.msra.mxu0 %v1328_v22  ;;  %852 = vmatpush1.bf16.msra.mxu1 %v1328_v22  ;;  %v752_v22 = vor.u32 %v751_v41, %v748_v20 }
  0x64   : > { %666 = vmatprep.subr.bf16.mxu0 %v1188_v1  ;;  %853 = vmatprep.subr.bf16.mxu1 %v1188_v1 }
  0x67   : > { %667 = vmatpush1.bf16.msra.mxu0 %v1339_v26  ;;  %854 = vmatpush1.bf16.msra.mxu1 %v1339_v26  ;;  %v761_v26 = vsel %vm744_vm4, %v752_v22, %v760_v51 }
  0x68   : > { %668 = vmatprep.subr.bf16.mxu0 %v1188_v1  ;;  %855 = vmatprep.subr.bf16.mxu1 %v1188_v1  ;;  %v1089_v1 = vcombine.low %v714_v38, %v714_v38 }
  0x6a   : > { %v801_v9 = vshll.u32 %v1089_v1, 16 }
  0x6b   : > { %669 = vmatpush1.bf16.msra.mxu0 %v1353_v37  ;;  %856 = vmatpush1.bf16.msra.mxu1 %v1353_v37  ;;  %v798_v37 = vshrl.u32 %v1089_v1, 16 }
  0x6c   : > { %v803_v17 = vrot.slane %v801_v9, 2 }
  0x6d   : > { %v800_v15 = vrot.slane %v798_v37, 1 }
  0x6e   : > { %677 = vmatmul.mubr.bf16.vlgmr.msra.gmra.mrb[16].mxu0 %v616_v58  ;;  %864 = vmatmul.mubr.bf16.vlgmr.msra.gmra.mrb[16].mxu1 %v761_v26 }
  0x6f   : > { %1080 = vmatprep.mubr.msk.bf16.mxu0 %vm312_vm0, %v623_v59  ;;  %1092 = vmatprep.mubr.msk.bf16.mxu1 %vm312_vm0, %v796_v63  ;;  %v804_v24 = vor.u32 %v803_v17, %v800_v15 }
  0x71   : > { %v805_v27 = vsel %vm744_vm4, %v786_v8, %v804_v24 }
  0x76   : > { %685 = vmatmul.mubr.bf16.gmra.mrb[20].mxu0 %v621_v11  ;;  %872 = vmatmul.mubr.bf16.gmra.mrb[20].mxu1 %v787_v13 }
  0x77   : > { %1081 = vmatprep.mubr.msk.bf16.mxu0 %vm312_vm0, %v627_v21  ;;  %1093 = vmatprep.mubr.msk.bf16.mxu1 %vm312_vm0, %v814_v23 }
  0x7e   : > { %693 = vmatmul.mubr.bf16.gmra.mrb[24].mxu0 %v625_v25  ;;  %880 = vmatmul.mubr.bf16.gmra.mrb[24].mxu1 %v805_v27 }
  0x7f   : > { %1082 = vmatprep.mubr.msk.bf16.mxu0 %vm312_vm0, %v626_v3  ;;  %1094 = vmatprep.mubr.msk.bf16.mxu1 %vm312_vm0, %v809_v2 }
  0x86   : > { %701 = vmatmul.mubr.bf16.gmra.mrb[28].mxu0 %v624_v4  ;;  %888 = vmatmul.mubr.bf16.gmra.mrb[28].mxu1 %v800_v15 }
 0x10d   : > { %v363_v28 = vpop.f32.mrb[0].mxu0  ;;  %v540_v29 = vpop.f32.mrb[0].mxu1 }
 0x10e   : > { %v570_v5 = vmax.f32 %v363_v28, %v540_v29  ;;  %v365_v30 = vpop.f32.mrb[1].mxu0  ;;  %v542_v12 = vpop.f32.mrb[1].mxu1 }
 0x10f   : > { %v366_v16 = vpop.f32.mrb[2].mxu0  ;;  %v543_v31 = vpop.f32.mrb[2].mxu1 }
 0x110   : > { %v571_v18 = vmax.f32 %v366_v16, %v543_v31  ;;  %v368_v32 = vpop.f32.mrb[3].mxu0  ;;  %v545_v33 = vpop.f32.mrb[3].mxu1 }
 0x115   : > { %v371_v19 = vpop.f32.mrb[4].mxu0  ;;  %v548_v34 = vpop.f32.mrb[4].mxu1 }
 0x116   : > { %v572_v35 = vmax.f32 %v371_v19, %v548_v34  ;;  %v373_v36 = vpop.f32.mrb[5].mxu0  ;;  %v550_v38 = vpop.f32.mrb[5].mxu1 }
 0x117   : > { %v374_v39 = vpop.f32.mrb[6].mxu0  ;;  %v551_v40 = vpop.f32.mrb[6].mxu1 }
 0x118   : > { %v573_v20 = vmax.f32 %v374_v39, %v551_v40  ;;  %v376_v41 = vpop.f32.mrb[7].mxu0  ;;  %v553_v42 = vpop.f32.mrb[7].mxu1 }
 0x11d   : > { %v1479_v43 = vpop.f32.mrb[8].mxu0  ;;  %v1481_v44 = vpop.f32.mrb[8].mxu1 }
 0x11e   : > { %v574_v45 = vmax.f32 %v1479_v43, %v1481_v44  ;;  %v381_v46 = vpop.f32.mrb[9].mxu0  ;;  %v558_v47 = vpop.f32.mrb[9].mxu1 }
 0x11f   : > { %v1485_v48 = vpop.f32.mrb[10].mxu0  ;;  %v1487_v49 = vpop.f32.mrb[10].mxu1 }
 0x120   : > { %v575_v50 = vmax.f32 %v1485_v48, %v1487_v49  ;;  %v384_v22 = vpop.f32.mrb[11].mxu0  ;;  %v561_v51 = vpop.f32.mrb[11].mxu1 }
 0x125   : > { %v1491_v52 = vpop.f32.mrb[12].mxu0  ;;  %v1493_v53 = vpop.f32.mrb[12].mxu1 }
 0x126   : > { %v576_v54 = vmax.f32 %v1491_v52, %v1493_v53  ;;  %v389_v55 = vpop.f32.mrb[13].mxu0  ;;  %v566_v56 = vpop.f32.mrb[13].mxu1 }
 0x127   : > { %v390_v57 = vpop.f32.mrb[14].mxu0  ;;  %v567_v58 = vpop.f32.mrb[14].mxu1 }
 0x128   : > { %v391_v59 = vpop.f32.mrb[15].mxu0  ;;  %v568_v60 = vpop.f32.mrb[15].mxu1 }
 0x141   : > { %v678_v26 = vpop.f32.mrb[16].mxu0  ;;  %v865_v61 = vpop.f32.mrb[16].mxu1 }
 0x142   : > { %v895_v62 = vmax.f32 %v678_v26, %v865_v61  ;;  %v680_v1 = vpop.f32.mrb[17].mxu0  ;;  %v867_v63 = vpop.f32.mrb[17].mxu1 }
 0x143   : > { %v681_v2 = vpop.f32.mrb[18].mxu0  ;;  %v868_v6 = vpop.f32.mrb[18].mxu1 }
 0x144   : > { %v902_v7 = vmax.f32 %v570_v5, %v895_v62  ;;  %v896_v8 = vmax.f32 %v681_v2, %v868_v6  ;;  %v683_v37 = vpop.f32.mrb[19].mxu0  ;;  %v870_v9 = vpop.f32.mrb[19].mxu1  ;;  %v969_v6 = vld [vmem:[%s1508_s24 + $0x18] sm:$0x1] }
 0x146   : > { %v916_v3 = vadd.f32 %v1500_v0, %v902_v7  ;;  %v903_v10 = vmax.f32 %v571_v18, %v896_v8 }
 0x148   : > { %v923_v11 = vmax.f32 %v916_v3, 0.0  ;;  %v917_v13 = vadd.f32 %v1500_v0, %v903_v10 }
 0x149   : > { %v686_v14 = vpop.f32.mrb[20].mxu0  ;;  %v873_v15 = vpop.f32.mrb[20].mxu1 }
 0x14a   : > { %v1105_v17 = vpack.c.bf16 %v923_v11, %v923_v11  ;;  %v924_v21 = vmax.f32 %v917_v13, 0.0  ;;  %v897_v23 = vmax.f32 %v686_v14, %v873_v15  ;;  %v688_v4 = vpop.f32.mrb[21].mxu0  ;;  %v875_v24 = vpop.f32.mrb[21].mxu1 }
 0x14b   : > { %v689_v25 = vpop.f32.mrb[22].mxu0  ;;  %v876_v27 = vpop.f32.mrb[22].mxu1 }
 0x14c   : > { %960 = vst.msk [vmem:[%s1508_s24] sm:$0xf] %vm959_vm5, %v1105_v17  ;;  %v1106_v28 = vpack.c.bf16 %v924_v21, %v924_v21  ;;  %v904_v29 = vmax.f32 %v572_v35, %v897_v23  ;;  %v898_v5 = vmax.f32 %v689_v25, %v876_v27  ;;  %v691_v30 = vpop.f32.mrb[23].mxu0  ;;  %v878_v12 = vpop.f32.mrb[23].mxu1 }
 0x14e   : > { %961 = vst.msk [vmem:[%s1508_s24 + $0x4] sm:$0xf] %vm959_vm5, %v1106_v28  ;;  %v918_v16 = vadd.f32 %v1500_v0, %v904_v29  ;;  %v905_v31 = vmax.f32 %v573_v20, %v898_v5 }
 0x150   : > { %v925_v18 = vmax.f32 %v918_v16, 0.0  ;;  %v919_v32 = vadd.f32 %v1500_v0, %v905_v31 }
 0x151   : > { %v694_v33 = vpop.f32.mrb[24].mxu0  ;;  %v881_v19 = vpop.f32.mrb[24].mxu1 }
 0x152   : > { %v1107_v34 = vpack.c.bf16 %v925_v18, %v925_v18  ;;  %v926_v36 = vmax.f32 %v919_v32, 0.0  ;;  %v899_v38 = vmax.f32 %v694_v33, %v881_v19  ;;  %v696_v39 = vpop.f32.mrb[25].mxu0  ;;  %v883_v35 = vpop.f32.mrb[25].mxu1 }
 0x153   : > { %v697_v40 = vpop.f32.mrb[26].mxu0  ;;  %v884_v41 = vpop.f32.mrb[26].mxu1 }
 0x154   : > { %962 = vst.msk [vmem:[%s1508_s24 + $0x8] sm:$0xf] %vm959_vm5, %v1107_v34  ;;  %v1108_v42 = vpack.c.bf16 %v926_v36, %v926_v36  ;;  %v906_v20 = vmax.f32 %v574_v45, %v899_v38  ;;  %v900_v46 = vmax.f32 %v697_v40, %v884_v41  ;;  %v699_v47 = vpop.f32.mrb[27].mxu0  ;;  %v886_v22 = vpop.f32.mrb[27].mxu1 }
 0x156   : > { %963 = vst.msk [vmem:[%s1508_s24 + $0xc] sm:$0xf] %vm959_vm5, %v1108_v42  ;;  %v920_v51 = vadd.f32 %v1500_v0, %v906_v20  ;;  %v907_v55 = vmax.f32 %v575_v50, %v900_v46 }
 0x158   : > { %v927_v56 = vmax.f32 %v920_v51, 0.0  ;;  %v921_v57 = vadd.f32 %v1500_v0, %v907_v55 }
 0x159   : > { %v702_v58 = vpop.f32.mrb[28].mxu0  ;;  %v889_v59 = vpop.f32.mrb[28].mxu1 }
 0x15a   : > { %v1109_v43 = vpack.c.bf16 %v927_v56, %v927_v56  ;;  %v928_v44 = vmax.f32 %v921_v57, 0.0  ;;  %v901_v45 = vmax.f32 %v702_v58, %v889_v59  ;;  %v704_v60 = vpop.f32.mrb[29].mxu0  ;;  %v891_v26 = vpop.f32.mrb[29].mxu1 }
 0x15b   : > { %v705_v61 = vpop.f32.mrb[30].mxu0  ;;  %v892_v62 = vpop.f32.mrb[30].mxu1 }
 0x15c   : > { %964 = vst.msk [vmem:[%s1508_s24 + $0x10] sm:$0xf] %vm959_vm5, %v1109_v43  ;;  %v1110_v1 = vpack.c.bf16 %v928_v44, %v928_v44  ;;  %v908_v48 = vmax.f32 %v576_v54, %v901_v45  ;;  %v706_v49 = vpop.f32.mrb[31].mxu0  ;;  %v893_v50 = vpop.f32.mrb[31].mxu1 }
 0x15e   : > { %965 = vst.msk [vmem:[%s1508_s24 + $0x14] sm:$0xf] %vm959_vm5, %v1110_v1  ;;  %v922_v63 = vadd.f32 %v1500_v0, %v908_v48 }
 0x160   : > { %v929_v2 = vmax.f32 %v922_v63, 0.0 }
 0x162   : > { %v1111_v7 = vpack.c.bf16 %v929_v2, %v929_v2 }
 0x164   : > { %v970_v8 = vsel %vm968_vm8, %v1111_v7, %v969_v6 }
 0x165   : > { %971 = vst [vmem:[%s1508_s24 + $0x18] sm:$0x1] %v970_v8 }
 0x166 PF: > { %s13_s12 = sadd.s32 1, %s1186_s12  }
 0x167   : > { %p10_p4 = scmp.ge.s32.totalorder %s13_s12, 4  }
 0x169   :  { %12 = sbr.rel (!%p10_p4) target bundleno = 1 (0x1), region = 62 }

// kernel: cnn_forward.6
= control target key start
LH: loop header
LB: loop body
LE: loop exit
PB: predicated region body
PF: predicated region fallthrough
CT: control target
= control target key end

     0   :  { %s2786_s12 = smov 0   ;;  %s2788_s13 = smov 0   ;;  %s3389_s0 = inlined_call_operand.vmem [shape: bf16[2,1568], index: 0, kind: input, shape index: {}]   ;;  %s3390_s1 = inlined_call_operand.vmem [shape: bf16[1568,640], index: 1, kind: input, shape index: {}]   ;;  %s3391_s2 = inlined_call_operand.vmem [shape: f32[1,640], index: 2, kind: input, shape index: {}]   ;;  %s3392_s3 = inlined_call_operand.vmem [shape: bf16[2,640], index: 3, kind: output, shape index: {}]  }
   0x1   :  { %s2790_s14 = smov 0   ;;  %s2792_s15 = smov 0  }
   0x2   :  { %s2794_s16 = smov 0  }
   0x3 LB: > { %s22_s17 = sadd.s32 1, %s2757_s15  ;;  %p65_p1 = scmp.ne.s32.totalorder %s2749_s13, %s2745_s12  ;;  %s2761_s16 = sphi %s2794_s16, %s13_s16   ;;  %s2757_s15 = sphi %s2792_s15, %s3396_s15   ;;  %s2753_s14 = sphi %s2790_s14, %s3395_s14   ;;  %s2749_s13 = sphi %s2788_s13, %s3394_s13   ;;  %s2745_s12 = sphi %s2786_s12, %s3393_s12  }
   0x4   : > { %p23_p0 = scmp.ge.s32.totalorder %s22_s17, 5  ;;  %p66_p2 = scmp.eq.s32.totalorder %s2761_s16, 0 }
   0x5   : > { %s58_s19 = sadd.s32 1, %s2749_s13  ;;  %p2330_p5 = scmp.ge.s32.totalorder %s2761_s16, 5 }
   0x6   : > { %s3398_s17 = smov (%p23_p0, %s22_s17), 0  ;;  %p67_p3 = por %p66_p2, %p65_p1 }
   0x7   : > { %s55_s18 = ssub.s32 %s2757_s15, %s3398_s17  ;;  %152 = sbr.rel (%p2330_p5) target bundleno = 149 (0x95), region = 20 }
   0x8   : > { %p56_p4 = scmp.eq.s32.totalorder %s55_s18, 0 }
   0xa   : > { %s2821_s20 = scalar_select %p56_p4, %s2749_s13, %s58_s19  }
   0xe   : > { %155 = sbr.rel (!%p67_p3) target bundleno = 149 (0x95), region = 24  ;;  %s157_s21 = sand.u32 (%p67_p3), 1, %s2749_s13  }
   0xf   : > { %s2331_s22 = sshll.u32 (%p67_p3), %s2757_s15, 2  ;;  %s2578_s23 = smul.u32 (%p67_p3), 784, %s157_s21 }
  0x10   : > { %s2829_s26 = scalar_lea.vmem (%p67_p3), %s3390_s1, %s2331_s22 }
  0x11   : > { %v177_v0 = vld [vmem:[%s2829_s26] sm:$0xf] (%p67_p3)  ;;  %v179_v1 = vld [vmem:[%s2829_s26 + $0x14] sm:$0xf] (%p67_p3)  ;;  %v181_v2 = vld [vmem:[%s2829_s26 + $0x28] sm:$0xf] (%p67_p3) }
  0x12   : > { %v183_v3 = vld [vmem:[%s2829_s26 + $0x3c] sm:$0xf] (%p67_p3)  ;;  %v185_v4 = vld [vmem:[%s2829_s26 + $0x50] sm:$0xf] (%p67_p3)  ;;  %s2836_s27 = scalar_lea.vmem (%p67_p3), [#allocation2], %s2578_s23 }
  0x13   : > { %178 = vst [vmem:[%s2836_s27] sm:$0xf] (%p67_p3), %v177_v0  ;;  %180 = vst [vmem:[%s2836_s27 + $0x4] sm:$0xf] (%p67_p3), %v179_v1  ;;  %v187_v5 = vld [vmem:[%s2829_s26 + $0x64] sm:$0xf] (%p67_p3) }
  0x14   : > { %182 = vst [vmem:[%s2836_s27 + $0x8] sm:$0xf] (%p67_p3), %v181_v2  ;;  %184 = vst [vmem:[%s2836_s27 + $0xc] sm:$0xf] (%p67_p3), %v183_v3  ;;  %v189_v6 = vld [vmem:[%s2829_s26 + $0x78] sm:$0xf] (%p67_p3) }
  0x15   : > { %186 = vst [vmem:[%s2836_s27 + $0x10] sm:$0xf] %v185_v4  ;;  %v191_v7 = vld [vmem:[%s2829_s26 + $0x8c] sm:$0xf]  ;;  %188 = vst [vmem:[%s2836_s27 + $0x14] sm:$0xf] %v187_v5 }
  0x16   : > { %190 = vst [vmem:[%s2836_s27 + $0x18] sm:$0xf] %v189_v6  ;;  %192 = vst [vmem:[%s2836_s27 + $0x1c] sm:$0xf] %v191_v7  ;;  %v193_v8 = vld [vmem:[%s2829_s26 + $0xa0] sm:$0xf] }
  0x17   : > { %v195_v9 = vld [vmem:[%s2829_s26 + $0xb4] sm:$0xf]  ;;  %v197_v10 = vld [vmem:[%s2829_s26 + $0xc8] sm:$0xf]  ;;  %194 = vst [vmem:[%s2836_s27 + $0x20] sm:$0xf] %v193_v8 }
  0x18   : > { %196 = vst [vmem:[%s2836_s27 + $0x24] sm:$0xf] %v195_v9  ;;  %198 = vst [vmem:[%s2836_s27 + $0x28] sm:$0xf] %v197_v10  ;;  %v199_v11 = vld [vmem:[%s2829_s26 + $0xdc] sm:$0xf] }
  0x19   : > { %v201_v12 = vld [vmem:[%s2829_s26 + $0xf0] sm:$0xf]  ;;  %v203_v13 = vld [vmem:[%s2829_s26 + $0x104] sm:$0xf]  ;;  %200 = vst [vmem:[%s2836_s27 + $0x2c] sm:$0xf] %v199_v11 }
  0x1a   : > { %202 = vst [vmem:[%s2836_s27 + $0x30] sm:$0xf] %v201_v12  ;;  %204 = vst [vmem:[%s2836_s27 + $0x34] sm:$0xf] %v203_v13  ;;  %v205_v14 = vld [vmem:[%s2829_s26 + $0x118] sm:$0xf] }
  0x1b   : > { %v207_v15 = vld [vmem:[%s2829_s26 + $0x12c] sm:$0xf]  ;;  %v209_v16 = vld [vmem:[%s2829_s26 + $0x140] sm:$0xf]  ;;  %206 = vst [vmem:[%s2836_s27 + $0x38] sm:$0xf] %v205_v14 }
  0x1c   : > { %208 = vst [vmem:[%s2836_s27 + $0x3c] sm:$0xf] %v207_v15  ;;  %210 = vst [vmem:[%s2836_s27 + $0x40] sm:$0xf] %v209_v16  ;;  %v211_v17 = vld [vmem:[%s2829_s26 + $0x154] sm:$0xf] }
  0x1d   : > { %v213_v18 = vld [vmem:[%s2829_s26 + $0x168] sm:$0xf]  ;;  %v215_v19 = vld [vmem:[%s2829_s26 + $0x17c] sm:$0xf]  ;;  %212 = vst [vmem:[%s2836_s27 + $0x44] sm:$0xf] %v211_v17 }
  0x1e   : > { %214 = vst [vmem:[%s2836_s27 + $0x48] sm:$0xf] %v213_v18  ;;  %216 = vst [vmem:[%s2836_s27 + $0x4c] sm:$0xf] %v215_v19  ;;  %v217_v20 = vld [vmem:[%s2829_s26 + $0x190] sm:$0xf] }
  0x1f   : > { %v219_v21 = vld [vmem:[%s2829_s26 + $0x1a4] sm:$0xf]  ;;  %v221_v22 = vld [vmem:[%s2829_s26 + $0x1b8] sm:$0xf]  ;;  %218 = vst [vmem:[%s2836_s27 + $0x50] sm:$0xf] %v217_v20 }
  0x20   : > { %220 = vst [vmem:[%s2836_s27 + $0x54] sm:$0xf] %v219_v21  ;;  %222 = vst [vmem:[%s2836_s27 + $0x58] sm:$0xf] %v221_v22  ;;  %v223_v23 = vld [vmem:[%s2829_s26 + $0x1cc] sm:$0xf] }
  0x21   : > { %v225_v24 = vld [vmem:[%s2829_s26 + $0x1e0] sm:$0xf]  ;;  %v227_v25 = vld [vmem:[%s2829_s26 + $0x1f4] sm:$0xf]  ;;  %224 = vst [vmem:[%s2836_s27 + $0x5c] sm:$0xf] %v223_v23 }
  0x22   : > { %226 = vst [vmem:[%s2836_s27 + $0x60] sm:$0xf] %v225_v24  ;;  %228 = vst [vmem:[%s2836_s27 + $0x64] sm:$0xf] %v227_v25  ;;  %v229_v26 = vld [vmem:[%s2829_s26 + $0x208] sm:$0xf] }
  0x23   : > { %v231_v27 = vld [vmem:[%s2829_s26 + $0x21c] sm:$0xf]  ;;  %v233_v28 = vld [vmem:[%s2829_s26 + $0x230] sm:$0xf]  ;;  %230 = vst [vmem:[%s2836_s27 + $0x68] sm:$0xf] %v229_v26 }
  0x24   : > { %232 = vst [vmem:[%s2836_s27 + $0x6c] sm:$0xf] %v231_v27  ;;  %234 = vst [vmem:[%s2836_s27 + $0x70] sm:$0xf] %v233_v28  ;;  %v235_v29 = vld [vmem:[%s2829_s26 + $0x244] sm:$0xf] }
  0x25   : > { %v237_v30 = vld [vmem:[%s2829_s26 + $0x258] sm:$0xf]  ;;  %v239_v31 = vld [vmem:[%s2829_s26 + $0x26c] sm:$0xf]  ;;  %236 = vst [vmem:[%s2836_s27 + $0x74] sm:$0xf] %v235_v29 }
  0x26   : > { %238 = vst [vmem:[%s2836_s27 + $0x78] sm:$0xf] %v237_v30  ;;  %240 = vst [vmem:[%s2836_s27 + $0x7c] sm:$0xf] %v239_v31  ;;  %v241_v32 = vld [vmem:[%s2829_s26 + $0x280] sm:$0xf] }
  0x27   : > { %v243_v33 = vld [vmem:[%s2829_s26 + $0x294] sm:$0xf]  ;;  %v245_v34 = vld [vmem:[%s2829_s26 + $0x2a8] sm:$0xf]  ;;  %242 = vst [vmem:[%s2836_s27 + $0x80] sm:$0xf] %v241_v32 }
  0x28   : > { %244 = vst [vmem:[%s2836_s27 + $0x84] sm:$0xf] %v243_v33  ;;  %246 = vst [vmem:[%s2836_s27 + $0x88] sm:$0xf] %v245_v34  ;;  %v247_v35 = vld [vmem:[%s2829_s26 + $0x2bc] sm:$0xf] }
  0x29   : > { %v249_v36 = vld [vmem:[%s2829_s26 + $0x2d0] sm:$0xf]  ;;  %v251_v37 = vld [vmem:[%s2829_s26 + $0x2e4] sm:$0xf]  ;;  %248 = vst [vmem:[%s2836_s27 + $0x8c] sm:$0xf] %v247_v35 }
  0x2a   : > { %250 = vst [vmem:[%s2836_s27 + $0x90] sm:$0xf] %v249_v36  ;;  %252 = vst [vmem:[%s2836_s27 + $0x94] sm:$0xf] %v251_v37  ;;  %v253_v38 = vld [vmem:[%s2829_s26 + $0x2f8] sm:$0xf] }
  0x2b   : > { %v255_v39 = vld [vmem:[%s2829_s26 + $0x30c] sm:$0xf]  ;;  %v257_v40 = vld [vmem:[%s2829_s26 + $0x320] sm:$0xf]  ;;  %254 = vst [vmem:[%s2836_s27 + $0x98] sm:$0xf] %v253_v38 }
  0x2c   : > { %256 = vst [vmem:[%s2836_s27 + $0x9c] sm:$0xf] %v255_v39  ;;  %258 = vst [vmem:[%s2836_s27 + $0xa0] sm:$0xf] %v257_v40  ;;  %v259_v41 = vld [vmem:[%s2829_s26 + $0x334] sm:$0xf] }
  0x2d   : > { %v261_v42 = vld [vmem:[%s2829_s26 + $0x348] sm:$0xf]  ;;  %v263_v43 = vld [vmem:[%s2829_s26 + $0x35c] sm:$0xf]  ;;  %260 = vst [vmem:[%s2836_s27 + $0xa4] sm:$0xf] %v259_v41 }
  0x2e   : > { %262 = vst [vmem:[%s2836_s27 + $0xa8] sm:$0xf] %v261_v42  ;;  %264 = vst [vmem:[%s2836_s27 + $0xac] sm:$0xf] %v263_v43  ;;  %v265_v44 = vld [vmem:[%s2829_s26 + $0x370] sm:$0xf] }
  0x2f   : > { %v267_v45 = vld [vmem:[%s2829_s26 + $0x384] sm:$0xf]  ;;  %v269_v46 = vld [vmem:[%s2829_s26 + $0x398] sm:$0xf]  ;;  %266 = vst [vmem:[%s2836_s27 + $0xb0] sm:$0xf] %v265_v44 }
  0x30   : > { %268 = vst [vmem:[%s2836_s27 + $0xb4] sm:$0xf] %v267_v45  ;;  %270 = vst [vmem:[%s2836_s27 + $0xb8] sm:$0xf] %v269_v46  ;;  %v271_v47 = vld [vmem:[%s2829_s26 + $0x3ac] sm:$0xf] }
  0x31   : > { %v273_v48 = vld [vmem:[%s2829_s26 + $0x3c0] sm:$0xf]  ;;  %v275_v49 = vld [vmem:[%s2829_s26 + $0x3d4] sm:$0xf]  ;;  %272 = vst [vmem:[%s2836_s27 + $0xbc] sm:$0xf] %v271_v47 }
  0x32   : > { %274 = vst [vmem:[%s2836_s27 + $0xc0] sm:$0xf] %v273_v48  ;;  %276 = vst [vmem:[%s2836_s27 + $0xc4] sm:$0xf] %v275_v49  ;;  %v277_v50 = vld [vmem:[%s2829_s26 + $0x3e8] sm:$0xf] }
  0x33   : > { %v279_v51 = vld [vmem:[%s2829_s26 + $0x3fc] sm:$0xf]  ;;  %v281_v52 = vld [vmem:[%s2829_s26 + $0x410] sm:$0xf]  ;;  %278 = vst [vmem:[%s2836_s27 + $0xc8] sm:$0xf] %v277_v50 }
  0x34   : > { %280 = vst [vmem:[%s2836_s27 + $0xcc] sm:$0xf] %v279_v51  ;;  %282 = vst [vmem:[%s2836_s27 + $0xd0] sm:$0xf] %v281_v52  ;;  %v283_v53 = vld [vmem:[%s2829_s26 + $0x424] sm:$0xf] }
  0x35   : > { %v285_v54 = vld [vmem:[%s2829_s26 + $0x438] sm:$0xf]  ;;  %v287_v55 = vld [vmem:[%s2829_s26 + $0x44c] sm:$0xf]  ;;  %284 = vst [vmem:[%s2836_s27 + $0xd4] sm:$0xf] %v283_v53 }
  0x36   : > { %286 = vst [vmem:[%s2836_s27 + $0xd8] sm:$0xf] %v285_v54  ;;  %288 = vst [vmem:[%s2836_s27 + $0xdc] sm:$0xf] %v287_v55  ;;  %v289_v56 = vld [vmem:[%s2829_s26 + $0x460] sm:$0xf] }
  0x37   : > { %v291_v57 = vld [vmem:[%s2829_s26 + $0x474] sm:$0xf]  ;;  %v293_v58 = vld [vmem:[%s2829_s26 + $0x488] sm:$0xf]  ;;  %290 = vst [vmem:[%s2836_s27 + $0xe0] sm:$0xf] %v289_v56 }
  0x38   : > { %292 = vst [vmem:[%s2836_s27 + $0xe4] sm:$0xf] %v291_v57  ;;  %294 = vst [vmem:[%s2836_s27 + $0xe8] sm:$0xf] %v293_v58  ;;  %v295_v59 = vld [vmem:[%s2829_s26 + $0x49c] sm:$0xf] }
  0x39   : > { %v297_v60 = vld [vmem:[%s2829_s26 + $0x4b0] sm:$0xf]  ;;  %v299_v61 = vld [vmem:[%s2829_s26 + $0x4c4] sm:$0xf]  ;;  %296 = vst [vmem:[%s2836_s27 + $0xec] sm:$0xf] %v295_v59 }
  0x3a   : > { %298 = vst [vmem:[%s2836_s27 + $0xf0] sm:$0xf] %v297_v60  ;;  %300 = vst [vmem:[%s2836_s27 + $0xf4] sm:$0xf] %v299_v61  ;;  %v301_v62 = vld [vmem:[%s2829_s26 + $0x4d8] sm:$0xf] }
  0x3b   : > { %v303_v63 = vld [vmem:[%s2829_s26 + $0x4ec] sm:$0xf]  ;;  %v305_v0 = vld [vmem:[%s2829_s26 + $0x500] sm:$0xf]  ;;  %302 = vst [vmem:[%s2836_s27 + $0xf8] sm:$0xf] %v301_v62 }
  0x3c   : > { %304 = vst [vmem:[%s2836_s27 + $0xfc] sm:$0xf] %v303_v63  ;;  %306 = vst [vmem:[%s2836_s27 + $0x100] sm:$0xf] %v305_v0  ;;  %v307_v1 = vld [vmem:[%s2829_s26 + $0x514] sm:$0xf] }
  0x3d   : > { %v309_v2 = vld [vmem:[%s2829_s26 + $0x528] sm:$0xf]  ;;  %v311_v3 = vld [vmem:[%s2829_s26 + $0x53c] sm:$0xf]  ;;  %308 = vst [vmem:[%s2836_s27 + $0x104] sm:$0xf] %v307_v1 }
  0x3e   : > { %310 = vst [vmem:[%s2836_s27 + $0x108] sm:$0xf] %v309_v2  ;;  %312 = vst [vmem:[%s2836_s27 + $0x10c] sm:$0xf] %v311_v3  ;;  %v313_v4 = vld [vmem:[%s2829_s26 + $0x550] sm:$0xf] }
  0x3f   : > { %v315_v5 = vld [vmem:[%s2829_s26 + $0x564] sm:$0xf]  ;;  %v317_v6 = vld [vmem:[%s2829_s26 + $0x578] sm:$0xf]  ;;  %314 = vst [vmem:[%s2836_s27 + $0x110] sm:$0xf] %v313_v4 }
  0x40   : > { %316 = vst [vmem:[%s2836_s27 + $0x114] sm:$0xf] %v315_v5  ;;  %318 = vst [vmem:[%s2836_s27 + $0x118] sm:$0xf] %v317_v6  ;;  %v319_v7 = vld [vmem:[%s2829_s26 + $0x58c] sm:$0xf] }
  0x41   : > { %v321_v8 = vld [vmem:[%s2829_s26 + $0x5a0] sm:$0xf]  ;;  %v323_v9 = vld [vmem:[%s2829_s26 + $0x5b4] sm:$0xf]  ;;  %320 = vst [vmem:[%s2836_s27 + $0x11c] sm:$0xf] %v319_v7 }
  0x42   : > { %322 = vst [vmem:[%s2836_s27 + $0x120] sm:$0xf] %v321_v8  ;;  %324 = vst [vmem:[%s2836_s27 + $0x124] sm:$0xf] %v323_v9  ;;  %v325_v10 = vld [vmem:[%s2829_s26 + $0x5c8] sm:$0xf] }
  0x43   : > { %v327_v11 = vld [vmem:[%s2829_s26 + $0x5dc] sm:$0xf]  ;;  %v329_v12 = vld [vmem:[%s2829_s26 + $0x5f0] sm:$0xf]  ;;  %326 = vst [vmem:[%s2836_s27 + $0x128] sm:$0xf] %v325_v10 }
  0x44   : > { %328 = vst [vmem:[%s2836_s27 + $0x12c] sm:$0xf] %v327_v11  ;;  %330 = vst [vmem:[%s2836_s27 + $0x130] sm:$0xf] %v329_v12  ;;  %v331_v13 = vld [vmem:[%s2829_s26 + $0x604] sm:$0xf] }
  0x45   : > { %v333_v14 = vld [vmem:[%s2829_s26 + $0x618] sm:$0xf]  ;;  %v335_v15 = vld [vmem:[%s2829_s26 + $0x62c] sm:$0xf]  ;;  %332 = vst [vmem:[%s2836_s27 + $0x134] sm:$0xf] %v331_v13 }
  0x46   : > { %334 = vst [vmem:[%s2836_s27 + $0x138] sm:$0xf] %v333_v14  ;;  %336 = vst [vmem:[%s2836_s27 + $0x13c] sm:$0xf] %v335_v15  ;;  %v337_v16 = vld [vmem:[%s2829_s26 + $0x640] sm:$0xf] }
  0x47   : > { %v339_v17 = vld [vmem:[%s2829_s26 + $0x654] sm:$0xf]  ;;  %v341_v18 = vld [vmem:[%s2829_s26 + $0x668] sm:$0xf]  ;;  %338 = vst [vmem:[%s2836_s27 + $0x140] sm:$0xf] %v337_v16 }
  0x48   : > { %340 = vst [vmem:[%s2836_s27 + $0x144] sm:$0xf] %v339_v17  ;;  %342 = vst [vmem:[%s2836_s27 + $0x148] sm:$0xf] %v341_v18  ;;  %v343_v19 = vld [vmem:[%s2829_s26 + $0x67c] sm:$0xf] }
  0x49   : > { %v345_v20 = vld [vmem:[%s2829_s26 + $0x690] sm:$0xf]  ;;  %v347_v21 = vld [vmem:[%s2829_s26 + $0x6a4] sm:$0xf]  ;;  %344 = vst [vmem:[%s2836_s27 + $0x14c] sm:$0xf] %v343_v19 }
  0x4a   : > { %346 = vst [vmem:[%s2836_s27 + $0x150] sm:$0xf] %v345_v20  ;;  %348 = vst [vmem:[%s2836_s27 + $0x154] sm:$0xf] %v347_v21  ;;  %v349_v22 = vld [vmem:[%s2829_s26 + $0x6b8] sm:$0xf] }
  0x4b   : > { %v351_v23 = vld [vmem:[%s2829_s26 + $0x6cc] sm:$0xf]  ;;  %v353_v24 = vld [vmem:[%s2829_s26 + $0x6e0] sm:$0xf]  ;;  %350 = vst [vmem:[%s2836_s27 + $0x158] sm:$0xf] %v349_v22 }
  0x4c   : > { %352 = vst [vmem:[%s2836_s27 + $0x15c] sm:$0xf] %v351_v23  ;;  %354 = vst [vmem:[%s2836_s27 + $0x160] sm:$0xf] %v353_v24  ;;  %v355_v25 = vld [vmem:[%s2829_s26 + $0x6f4] sm:$0xf] }
  0x4d   : > { %v357_v26 = vld [vmem:[%s2829_s26 + $0x708] sm:$0xf]  ;;  %v359_v27 = vld [vmem:[%s2829_s26 + $0x71c] sm:$0xf]  ;;  %356 = vst [vmem:[%s2836_s27 + $0x164] sm:$0xf] %v355_v25 }
  0x4e   : > { %358 = vst [vmem:[%s2836_s27 + $0x168] sm:$0xf] %v357_v26  ;;  %360 = vst [vmem:[%s2836_s27 + $0x16c] sm:$0xf] %v359_v27  ;;  %v361_v28 = vld [vmem:[%s2829_s26 + $0x730] sm:$0xf] }
  0x4f   : > { %v363_v29 = vld [vmem:[%s2829_s26 + $0x744] sm:$0xf]  ;;  %v365_v30 = vld [vmem:[%s2829_s26 + $0x758] sm:$0xf]  ;;  %362 = vst [vmem:[%s2836_s27 + $0x170] sm:$0xf] %v361_v28 }
  0x50   : > { %364 = vst [vmem:[%s2836_s27 + $0x174] sm:$0xf] %v363_v29  ;;  %366 = vst [vmem:[%s2836_s27 + $0x178] sm:$0xf] %v365_v30  ;;  %v367_v31 = vld [vmem:[%s2829_s26 + $0x76c] sm:$0xf] }
  0x51   : > { %v369_v32 = vld [vmem:[%s2829_s26 + $0x780] sm:$0xf]  ;;  %v371_v33 = vld [vmem:[%s2829_s26 + $0x794] sm:$0xf]  ;;  %368 = vst [vmem:[%s2836_s27 + $0x17c] sm:$0xf] %v367_v31 }
  0x52   : > { %370 = vst [vmem:[%s2836_s27 + $0x180] sm:$0xf] %v369_v32  ;;  %372 = vst [vmem:[%s2836_s27 + $0x184] sm:$0xf] %v371_v33  ;;  %v373_v34 = vld [vmem:[%s2829_s26 + $0x7a8] sm:$0xf] }
  0x53   : > { %v375_v35 = vld [vmem:[%s2829_s26 + $0x7bc] sm:$0xf]  ;;  %v377_v36 = vld [vmem:[%s2829_s26 + $0x7d0] sm:$0xf]  ;;  %374 = vst [vmem:[%s2836_s27 + $0x188] sm:$0xf] %v373_v34 }
  0x54   : > { %376 = vst [vmem:[%s2836_s27 + $0x18c] sm:$0xf] %v375_v35  ;;  %378 = vst [vmem:[%s2836_s27 + $0x190] sm:$0xf] %v377_v36  ;;  %v379_v37 = vld [vmem:[%s2829_s26 + $0x7e4] sm:$0xf] }
  0x55   : > { %v381_v38 = vld [vmem:[%s2829_s26 + $0x7f8] sm:$0xf]  ;;  %v383_v39 = vld [vmem:[%s2829_s26 + $0x80c] sm:$0xf]  ;;  %380 = vst [vmem:[%s2836_s27 + $0x194] sm:$0xf] %v379_v37 }
  0x56   : > { %382 = vst [vmem:[%s2836_s27 + $0x198] sm:$0xf] %v381_v38  ;;  %384 = vst [vmem:[%s2836_s27 + $0x19c] sm:$0xf] %v383_v39  ;;  %v385_v40 = vld [vmem:[%s2829_s26 + $0x820] sm:$0xf] }
  0x57   : > { %v387_v41 = vld [vmem:[%s2829_s26 + $0x834] sm:$0xf]  ;;  %v389_v42 = vld [vmem:[%s2829_s26 + $0x848] sm:$0xf]  ;;  %386 = vst [vmem:[%s2836_s27 + $0x1a0] sm:$0xf] %v385_v40 }
  0x58   : > { %388 = vst [vmem:[%s2836_s27 + $0x1a4] sm:$0xf] %v387_v41  ;;  %390 = vst [vmem:[%s2836_s27 + $0x1a8] sm:$0xf] %v389_v42  ;;  %v391_v43 = vld [vmem:[%s2829_s26 + $0x85c] sm:$0xf] }
  0x59   : > { %v393_v44 = vld [vmem:[%s2829_s26 + $0x870] sm:$0xf]  ;;  %v395_v45 = vld [vmem:[%s2829_s26 + $0x884] sm:$0xf]  ;;  %392 = vst [vmem:[%s2836_s27 + $0x1ac] sm:$0xf] %v391_v43 }
  0x5a   : > { %394 = vst [vmem:[%s2836_s27 + $0x1b0] sm:$0xf] %v393_v44  ;;  %396 = vst [vmem:[%s2836_s27 + $0x1b4] sm:$0xf] %v395_v45  ;;  %v397_v46 = vld [vmem:[%s2829_s26 + $0x898] sm:$0xf] }
  0x5b   : > { %v399_v47 = vld [vmem:[%s2829_s26 + $0x8ac] sm:$0xf]  ;;  %v401_v48 = vld [vmem:[%s2829_s26 + $0x8c0] sm:$0xf]  ;;  %398 = vst [vmem:[%s2836_s27 + $0x1b8] sm:$0xf] %v397_v46 }
  0x5c   : > { %400 = vst [vmem:[%s2836_s27 + $0x1bc] sm:$0xf] %v399_v47  ;;  %402 = vst [vmem:[%s2836_s27 + $0x1c0] sm:$0xf] %v401_v48  ;;  %v403_v49 = vld [vmem:[%s2829_s26 + $0x8d4] sm:$0xf] }
  0x5d   : > { %v405_v50 = vld [vmem:[%s2829_s26 + $0x8e8] sm:$0xf]  ;;  %v407_v51 = vld [vmem:[%s2829_s26 + $0x8fc] sm:$0xf]  ;;  %404 = vst [vmem:[%s2836_s27 + $0x1c4] sm:$0xf] %v403_v49 }
  0x5e   : > { %406 = vst [vmem:[%s2836_s27 + $0x1c8] sm:$0xf] %v405_v50  ;;  %408 = vst [vmem:[%s2836_s27 + $0x1cc] sm:$0xf] %v407_v51  ;;  %v409_v52 = vld [vmem:[%s2829_s26 + $0x910] sm:$0xf] }
  0x5f   : > { %v411_v53 = vld [vmem:[%s2829_s26 + $0x924] sm:$0xf]  ;;  %v413_v54 = vld [vmem:[%s2829_s26 + $0x938] sm:$0xf]  ;;  %410 = vst [vmem:[%s2836_s27 + $0x1d0] sm:$0xf] %v409_v52 }
  0x60   : > { %412 = vst [vmem:[%s2836_s27 + $0x1d4] sm:$0xf] %v411_v53  ;;  %414 = vst [vmem:[%s2836_s27 + $0x1d8] sm:$0xf] %v413_v54  ;;  %v415_v55 = vld [vmem:[%s2829_s26 + $0x94c] sm:$0xf] }
  0x61   : > { %v417_v56 = vld [vmem:[%s2829_s26 + $0x960] sm:$0xf]  ;;  %v419_v57 = vld [vmem:[%s2829_s26 + $0x974] sm:$0xf]  ;;  %416 = vst [vmem:[%s2836_s27 + $0x1dc] sm:$0xf] %v415_v55 }
  0x62   : > { %418 = vst [vmem:[%s2836_s27 + $0x1e0] sm:$0xf] %v417_v56  ;;  %420 = vst [vmem:[%s2836_s27 + $0x1e4] sm:$0xf] %v419_v57  ;;  %v421_v58 = vld [vmem:[%s2829_s26 + $0x988] sm:$0xf] }
  0x63   : > { %v423_v59 = vld [vmem:[%s2829_s26 + $0x99c] sm:$0xf]  ;;  %v425_v60 = vld [vmem:[%s2829_s26 + $0x9b0] sm:$0xf]  ;;  %422 = vst [vmem:[%s2836_s27 + $0x1e8] sm:$0xf] %v421_v58 }
  0x64   : > { %424 = vst [vmem:[%s2836_s27 + $0x1ec] sm:$0xf] %v423_v59  ;;  %426 = vst [vmem:[%s2836_s27 + $0x1f0] sm:$0xf] %v425_v60  ;;  %v427_v61 = vld [vmem:[%s2829_s26 + $0x9c4] sm:$0xf] }
  0x65   : > { %v429_v62 = vld [vmem:[%s2829_s26 + $0x9d8] sm:$0xf]  ;;  %v431_v63 = vld [vmem:[%s2829_s26 + $0x9ec] sm:$0xf]  ;;  %428 = vst [vmem:[%s2836_s27 + $0x1f4] sm:$0xf] %v427_v61 }
  0x66   : > { %430 = vst [vmem:[%s2836_s27 + $0x1f8] sm:$0xf] %v429_v62  ;;  %432 = vst [vmem:[%s2836_s27 + $0x1fc] sm:$0xf] %v431_v63  ;;  %v433_v0 = vld [vmem:[%s2829_s26 + $0xa00] sm:$0xf] }
  0x67   : > { %v435_v1 = vld [vmem:[%s2829_s26 + $0xa14] sm:$0xf]  ;;  %v437_v2 = vld [vmem:[%s2829_s26 + $0xa28] sm:$0xf]  ;;  %434 = vst [vmem:[%s2836_s27 + $0x200] sm:$0xf] %v433_v0 }
  0x68   : > { %436 = vst [vmem:[%s2836_s27 + $0x204] sm:$0xf] %v435_v1  ;;  %438 = vst [vmem:[%s2836_s27 + $0x208] sm:$0xf] %v437_v2  ;;  %v439_v3 = vld [vmem:[%s2829_s26 + $0xa3c] sm:$0xf] }
  0x69   : > { %v441_v4 = vld [vmem:[%s2829_s26 + $0xa50] sm:$0xf]  ;;  %v443_v5 = vld [vmem:[%s2829_s26 + $0xa64] sm:$0xf]  ;;  %440 = vst [vmem:[%s2836_s27 + $0x20c] sm:$0xf] %v439_v3 }
  0x6a   : > { %442 = vst [vmem:[%s2836_s27 + $0x210] sm:$0xf] %v441_v4  ;;  %444 = vst [vmem:[%s2836_s27 + $0x214] sm:$0xf] %v443_v5  ;;  %v445_v6 = vld [vmem:[%s2829_s26 + $0xa78] sm:$0xf] }
  0x6b   : > { %v447_v7 = vld [vmem:[%s2829_s26 + $0xa8c] sm:$0xf]  ;;  %v449_v8 = vld [vmem:[%s2829_s26 + $0xaa0] sm:$0xf]  ;;  %446 = vst [vmem:[%s2836_s27 + $0x218] sm:$0xf] %v445_v6 }
  0x6c   : > { %448 = vst [vmem:[%s2836_s27 + $0x21c] sm:$0xf] %v447_v7  ;;  %450 = vst [vmem:[%s2836_s27 + $0x220] sm:$0xf] %v449_v8  ;;  %v451_v9 = vld [vmem:[%s2829_s26 + $0xab4] sm:$0xf] }
  0x6d   : > { %v453_v10 = vld [vmem:[%s2829_s26 + $0xac8] sm:$0xf]  ;;  %v455_v11 = vld [vmem:[%s2829_s26 + $0xadc] sm:$0xf]  ;;  %452 = vst [vmem:[%s2836_s27 + $0x224] sm:$0xf] %v451_v9 }
  0x6e   : > { %454 = vst [vmem:[%s2836_s27 + $0x228] sm:$0xf] %v453_v10  ;;  %456 = vst [vmem:[%s2836_s27 + $0x22c] sm:$0xf] %v455_v11  ;;  %v457_v12 = vld [vmem:[%s2829_s26 + $0xaf0] sm:$0xf] }
  0x6f   : > { %v459_v13 = vld [vmem:[%s2829_s26 + $0xb04] sm:$0xf]  ;;  %v461_v14 = vld [vmem:[%s2829_s26 + $0xb18] sm:$0xf]  ;;  %458 = vst [vmem:[%s2836_s27 + $0x230] sm:$0xf] %v457_v12 }
  0x70   : > { %460 = vst [vmem:[%s2836_s27 + $0x234] sm:$0xf] %v459_v13  ;;  %462 = vst [vmem:[%s2836_s27 + $0x238] sm:$0xf] %v461_v14  ;;  %v463_v15 = vld [vmem:[%s2829_s26 + $0xb2c] sm:$0xf] }
  0x71   : > { %v465_v16 = vld [vmem:[%s2829_s26 + $0xb40] sm:$0xf]  ;;  %v467_v17 = vld [vmem:[%s2829_s26 + $0xb54] sm:$0xf]  ;;  %464 = vst [vmem:[%s2836_s27 + $0x23c] sm:$0xf] %v463_v15 }
  0x72   : > { %466 = vst [vmem:[%s2836_s27 + $0x240] sm:$0xf] %v465_v16  ;;  %468 = vst [vmem:[%s2836_s27 + $0x244] sm:$0xf] %v467_v17  ;;  %v469_v18 = vld [vmem:[%s2829_s26 + $0xb68] sm:$0xf] }
  0x73   : > { %v471_v19 = vld [vmem:[%s2829_s26 + $0xb7c] sm:$0xf]  ;;  %v473_v20 = vld [vmem:[%s2829_s26 + $0xb90] sm:$0xf]  ;;  %470 = vst [vmem:[%s2836_s27 + $0x248] sm:$0xf] %v469_v18 }
  0x74   : > { %472 = vst [vmem:[%s2836_s27 + $0x24c] sm:$0xf] %v471_v19  ;;  %474 = vst [vmem:[%s2836_s27 + $0x250] sm:$0xf] %v473_v20  ;;  %v475_v21 = vld [vmem:[%s2829_s26 + $0xba4] sm:$0xf] }
  0x75   : > { %v477_v22 = vld [vmem:[%s2829_s26 + $0xbb8] sm:$0xf]  ;;  %v479_v23 = vld [vmem:[%s2829_s26 + $0xbcc] sm:$0xf]  ;;  %476 = vst [vmem:[%s2836_s27 + $0x254] sm:$0xf] %v475_v21 }
  0x76   : > { %478 = vst [vmem:[%s2836_s27 + $0x258] sm:$0xf] %v477_v22  ;;  %480 = vst [vmem:[%s2836_s27 + $0x25c] sm:$0xf] %v479_v23  ;;  %v481_v24 = vld [vmem:[%s2829_s26 + $0xbe0] sm:$0xf] }
  0x77   : > { %v483_v25 = vld [vmem:[%s2829_s26 + $0xbf4] sm:$0xf]  ;;  %v485_v26 = vld [vmem:[%s2829_s26 + $0xc08] sm:$0xf]  ;;  %482 = vst [vmem:[%s2836_s27 + $0x260] sm:$0xf] %v481_v24 }
  0x78   : > { %484 = vst [vmem:[%s2836_s27 + $0x264] sm:$0xf] %v483_v25  ;;  %486 = vst [vmem:[%s2836_s27 + $0x268] sm:$0xf] %v485_v26  ;;  %v487_v27 = vld [vmem:[%s2829_s26 + $0xc1c] sm:$0xf] }
  0x79   : > { %v489_v28 = vld [vmem:[%s2829_s26 + $0xc30] sm:$0xf]  ;;  %v491_v29 = vld [vmem:[%s2829_s26 + $0xc44] sm:$0xf]  ;;  %488 = vst [vmem:[%s2836_s27 + $0x26c] sm:$0xf] %v487_v27 }
  0x7a   : > { %490 = vst [vmem:[%s2836_s27 + $0x270] sm:$0xf] %v489_v28  ;;  %492 = vst [vmem:[%s2836_s27 + $0x274] sm:$0xf] %v491_v29  ;;  %v493_v30 = vld [vmem:[%s2829_s26 + $0xc58] sm:$0xf] }
  0x7b   : > { %v495_v31 = vld [vmem:[%s2829_s26 + $0xc6c] sm:$0xf]  ;;  %v497_v32 = vld [vmem:[%s2829_s26 + $0xc80] sm:$0xf]  ;;  %494 = vst [vmem:[%s2836_s27 + $0x278] sm:$0xf] %v493_v30 }
  0x7c   : > { %496 = vst [vmem:[%s2836_s27 + $0x27c] sm:$0xf] %v495_v31  ;;  %498 = vst [vmem:[%s2836_s27 + $0x280] sm:$0xf] %v497_v32  ;;  %v499_v33 = vld [vmem:[%s2829_s26 + $0xc94] sm:$0xf] }
  0x7d   : > { %v501_v34 = vld [vmem:[%s2829_s26 + $0xca8] sm:$0xf]  ;;  %v503_v35 = vld [vmem:[%s2829_s26 + $0xcbc] sm:$0xf]  ;;  %500 = vst [vmem:[%s2836_s27 + $0x284] sm:$0xf] %v499_v33 }
  0x7e   : > { %502 = vst [vmem:[%s2836_s27 + $0x288] sm:$0xf] %v501_v34  ;;  %504 = vst [vmem:[%s2836_s27 + $0x28c] sm:$0xf] %v503_v35  ;;  %v505_v36 = vld [vmem:[%s2829_s26 + $0xcd0] sm:$0xf] }
  0x7f   : > { %v507_v37 = vld [vmem:[%s2829_s26 + $0xce4] sm:$0xf]  ;;  %v509_v38 = vld [vmem:[%s2829_s26 + $0xcf8] sm:$0xf]  ;;  %506 = vst [vmem:[%s2836_s27 + $0x290] sm:$0xf] %v505_v36 }
  0x80   : > { %508 = vst [vmem:[%s2836_s27 + $0x294] sm:$0xf] %v507_v37  ;;  %510 = vst [vmem:[%s2836_s27 + $0x298] sm:$0xf] %v509_v38  ;;  %v511_v39 = vld [vmem:[%s2829_s26 + $0xd0c] sm:$0xf] }
  0x81   : > { %v513_v40 = vld [vmem:[%s2829_s26 + $0xd20] sm:$0xf]  ;;  %v515_v41 = vld [vmem:[%s2829_s26 + $0xd34] sm:$0xf]  ;;  %512 = vst [vmem:[%s2836_s27 + $0x29c] sm:$0xf] %v511_v39 }
  0x82   : > { %514 = vst [vmem:[%s2836_s27 + $0x2a0] sm:$0xf] %v513_v40  ;;  %516 = vst [vmem:[%s2836_s27 + $0x2a4] sm:$0xf] %v515_v41  ;;  %v517_v42 = vld [vmem:[%s2829_s26 + $0xd48] sm:$0xf] }
  0x83   : > { %v519_v43 = vld [vmem:[%s2829_s26 + $0xd5c] sm:$0xf]  ;;  %v521_v44 = vld [vmem:[%s2829_s26 + $0xd70] sm:$0xf]  ;;  %518 = vst [vmem:[%s2836_s27 + $0x2a8] sm:$0xf] %v517_v42 }
  0x84   : > { %520 = vst [vmem:[%s2836_s27 + $0x2ac] sm:$0xf] %v519_v43  ;;  %522 = vst [vmem:[%s2836_s27 + $0x2b0] sm:$0xf] %v521_v44  ;;  %v523_v45 = vld [vmem:[%s2829_s26 + $0xd84] sm:$0xf] }
  0x85   : > { %v525_v46 = vld [vmem:[%s2829_s26 + $0xd98] sm:$0xf]  ;;  %v527_v47 = vld [vmem:[%s2829_s26 + $0xdac] sm:$0xf]  ;;  %524 = vst [vmem:[%s2836_s27 + $0x2b4] sm:$0xf] %v523_v45 }
  0x86   : > { %526 = vst [vmem:[%s2836_s27 + $0x2b8] sm:$0xf] %v525_v46  ;;  %528 = vst [vmem:[%s2836_s27 + $0x2bc] sm:$0xf] %v527_v47  ;;  %v529_v48 = vld [vmem:[%s2829_s26 + $0xdc0] sm:$0xf] }
  0x87   : > { %v531_v49 = vld [vmem:[%s2829_s26 + $0xdd4] sm:$0xf]  ;;  %v533_v50 = vld [vmem:[%s2829_s26 + $0xde8] sm:$0xf]  ;;  %530 = vst [vmem:[%s2836_s27 + $0x2c0] sm:$0xf] %v529_v48 }
  0x88   : > { %532 = vst [vmem:[%s2836_s27 + $0x2c4] sm:$0xf] %v531_v49  ;;  %534 = vst [vmem:[%s2836_s27 + $0x2c8] sm:$0xf] %v533_v50  ;;  %v535_v51 = vld [vmem:[%s2829_s26 + $0xdfc] sm:$0xf] }
  0x89   : > { %v537_v52 = vld [vmem:[%s2829_s26 + $0xe10] sm:$0xf]  ;;  %v539_v53 = vld [vmem:[%s2829_s26 + $0xe24] sm:$0xf]  ;;  %536 = vst [vmem:[%s2836_s27 + $0x2cc] sm:$0xf] %v535_v51 }
  0x8a   : > { %538 = vst [vmem:[%s2836_s27 + $0x2d0] sm:$0xf] %v537_v52  ;;  %540 = vst [vmem:[%s2836_s27 + $0x2d4] sm:$0xf] %v539_v53  ;;  %v541_v54 = vld [vmem:[%s2829_s26 + $0xe38] sm:$0xf] }
  0x8b   : > { %v543_v55 = vld [vmem:[%s2829_s26 + $0xe4c] sm:$0xf]  ;;  %v545_v56 = vld [vmem:[%s2829_s26 + $0xe60] sm:$0xf]  ;;  %542 = vst [vmem:[%s2836_s27 + $0x2d8] sm:$0xf] %v541_v54 }
  0x8c   : > { %544 = vst [vmem:[%s2836_s27 + $0x2dc] sm:$0xf] %v543_v55  ;;  %546 = vst [vmem:[%s2836_s27 + $0x2e0] sm:$0xf] %v545_v56  ;;  %v547_v57 = vld [vmem:[%s2829_s26 + $0xe74] sm:$0xf] }
  0x8d   : > { %v549_v58 = vld [vmem:[%s2829_s26 + $0xe88] sm:$0xf]  ;;  %v551_v59 = vld [vmem:[%s2829_s26 + $0xe9c] sm:$0xf]  ;;  %548 = vst [vmem:[%s2836_s27 + $0x2e4] sm:$0xf] %v547_v57 }
  0x8e   : > { %550 = vst [vmem:[%s2836_s27 + $0x2e8] sm:$0xf] %v549_v58  ;;  %552 = vst [vmem:[%s2836_s27 + $0x2ec] sm:$0xf] %v551_v59  ;;  %v553_v60 = vld [vmem:[%s2829_s26 + $0xeb0] sm:$0xf] }
  0x8f   : > { %v555_v61 = vld [vmem:[%s2829_s26 + $0xec4] sm:$0xf]  ;;  %v557_v62 = vld [vmem:[%s2829_s26 + $0xed8] sm:$0xf]  ;;  %554 = vst [vmem:[%s2836_s27 + $0x2f0] sm:$0xf] %v553_v60 }
  0x90   : > { %556 = vst [vmem:[%s2836_s27 + $0x2f4] sm:$0xf] %v555_v61  ;;  %558 = vst [vmem:[%s2836_s27 + $0x2f8] sm:$0xf] %v557_v62  ;;  %v559_v63 = vld [vmem:[%s2829_s26 + $0xeec] sm:$0xf] }
  0x91   : > { %v561_v0 = vld [vmem:[%s2829_s26 + $0xf00] sm:$0xf]  ;;  %v563_v1 = vld [vmem:[%s2829_s26 + $0xf14] sm:$0xf]  ;;  %560 = vst [vmem:[%s2836_s27 + $0x2fc] sm:$0xf] %v559_v63 }
  0x92   : > { %562 = vst [vmem:[%s2836_s27 + $0x300] sm:$0xf] %v561_v0  ;;  %564 = vst [vmem:[%s2836_s27 + $0x304] sm:$0xf] %v563_v1  ;;  %v565_v2 = vld [vmem:[%s2829_s26 + $0xf28] sm:$0xf] }
  0x93   : > { %v567_v3 = vld [vmem:[%s2829_s26 + $0xf3c] sm:$0xf]  ;;  %566 = vst [vmem:[%s2836_s27 + $0x308] sm:$0xf] %v565_v2 }
  0x94   : > { %568 = vst [vmem:[%s2836_s27 + $0x30c] sm:$0xf] %v567_v3 }
  0x95 PF: > { %p2332_p6 = scmp.ge.s32.totalorder %s2761_s16, 1  ;;  %p988_p7 = scmp.lt.s32.totalorder %s2761_s16, 6 }
  0x97   : > { %p989_p8 = pnand %p2332_p6, %p988_p7 }
  0x98   : > { %s995_s28 = sand.u32 (!%p989_p8), 1, %s2745_s12   ;;  %v1253_v4 = vlaneseq (!%p989_p8)  ;;  %v2763_v5 = vmov (!%p989_p8), 1966171168   ;;  %v1042_v8 = vld [vmem:[%s3389_s0] sm:$0xff] (!%p989_p8)  ;;  %vm2765_vm0 = vmmov (!%p989_p8), 0   ;;  %vm1937_vm1 = vcmask (!%p989_p8), 261120  }
  0x99   : > { %992 = sbr.rel (%p989_p8) target bundleno = 481 (0x1e1), region = 69  ;;  %v1251_v6 = vunpack.c.l.s4 (!%p989_p8), %v2763_v5  ;;  %v1249_v33 = vcombine.high (!%p989_p8), %v1042_v8, %v1042_v8  ;;  %p1031_p9 = scmp.lt.s32.totalorder (!%p989_p8), %s2753_s14, 4 }
  0x9a   : > { %s2579_s29 = smul.u32 (!%p989_p8), 784, %s995_s28  ;;  %v1254_v7 = vshrl.u32 (!%p989_p8), %v1253_v4, 7 }
  0x9b   : > { %v1252_v9 = vunpack.c.0.s8 (!%p989_p8), %v1251_v6 }
  0x9c   : > { %s3231_s5 = scalar_lea.vmem (!%p989_p8), [#allocation2], %s2579_s29 }
  0x9d   : > { %v2623_v10 = vld [vmem:[%s3231_s5 + $0x40] sm:$0xff] (!%p989_p8)   ;;  %v3235_v12 = vsub.s32 (!%p989_p8), %v1252_v9, %v1254_v7  ;;  %v2627_v16 = vld [vmem:[%s3231_s5 + $0x48] sm:$0xff] (!%p989_p8)   ;;  %v2631_v22 = vld [vmem:[%s3231_s5 + $0x50] sm:$0xff] (!%p989_p8)  }
  0x9e   : > { %v2624_v11 = vld [vmem:[%s3231_s5] sm:$0xff] (!%p989_p8)   ;;  %2435 = vmatprep.subr.bf16.mxu0 (!%p989_p8), %v2623_v10  ;;  %v2628_v17 = vld [vmem:[%s3231_s5 + $0x8] sm:$0xff] (!%p989_p8)   ;;  %v2632_v23 = vld [vmem:[%s3231_s5 + $0x10] sm:$0xff] (!%p989_p8)  }
  0x9f   : > { %v2625_v13 = vld [vmem:[%s3231_s5 + $0xc0] sm:$0xff] (!%p989_p8)   ;;  %2436 = vmatpush3.bf16.msra.mxu0 (!%p989_p8), %v2624_v11  ;;  %v1256_v15 = vrot.slane (!%p989_p8), %v1042_v8, %v3235_v12  ;;  %v2629_v19 = vld [vmem:[%s3231_s5 + $0xc8] sm:$0xff] (!%p989_p8)   ;;  %v2633_v25 = vld [vmem:[%s3231_s5 + $0xd0] sm:$0xff] (!%p989_p8)   ;;  %v3260_v38 = vrot.slane (!%p989_p8), %v1249_v33, %v3235_v12 }
  0xa0   : > { %v2626_v14 = vld [vmem:[%s3231_s5 + $0x80] sm:$0xff]   ;;  %2457 = vmatprep.subr.bf16.mxu1 %v2625_v13  ;;  %2437 = vmatprep.subr.bf16.mxu0 %v2627_v16  ;;  %v2630_v20 = vld [vmem:[%s3231_s5 + $0x88] sm:$0xff]   ;;  %v2634_v26 = vld [vmem:[%s3231_s5 + $0x90] sm:$0xff]   ;;  %s3400_s14 = smov (!%p1031_p9, %s2753_s14), 4 }
  0xa1   : > { %2458 = vmatpush3.bf16.msra.mxu1 %v2626_v14  ;;  %v1264_v18 = vcombine.high %v1256_v15, %v1256_v15  ;;  %v2635_v27 = vld [vmem:[%s3231_s5 + $0x58] sm:$0xff]   ;;  %v2639_v31 = vld [vmem:[%s3231_s5 + $0x60] sm:$0xff]   ;;  %v2643_v36 = vld [vmem:[%s3231_s5 + $0x68] sm:$0xff]   ;;  %v1265_v43 = vcombine.high %v3260_v38, %v3260_v38  ;;  %v1272_v47 = vrot.slane %v1256_v15, %v3235_v12  ;;  %s1033_s10 = scalar_lea.vmem %s3391_s2, %s3400_s14  ;;  %s1040_s18 = scalar_lea.vmem %s3392_s3, %s3400_s14 }
  0xa2   : > { %2459 = vmatprep.subr.bf16.mxu1 %v2629_v19  ;;  %v2636_v28 = vld [vmem:[%s3231_s5 + $0x18] sm:$0xff]   ;;  %v2640_v32 = vld [vmem:[%s3231_s5 + $0x20] sm:$0xff]   ;;  %v2644_v37 = vld [vmem:[%s3231_s5 + $0x28] sm:$0xff]  }
  0xa3   : > { %2438 = vmatpush3.bf16.msra.mxu0 %v2628_v17  ;;  %v1286_v21 = vrot.slane %v1264_v18, %v3235_v12  ;;  %v2637_v29 = vld [vmem:[%s3231_s5 + $0xd8] sm:$0xff]   ;;  %v2641_v34 = vld [vmem:[%s3231_s5 + $0xe0] sm:$0xff]   ;;  %v2645_v39 = vld [vmem:[%s3231_s5 + $0xe8] sm:$0xff]   ;;  %v1293_v49 = vrot.slane %v1265_v43, %v3235_v12  ;;  %v1294_v53 = vcombine.high %v1272_v47, %v1272_v47 }
  0xa4   : > { %2439 = vmatprep.subr.bf16.mxu0 %v2631_v22  ;;  %v2638_v30 = vld [vmem:[%s3231_s5 + $0x98] sm:$0xff]   ;;  %v2642_v35 = vld [vmem:[%s3231_s5 + $0xa0] sm:$0xff]   ;;  %v2646_v40 = vld [vmem:[%s3231_s5 + $0xa8] sm:$0xff]  }
  0xa5   : > { %2460 = vmatpush3.bf16.msra.mxu1 %v2630_v20  ;;  %1973 = vmatprep.mubr.bf16.mxu0 %v1286_v21  ;;  %v1296_v24 = vcombine.high %v1286_v21, %v1286_v21  ;;  %v2647_v41 = vld [vmem:[%s3231_s5 + $0x70] sm:$0xff]   ;;  %v2651_v46 = vld [vmem:[%s3231_s5 + $0x78] sm:$0xff]   ;;  %v2656_v52 = vld [vmem:[%s3231_s5 + $0x140] sm:$0xff]   ;;  %v1297_v55 = vcombine.high %v1293_v49, %v1293_v49 }
  0xa6   : > { %2461 = vmatprep.subr.bf16.mxu1 %v2633_v25  ;;  %v2648_v42 = vld [vmem:[%s3231_s5 + $0x30] sm:$0xff]   ;;  %v2652_v48 = vld [vmem:[%s3231_s5 + $0x38] sm:$0xff]   ;;  %v2657_v54 = vld [vmem:[%s3231_s5 + $0x100] sm:$0xff]  }
  0xa7   : > { %2440 = vmatpush3.bf16.msra.mxu0 %v2632_v23  ;;  %2013 = vmatprep.mubr.bf16.mxu1 %v1296_v24  ;;  %v2649_v44 = vld [vmem:[%s3231_s5 + $0xf0] sm:$0xff]   ;;  %v2653_v50 = vld [vmem:[%s3231_s5 + $0xf8] sm:$0xff]   ;;  %v2658_v56 = vld [vmem:[%s3231_s5 + $0x1c0] sm:$0xff]   ;;  %v1279_v23 = vrot.slane %v3260_v38, %v3235_v12 }
  0xa8   : > { %2441 = vmatprep.subr.bf16.mxu0 %v2635_v27  ;;  %v2650_v45 = vld [vmem:[%s3231_s5 + $0xb0] sm:$0xff]   ;;  %v2654_v51 = vld [vmem:[%s3231_s5 + $0xb8] sm:$0xff]   ;;  %v2659_v57 = vld [vmem:[%s3231_s5 + $0x180] sm:$0xff]  }
  0xa9   : > { %2462 = vmatpush3.bf16.msra.mxu1 %v2634_v26  ;;  %v2660_v58 = vld [vmem:[%s3231_s5 + $0x148] sm:$0xff]   ;;  %v2664_v62 = vld [vmem:[%s3231_s5 + $0x150] sm:$0xff]   ;;  %v2668_v2 = vld [vmem:[%s3231_s5 + $0x158] sm:$0xff]  }
  0xaa   : > { %2463 = vmatprep.subr.bf16.mxu1 %v2637_v29  ;;  %v2661_v59 = vld [vmem:[%s3231_s5 + $0x108] sm:$0xff]   ;;  %v2665_v63 = vld [vmem:[%s3231_s5 + $0x110] sm:$0xff]   ;;  %v2669_v3 = vld [vmem:[%s3231_s5 + $0x118] sm:$0xff]   ;;  %v1295_v29 = vcombine.high %v1279_v23, %v1279_v23 }
  0xab   : > { %2442 = vmatpush3.bf16.msra.mxu0 %v2636_v28  ;;  %v2662_v60 = vld [vmem:[%s3231_s5 + $0x1c8] sm:$0xff]   ;;  %v2666_v0 = vld [vmem:[%s3231_s5 + $0x1d0] sm:$0xff]   ;;  %v2670_v4 = vld [vmem:[%s3231_s5 + $0x1d8] sm:$0xff]  }
  0xac   : > { %2443 = vmatprep.subr.bf16.mxu0 %v2639_v31  ;;  %v2663_v61 = vld [vmem:[%s3231_s5 + $0x188] sm:$0xff]   ;;  %v2667_v1 = vld [vmem:[%s3231_s5 + $0x190] sm:$0xff]   ;;  %v2671_v5 = vld [vmem:[%s3231_s5 + $0x198] sm:$0xff]  }
  0xad   : > { %2464 = vmatpush3.bf16.msra.mxu1 %v2638_v30  ;;  %v2672_v6 = vld [vmem:[%s3231_s5 + $0x160] sm:$0xff]   ;;  %v3296_v7 = vld [vmem:[%s3389_s0 + $0x8] sm:$0x1f]  ;;  %v2680_v17 = vld [vmem:[%s3231_s5 + $0x170] sm:$0xff]  }
  0xae   : > { %2465 = vmatprep.subr.bf16.mxu1 %v2641_v34  ;;  %v2673_v8 = vld [vmem:[%s3231_s5 + $0x120] sm:$0xff]   ;;  %v2676_v11 = vld [vmem:[%s3231_s5 + $0x168] sm:$0xff]   ;;  %v3305_v14 = vrot.slane %v3296_v7, %v3235_v12  ;;  %v2681_v18 = vld [vmem:[%s3231_s5 + $0x130] sm:$0xff]  }
  0xaf   : > { %2444 = vmatpush3.bf16.msra.mxu0 %v2640_v32  ;;  %v2674_v9 = vld [vmem:[%s3231_s5 + $0x1e0] sm:$0xff]   ;;  %v2677_v13 = vld [vmem:[%s3231_s5 + $0x128] sm:$0xff]   ;;  %v2682_v20 = vld [vmem:[%s3231_s5 + $0x1f0] sm:$0xff]  }
  0xb0   : > { %2445 = vmatprep.subr.bf16.mxu0 %v2643_v36  ;;  %v2675_v10 = vld [vmem:[%s3231_s5 + $0x1a0] sm:$0xff]   ;;  %v2678_v15 = vld [vmem:[%s3231_s5 + $0x1e8] sm:$0xff]   ;;  %v1313_v19 = vcombine.high %v3305_v14, %v3305_v14  ;;  %v2683_v21 = vld [vmem:[%s3231_s5 + $0x1b0] sm:$0xff]  }
  0xb1   : > { %2466 = vmatpush3.bf16.msra.mxu1 %v2642_v35  ;;  %v2679_v16 = vld [vmem:[%s3231_s5 + $0x1a8] sm:$0xff]   ;;  %v2684_v22 = vld [vmem:[%s3231_s5 + $0x178] sm:$0xff]   ;;  %v2688_v28 = vld [vmem:[%s3231_s5 + $0x240] sm:$0xff]  }
  0xb2   : > { %2467 = vmatprep.subr.bf16.mxu1 %v2645_v39  ;;  %v2685_v24 = vld [vmem:[%s3231_s5 + $0x138] sm:$0xff]   ;;  %v1334_v25 = vrot.slane %v1313_v19, %v3235_v12  ;;  %v2689_v30 = vld [vmem:[%s3231_s5 + $0x200] sm:$0xff]   ;;  %v2692_v34 = vld [vmem:[%s3231_s5 + $0x248] sm:$0xff]  }
  0xb3   : > { %2446 = vmatpush3.bf16.msra.mxu0 %v2644_v37  ;;  %v2686_v26 = vld [vmem:[%s3231_s5 + $0x1f8] sm:$0xff]   ;;  %v2690_v32 = vld [vmem:[%s3231_s5 + $0x2c0] sm:$0xff]   ;;  %v2693_v35 = vld [vmem:[%s3231_s5 + $0x208] sm:$0xff]  }
  0xb4   : > { %2447 = vmatprep.subr.bf16.mxu0 %v2647_v41  ;;  %v2687_v27 = vld [vmem:[%s3231_s5 + $0x1b8] sm:$0xff]   ;;  %v1336_v31 = vcombine.high %v1334_v25, %v1334_v25  ;;  %v2691_v33 = vld [vmem:[%s3231_s5 + $0x280] sm:$0xff]   ;;  %v2694_v36 = vld [vmem:[%s3231_s5 + $0x2c8] sm:$0xff]  }
  0xb5   : > { %2468 = vmatpush3.bf16.msra.mxu1 %v2646_v40  ;;  %v2695_v37 = vld [vmem:[%s3231_s5 + $0x288] sm:$0xff]   ;;  %v2696_v38 = vld [vmem:[%s3231_s5 + $0x250] sm:$0xff]   ;;  %v2701_v43 = vld [vmem:[%s3231_s5 + $0x218] sm:$0xff]  }
  0xb6   : > { %2469 = vmatprep.subr.bf16.mxu1 %v2649_v44  ;;  %v2697_v39 = vld [vmem:[%s3231_s5 + $0x210] sm:$0xff]   ;;  %v2702_v44 = vld [vmem:[%s3231_s5 + $0x2d8] sm:$0xff]  }
  0xb7   : > { %2448 = vmatpush3.bf16.msra.mxu0 %v2648_v42  ;;  %v2698_v40 = vld [vmem:[%s3231_s5 + $0x2d0] sm:$0xff]   ;;  %v2700_v42 = vld [vmem:[%s3231_s5 + $0x258] sm:$0xff]  }
  0xb8   : > { %2449 = vmatprep.subr.bf16.mxu0 %v2651_v46  ;;  %v2699_v41 = vld [vmem:[%s3231_s5 + $0x290] sm:$0xff]   ;;  %v2704_v46 = vld [vmem:[%s3231_s5 + $0x260] sm:$0xff]  }
  0xb9   : > { %2470 = vmatpush3.bf16.msra.mxu1 %v2650_v45  ;;  %v2703_v45 = vld [vmem:[%s3231_s5 + $0x298] sm:$0xff]  }
  0xba   : > { %2471 = vmatprep.subr.bf16.mxu1 %v2653_v50  ;;  %v2708_v50 = vld [vmem:[%s3231_s5 + $0x268] sm:$0xff]  }
  0xbb   : > { %2450 = vmatpush3.bf16.msra.mxu0 %v2652_v48  ;;  %v2706_v48 = vld [vmem:[%s3231_s5 + $0x2e0] sm:$0xff]  }
  0xbc   : > { %2479 = vmatprep.subr.bf16.mxu0 %v2656_v52  ;;  %v2710_v52 = vld [vmem:[%s3231_s5 + $0x2e8] sm:$0xff]  }
  0xbd   : > { %2472 = vmatpush3.bf16.msra.mxu1 %v2654_v51  ;;  %v2709_v51 = vld [vmem:[%s3231_s5 + $0x228] sm:$0xff]  }
  0xbe   : > { %1974 = vmatmul.mubr.bf16.vlgmr.msra.gmra.mrb[0].mxu0 %v1272_v47  ;;  %2501 = vmatprep.subr.bf16.mxu1 %v2658_v56  ;;  %v2705_v47 = vld [vmem:[%s3231_s5 + $0x220] sm:$0xff]   ;;  %v2714_v56 = vld [vmem:[%s3231_s5 + $0x2f0] sm:$0xff]  }
  0xbf   : > { %2480 = vmatpush3.bf16.msra.mxu0 %v2657_v54  ;;  %2053 = vmatprep.mubr.bf16.mxu0 %v1293_v49  ;;  %v2707_v49 = vld [vmem:[%s3231_s5 + $0x2a0] sm:$0xff]   ;;  %v2712_v54 = vld [vmem:[%s3231_s5 + $0x270] sm:$0xff]  }
  0xc0   : > { %2014 = vmatmul.mubr.bf16.vlgmr.msra.gmra.mrb[0].mxu1 %v1294_v53  ;;  %2481 = vmatprep.subr.bf16.mxu0 %v2660_v58  ;;  %v2711_v53 = vld [vmem:[%s3231_s5 + $0x2a8] sm:$0xff]   ;;  %v2716_v58 = vld [vmem:[%s3231_s5 + $0x278] sm:$0xff]  }
  0xc1   : > { %2502 = vmatpush3.bf16.msra.mxu1 %v2659_v57  ;;  %2093 = vmatprep.mubr.bf16.mxu1 %v1297_v55  ;;  %v2713_v55 = vld [vmem:[%s3231_s5 + $0x230] sm:$0xff]  }
  0xc2   : > { %2503 = vmatprep.subr.bf16.mxu1 %v2662_v60  ;;  %v2715_v57 = vld [vmem:[%s3231_s5 + $0x2b0] sm:$0xff]   ;;  %v2717_v60 = vld [vmem:[%s3231_s5 + $0x238] sm:$0xff]  }
  0xc3   : > { %2482 = vmatpush3.bf16.msra.mxu0 %v2661_v59  ;;  %v1320_v59 = vrot.slane %v3305_v14, %v3235_v12 }
  0xc4   : > { %2483 = vmatprep.subr.bf16.mxu0 %v2664_v62  ;;  %v1298_v62 = vcombine.high %v3296_v7, %v3296_v7  ;;  %v2333_v7 = vld [vmem:[%s1033_s10] ss:$0 sm:$0xff] }
  0xc5   : > { %2504 = vmatpush3.bf16.msra.mxu1 %v2663_v61  ;;  %v2718_v61 = vld [vmem:[%s3231_s5 + $0x2f8] sm:$0xff]  }
  0xc6   : > { %2505 = vmatprep.subr.bf16.mxu1 %v2666_v0  ;;  %v2764_v0 = vmov 0.0  }
  0xc7   : > { %2484 = vmatpush3.bf16.msra.mxu0 %v2665_v63  ;;  %v2719_v63 = vld [vmem:[%s3231_s5 + $0x2b8] sm:$0xff]  }
  0xc8   : > { %2485 = vmatprep.subr.bf16.mxu0 %v2668_v2  ;;  %v2721_v2 = vld [vmem:[%s3231_s5 + $0x300] sm:$0xff]  }
  0xc9   : > { %2506 = vmatpush3.bf16.msra.mxu1 %v2667_v1  ;;  %v1335_v1 = vcombine.high %v1320_v59, %v1320_v59 }
  0xca   : > { %2507 = vmatprep.subr.bf16.mxu1 %v2670_v4  ;;  %v2722_v4 = vld [vmem:[%s3231_s5 + $0x308] sm:$0xff]  }
  0xcb   : > { %2486 = vmatpush3.bf16.msra.mxu0 %v2669_v3  ;;  %v1312_v3 = vrot.slane %v1298_v62, %v3235_v12 }
  0xcc   : > { %2487 = vmatprep.subr.bf16.mxu0 %v2672_v6 }
  0xcd   : > { %2508 = vmatpush3.bf16.msra.mxu1 %v2671_v5  ;;  %v1327_v5 = vrot.slane %v1312_v3, %v3235_v12 }
  0xce   : > { %2509 = vmatprep.subr.bf16.mxu1 %v2674_v9 }
  0xcf   : > { %2488 = vmatpush3.bf16.msra.mxu0 %v2673_v8 }
  0xd0   : > { %2489 = vmatprep.subr.bf16.mxu0 %v2676_v11 }
  0xd1   : > { %2510 = vmatpush3.bf16.msra.mxu1 %v2675_v10 }
  0xd2   : > { %2511 = vmatprep.subr.bf16.mxu1 %v2678_v15 }
  0xd3   : > { %2490 = vmatpush3.bf16.msra.mxu0 %v2677_v13 }
  0xd4   : > { %2491 = vmatprep.subr.bf16.mxu0 %v2680_v17 }
  0xd5   : > { %2512 = vmatpush3.bf16.msra.mxu1 %v2679_v16 }
  0xd6   : > { %2513 = vmatprep.subr.bf16.mxu1 %v2682_v20 }
  0xd7   : > { %2492 = vmatpush3.bf16.msra.mxu0 %v2681_v18 }
  0xd8   : > { %2493 = vmatprep.subr.bf16.mxu0 %v2684_v22 }
  0xd9   : > { %2514 = vmatpush3.bf16.msra.mxu1 %v2683_v21 }
  0xda   : > { %2515 = vmatprep.subr.bf16.mxu1 %v2686_v26 }
  0xdb   : > { %2494 = vmatpush3.bf16.msra.mxu0 %v2685_v24 }
  0xdc   : > { %2523 = vmatprep.subr.bf16.mxu0 %v2688_v28 }
  0xdd   : > { %2516 = vmatpush3.bf16.msra.mxu1 %v2687_v27 }
  0xde   : > { %2054 = vmatmul.mubr.bf16.vlgmr.msra.gmra.mrb[4].mxu0 %v1279_v23  ;;  %2545 = vmatprep.subr.bf16.mxu1 %v2690_v32 }
  0xdf   : > { %2524 = vmatpush3.bf16.msra.mxu0 %v2689_v30  ;;  %2133 = vmatprep.mubr.bf16.mxu0 %v1334_v25 }
  0xe0   : > { %2094 = vmatmul.mubr.bf16.vlgmr.msra.gmra.mrb[4].mxu1 %v1295_v29  ;;  %2525 = vmatprep.subr.bf16.mxu0 %v2692_v34 }
  0xe1   : > { %2546 = vmatpush3.bf16.msra.mxu1 %v2691_v33  ;;  %2173 = vmatprep.mubr.bf16.mxu1 %v1336_v31 }
  0xe2   : > { %2547 = vmatprep.subr.bf16.mxu1 %v2694_v36 }
  0xe3   : > { %2526 = vmatpush3.bf16.msra.mxu0 %v2693_v35 }
  0xe4   : > { %2527 = vmatprep.subr.bf16.mxu0 %v2696_v38 }
  0xe5   : > { %2548 = vmatpush3.bf16.msra.mxu1 %v2695_v37 }
  0xe6   : > { %2549 = vmatprep.subr.bf16.mxu1 %v2698_v40 }
  0xe7   : > { %2528 = vmatpush3.bf16.msra.mxu0 %v2697_v39 }
  0xe8   : > { %2529 = vmatprep.subr.bf16.mxu0 %v2700_v42 }
  0xe9   : > { %2550 = vmatpush3.bf16.msra.mxu1 %v2699_v41 }
  0xea   : > { %2551 = vmatprep.subr.bf16.mxu1 %v2702_v44 }
  0xeb   : > { %2530 = vmatpush3.bf16.msra.mxu0 %v2701_v43 }
  0xec   : > { %2531 = vmatprep.subr.bf16.mxu0 %v2704_v46 }
  0xed   : > { %2552 = vmatpush3.bf16.msra.mxu1 %v2703_v45 }
  0xee   : > { %2553 = vmatprep.subr.bf16.mxu1 %v2706_v48 }
  0xef   : > { %2532 = vmatpush3.bf16.msra.mxu0 %v2705_v47 }
  0xf0   : > { %2533 = vmatprep.subr.bf16.mxu0 %v2708_v50 }
  0xf1   : > { %2554 = vmatpush3.bf16.msra.mxu1 %v2707_v49 }
  0xf2   : > { %2555 = vmatprep.subr.bf16.mxu1 %v2710_v52 }
  0xf3   : > { %2534 = vmatpush3.bf16.msra.mxu0 %v2709_v51 }
  0xf4   : > { %2535 = vmatprep.subr.bf16.mxu0 %v2712_v54 }
  0xf5   : > { %2556 = vmatpush3.bf16.msra.mxu1 %v2711_v53 }
  0xf6   : > { %2557 = vmatprep.subr.bf16.mxu1 %v2714_v56 }
  0xf7   : > { %2536 = vmatpush3.bf16.msra.mxu0 %v2713_v55 }
  0xf8   : > { %2537 = vmatprep.subr.bf16.mxu0 %v2716_v58 }
  0xf9   : > { %2558 = vmatpush3.bf16.msra.mxu1 %v2715_v57 }
  0xfa   : > { %2559 = vmatprep.subr.bf16.mxu1 %v2718_v61 }
  0xfb   : > { %2538 = vmatpush3.bf16.msra.mxu0 %v2717_v60 }
  0xfc   : > { %2570 = vmatprep.subr.bf16.mxu0 %v2764_v0 }
  0xfd   : > { %2560 = vmatpush3.bf16.msra.mxu1 %v2719_v63 }
  0xfe   : > { %2134 = vmatmul.mubr.bf16.vlgmr.msra.gmra.mrb[8].mxu0 %v1320_v59 }
  0xff   : > { %2571 = vmatpush3.bf16.msra.mxu0 %v2721_v2  ;;  %2574 = vmatprep.mubr.msk.bf16.mxu0 %vm2765_vm0, %v2764_v0 }
 0x100   : > { %2174 = vmatmul.mubr.bf16.vlgmr.msra.gmra.mrb[8].mxu1 %v1335_v1  ;;  %2572 = vmatprep.subr.bf16.mxu0 %v2764_v0 }
 0x103   : > { %2573 = vmatpush3.bf16.msra.mxu0 %v2722_v4 }
 0x106   : > { %2575 = vmatmul.mubr.msk.bf16.vlgmr.msra.gmra.mrb[12].mxu0 %vm1937_vm1, %v1327_v5 }
 0x191   : > { %v2451_v6 = vpop.f32.mrb[0].mxu0 }
 0x192   : > { %v2452_v8 = vpop.f32.mrb[1].mxu0 }
 0x193   : > { %v2453_v9 = vadd.f32 %v2452_v8, %v2451_v6  ;;  %v2454_v10 = vpop.f32.mrb[2].mxu0  ;;  %v2473_v11 = vpop.f32.mrb[0].mxu1 }
 0x194   : > { %v2455_v13 = vpop.f32.mrb[3].mxu0  ;;  %v2474_v14 = vpop.f32.mrb[1].mxu1 }
 0x195   : > { %v1976_v12 = vadd.f32 %v2453_v9, %v2333_v7  ;;  %v2475_v15 = vadd.f32 %v2474_v14, %v2473_v11  ;;  %v2476_v16 = vpop.f32.mrb[2].mxu1 }
 0x196   : > { %v2477_v17 = vpop.f32.mrb[3].mxu1 }
 0x197   : > { %v2016_v18 = vadd.f32 %v2475_v15, %v1976_v12 }
 0x1b1   : > { %v2495_v19 = vpop.f32.mrb[4].mxu0 }
 0x1b2   : > { %v2496_v20 = vpop.f32.mrb[5].mxu0 }
 0x1b3   : > { %v2497_v21 = vadd.f32 %v2496_v20, %v2495_v19  ;;  %v2498_v22 = vpop.f32.mrb[6].mxu0  ;;  %v2517_v23 = vpop.f32.mrb[4].mxu1 }
 0x1b4   : > { %v2499_v24 = vpop.f32.mrb[7].mxu0  ;;  %v2518_v25 = vpop.f32.mrb[5].mxu1 }
 0x1b5   : > { %v2056_v26 = vadd.f32 %v2497_v21, %v2016_v18  ;;  %v2519_v27 = vadd.f32 %v2518_v25, %v2517_v23  ;;  %v2520_v28 = vpop.f32.mrb[6].mxu1 }
 0x1b6   : > { %v2521_v29 = vpop.f32.mrb[7].mxu1 }
 0x1b7   : > { %v2096_v30 = vadd.f32 %v2519_v27, %v2056_v26 }
 0x1d1   : > { %v2539_v31 = vpop.f32.mrb[8].mxu0 }
 0x1d2   : > { %v2540_v32 = vpop.f32.mrb[9].mxu0 }
 0x1d3   : > { %v2541_v33 = vadd.f32 %v2540_v32, %v2539_v31  ;;  %v2561_v34 = vpop.f32.mrb[8].mxu1  ;;  %v2542_v35 = vpop.f32.mrb[10].mxu0 }
 0x1d4   : > { %v2562_v36 = vpop.f32.mrb[9].mxu1  ;;  %v2543_v37 = vpop.f32.mrb[11].mxu0 }
 0x1d5   : > { %v2136_v38 = vadd.f32 %v2541_v33, %v2096_v30  ;;  %v2563_v39 = vadd.f32 %v2562_v36, %v2561_v34  ;;  %v2564_v40 = vpop.f32.mrb[10].mxu1 }
 0x1d6   : > { %v2565_v41 = vpop.f32.mrb[11].mxu1 }
 0x1d7   : > { %v2176_v42 = vadd.f32 %v2563_v39, %v2136_v38 }
 0x1d9   : > { %v2215_v43 = vpop.f32.mrb[12].mxu0 }
 0x1da   : > { %v2216_v44 = vadd.f32 %v2215_v43, %v2176_v42  ;;  %v2576_v45 = vpop.f32.mrb[13].mxu0 }
 0x1db   : > { %v2218_v46 = vpop.f32.mrb[14].mxu0 }
 0x1dc   : > { %v2221_v47 = vmax.f32 %v2216_v44, 0.0  ;;  %v2577_v48 = vpop.f32.mrb[15].mxu0 }
 0x1de   : > { %v2222_v49 = vpack.c.bf16 %v2221_v47, %v2221_v47 }
 0x1e0   : > { %2223 = vst [vmem:[%s1040_s18] sm:$0x1] %v2222_v49 }
 0x1e1 PF: > { %s13_s16 = sadd.s32 1, %s2761_s16   ;;  %s3393_s12 = smov %s2749_s13 }
 0x1e2   : > { %p10_p10 = scmp.ge.s32.totalorder %s13_s16, 7   ;;  %s3394_s13 = smov %s2821_s20 }
 0x1e3   : > { %s3395_s14 = smov %s2757_s15  ;;  %s3396_s15 = smov %s3398_s17 }
 0x1e4   :  { %12 = sbr.rel (!%p10_p10) target bundleno = 3 (0x3), region = 114 }

// kernel: cnn_forward.7
= control target key start
LH: loop header
LB: loop body
LE: loop exit
PB: predicated region body
PF: predicated region fallthrough
CT: control target
= control target key end

     0   :  { %v109_v29 = vlaneseq  ;;  %v708_v32 = vmov 1966171168   ;;  %v709_v36 = vmov 0.0   ;;  %s870_s0 = inlined_call_operand.vmem [shape: bf16[2,640], index: 0, kind: input, shape index: {}]   ;;  %s871_s1 = inlined_call_operand.vmem [shape: bf16[640,10], index: 1, kind: input, shape index: {}]   ;;  %s872_s2 = inlined_call_operand.vmem [shape: f32[1,10], index: 2, kind: input, shape index: {}]   ;;  %s873_s3 = inlined_call_operand.hbm [shape: f32[2,10], index: 3, kind: output, shape index: {}]  }
   0x1   :  { %v643_v0 = vld [vmem:[%s871_s1 + $0x40] sm:$0xff]   ;;  %v647_v4 = vld [vmem:[%s871_s1 + $0x48] sm:$0xff]   ;;  %v651_v8 = vld [vmem:[%s871_s1 + $0x50] sm:$0xff]   ;;  %v107_v33 = vunpack.c.l.s4 %v708_v32 }
   0x2   :  { %v644_v1 = vld [vmem:[%s871_s1] sm:$0xff]   ;;  %566 = vmatprep.subr.bf16.mxu0 %v643_v0  ;;  %v648_v5 = vld [vmem:[%s871_s1 + $0x8] sm:$0xff]   ;;  %v652_v9 = vld [vmem:[%s871_s1 + $0x10] sm:$0xff]   ;;  %v110_v34 = vshrl.u32 %v109_v29, 7 }
   0x3   :  { %v645_v2 = vld [vmem:[%s871_s1 + $0xc0] sm:$0xff]   ;;  %567 = vmatpush3.bf16.msra.mxu0 %v644_v1  ;;  %v649_v6 = vld [vmem:[%s871_s1 + $0xc8] sm:$0xff]   ;;  %v653_v10 = vld [vmem:[%s871_s1 + $0xd0] sm:$0xff]   ;;  %v108_v37 = vunpack.c.0.s8 %v107_v33 }
   0x4   :  { %v646_v3 = vld [vmem:[%s871_s1 + $0x80] sm:$0xff]   ;;  %588 = vmatprep.subr.bf16.mxu1 %v645_v2  ;;  %568 = vmatprep.subr.bf16.mxu0 %v647_v4  ;;  %v650_v7 = vld [vmem:[%s871_s1 + $0x88] sm:$0xff]   ;;  %v654_v11 = vld [vmem:[%s871_s1 + $0x90] sm:$0xff]  }
   0x5   :  { %589 = vmatpush3.bf16.msra.mxu1 %v646_v3  ;;  %v655_v12 = vld [vmem:[%s871_s1 + $0x58] sm:$0xff]   ;;  %v659_v16 = vld [vmem:[%s871_s1 + $0x60] sm:$0xff]   ;;  %v663_v20 = vld [vmem:[%s871_s1 + $0x68] sm:$0xff]   ;;  %v111_v39 = vsub.s32 %v108_v37, %v110_v34 }
   0x6   :  { %590 = vmatprep.subr.bf16.mxu1 %v649_v6  ;;  %v656_v13 = vld [vmem:[%s871_s1 + $0x18] sm:$0xff]   ;;  %v660_v17 = vld [vmem:[%s871_s1 + $0x20] sm:$0xff]   ;;  %v664_v21 = vld [vmem:[%s871_s1 + $0x28] sm:$0xff]  }
   0x7   :  { %569 = vmatpush3.bf16.msra.mxu0 %v648_v5  ;;  %v657_v14 = vld [vmem:[%s871_s1 + $0xd8] sm:$0xff]   ;;  %v661_v18 = vld [vmem:[%s871_s1 + $0xe0] sm:$0xff]   ;;  %v665_v22 = vld [vmem:[%s871_s1 + $0xe8] sm:$0xff]  }
   0x8   :  { %570 = vmatprep.subr.bf16.mxu0 %v651_v8  ;;  %v658_v15 = vld [vmem:[%s871_s1 + $0x98] sm:$0xff]   ;;  %v662_v19 = vld [vmem:[%s871_s1 + $0xa0] sm:$0xff]   ;;  %v666_v23 = vld [vmem:[%s871_s1 + $0xa8] sm:$0xff]  }
   0x9   :  { %591 = vmatpush3.bf16.msra.mxu1 %v650_v7  ;;  %v667_v24 = vld [vmem:[%s871_s1 + $0x70] sm:$0xff]   ;;  %v671_v28 = vld [vmem:[%s871_s1 + $0x78] sm:$0xff]   ;;  %v16_v38 = vld [vmem:[%s870_s0] sm:$0x1f] }
   0xa   :  { %592 = vmatprep.subr.bf16.mxu1 %v653_v10  ;;  %v668_v25 = vld [vmem:[%s871_s1 + $0x30] sm:$0xff]   ;;  %v672_v30 = vld [vmem:[%s871_s1 + $0x38] sm:$0xff]   ;;  %v112_v40 = vrot.slane %v16_v38, %v111_v39 }
   0xb   :  { %571 = vmatpush3.bf16.msra.mxu0 %v652_v9  ;;  %v669_v26 = vld [vmem:[%s871_s1 + $0xf0] sm:$0xff]   ;;  %v673_v31 = vld [vmem:[%s871_s1 + $0xf8] sm:$0xff]  }
   0xc   :  { %572 = vmatprep.subr.bf16.mxu0 %v655_v12  ;;  %v670_v27 = vld [vmem:[%s871_s1 + $0xb0] sm:$0xff]   ;;  %v675_v35 = vld [vmem:[%s871_s1 + $0xb8] sm:$0xff]   ;;  %v120_v41 = vcombine.high %v112_v40, %v112_v40  ;;  %v127_v42 = vrot.slane %v112_v40, %v111_v39 }
   0xd   :  { %593 = vmatpush3.bf16.msra.mxu1 %v654_v11 }
   0xe   :  { %594 = vmatprep.subr.bf16.mxu1 %v657_v14 }
   0xf   :  { %573 = vmatpush3.bf16.msra.mxu0 %v656_v13 }
  0x10   :  { %574 = vmatprep.subr.bf16.mxu0 %v659_v16 }
  0x11   :  { %595 = vmatpush3.bf16.msra.mxu1 %v658_v15 }
  0x12   :  { %596 = vmatprep.subr.bf16.mxu1 %v661_v18 }
  0x13   :  { %575 = vmatpush3.bf16.msra.mxu0 %v660_v17 }
  0x14   :  { %576 = vmatprep.subr.bf16.mxu0 %v663_v20 }
  0x15   :  { %597 = vmatpush3.bf16.msra.mxu1 %v662_v19 }
  0x16   :  { %598 = vmatprep.subr.bf16.mxu1 %v665_v22 }
  0x17   :  { %577 = vmatpush3.bf16.msra.mxu0 %v664_v21 }
  0x18   :  { %578 = vmatprep.subr.bf16.mxu0 %v667_v24 }
  0x19   :  { %599 = vmatpush3.bf16.msra.mxu1 %v666_v23 }
  0x1a   :  { %600 = vmatprep.subr.bf16.mxu1 %v669_v26 }
  0x1b   :  { %579 = vmatpush3.bf16.msra.mxu0 %v668_v25 }
  0x1c   :  { %580 = vmatprep.subr.bf16.mxu0 %v671_v28 }
  0x1d   :  { %601 = vmatpush3.bf16.msra.mxu1 %v670_v27 }
  0x1e   :  { %602 = vmatprep.subr.bf16.mxu1 %v673_v31 }
  0x1f   :  { %581 = vmatpush3.bf16.msra.mxu0 %v672_v30 }
  0x20   :  { %619 = vmatprep.subr.bf16.mxu0 %v709_v36 }
  0x21   :  { %603 = vmatpush3.bf16.msra.mxu1 %v675_v35 }
  0x22   :  { %8 = vsyncpa [#allocation3], 0  ;;  %v141_v43 = vrot.slane %v120_v41, %v111_v39  ;;  %v676_v44 = vld [vmem:[%s871_s1 + $0x100] sm:$0xff]   ;;  %v142_v45 = vcombine.high %v127_v42, %v127_v42  ;;  %v677_v47 = vld [vmem:[%s871_s1 + $0x108] sm:$0xff]   ;;  %vm710_vm0 = vmmov 0   ;;  %v105_v52 = vcombine.high %v16_v38, %v16_v38 }
  0x23   :  { %v678_v48 = vld [vmem:[%s871_s1 + $0x110] sm:$0xff]   ;;  %v679_v49 = vld [vmem:[%s871_s1 + $0x118] sm:$0xff]   ;;  %v680_v50 = vld [vmem:[%s871_s1 + $0x120] sm:$0xff]   ;;  %vm509_vm1 = vcmask 74752  }
  0x24   :  { %421 = vmatprep.mubr.bf16.mxu0 %v141_v43  ;;  %v143_v46 = vcombine.high %v141_v43, %v141_v43  ;;  %v681_v51 = vld [vmem:[%s871_s1 + $0x128] sm:$0xff]   ;;  %v682_v53 = vld [vmem:[%s871_s1 + $0x130] sm:$0xff]   ;;  %v119_v54 = vrot.slane %v105_v52, %v111_v39  ;;  %v683_v55 = vld [vmem:[%s871_s1 + $0x138] sm:$0xff]   ;;  %s711_s1 = smov [#allocation2]  }
  0x25   :  { %422 = vmatmul.mubr.bf16.vlgmr.msra.gmra.mrb[0].mxu0 %v127_v42  ;;  %v525_v58 = vld [vmem:[%s872_s2] ss:$0 sm:$0xff]  ;;  %s517_s14 = sshll.u32 %s711_s1, 4  ;;  %s518_s14 = int_to_ptr.vmem [resolvable:$true] %s517_s14 }
  0x26   :  { %461 = vmatprep.mubr.bf16.mxu1 %v143_v46  ;;  %620 = vmatpush3.bf16.msra.mxu0 %v676_v44  ;;  %v134_v56 = vrot.slane %v119_v54, %v111_v39  ;;  %s684_s2 = scalar_lea.vmem %s518_s14, 32  ;;  %p689_p1 = scmp.lt.s32.totalorder %s518_s14, %s518_s14 }
  0x27   :  { %462 = vmatmul.mubr.bf16.vlgmr.msra.gmra.mrb[0].mxu1 %v142_v45  ;;  %621 = vmatprep.subr.bf16.mxu0 %v709_v36  ;;  %p685_p0 = scmp.ne.s32.totalorder %s518_s14, %s684_s2  ;;  %p690_p2 = scmp.lt.s32.totalorder %s684_s2, %s684_s2 }
  0x28   :  { %635 = vmatprep.mubr.msk.bf16.mxu0 %vm710_vm0, %v709_v36 }
  0x29   :  { %p691_p3 = por %p690_p2, %p689_p1 }
  0x2a   :  { %622 = vmatpush3.bf16.msra.mxu0 %v677_v47 }
  0x2b   :  { %623 = vmatprep.subr.bf16.mxu0 %v709_v36  ;;  %p692_p4 = pnand %p691_p3, %p685_p0 }
  0x2e   :  { %624 = vmatpush3.bf16.msra.mxu0 %v678_v48 }
  0x2f   :  { %625 = vmatprep.subr.bf16.mxu0 %v709_v36 }
  0x32   :  { %626 = vmatpush3.bf16.msra.mxu0 %v679_v49 }
  0x33   :  { %627 = vmatprep.subr.bf16.mxu0 %v709_v36 }
  0x36   :  { %628 = vmatpush3.bf16.msra.mxu0 %v680_v50 }
  0x37   :  { %629 = vmatprep.subr.bf16.mxu0 %v709_v36 }
  0x3a   :  { %630 = vmatpush3.bf16.msra.mxu0 %v681_v51 }
  0x3b   :  { %631 = vmatprep.subr.bf16.mxu0 %v709_v36 }
  0x3e   :  { %632 = vmatpush3.bf16.msra.mxu0 %v682_v53 }
  0x3f   :  { %633 = vmatprep.subr.bf16.mxu0 %v709_v36 }
  0x42   :  { %634 = vmatpush3.bf16.msra.mxu0 %v683_v55 }
  0x45   :  { %636 = vmatmul.mubr.bf16.vlgmr.msra.gmra.mrb[4].mxu0 %v134_v56 }
  0xf8   :  { %v582_v57 = vpop.f32.mrb[0].mxu0 }
  0xf9   :  { %v583_v59 = vpop.f32.mrb[1].mxu0 }
  0xfa   :  { %v584_v60 = vadd.f32 %v583_v59, %v582_v57  ;;  %v585_v61 = vpop.f32.mrb[2].mxu0  ;;  %v604_v62 = vpop.f32.mrb[0].mxu1 }
  0xfb   :  { %v586_v63 = vpop.f32.mrb[3].mxu0  ;;  %v605_v0 = vpop.f32.mrb[1].mxu1 }
  0xfc   :  { %v424_v1 = vadd.f32 %v584_v60, %v525_v58  ;;  %v606_v2 = vadd.f32 %v605_v0, %v604_v62  ;;  %v607_v3 = vpop.f32.mrb[2].mxu1 }
  0xfd   :  { %v608_v4 = vpop.f32.mrb[3].mxu1 }
  0xfe   :  { %v464_v5 = vadd.f32 %v606_v2, %v424_v1 }
 0x118   :  { %v503_v6 = vpop.f32.mrb[4].mxu0 }
 0x119   :  { %v504_v7 = vadd.f32 %v503_v6, %v464_v5  ;;  %v637_v8 = vpop.f32.mrb[5].mxu0 }
 0x11a   :  { %v506_v9 = vpop.f32.mrb[6].mxu0 }
 0x11b   :  { %v638_v10 = vpop.f32.mrb[7].mxu0  ;;  %510 = vst.msk [vmem:[#allocation2] sm:$0x3] %vm509_vm1, %v504_v7 }
 0x11c   :  { %695 = shalt.err (!%p692_p4)
}
 0x11d   :  { %s696_s17 = scalar_lea.hbm %s873_s3, 32 }
 0x11e   :  { %p697_p5 = scmp.ne.s32.totalorder %s873_s3, %s696_s17  ;;  %p700_p6 = scmp.lt.u32.totalorder %s696_s17, %s873_s3 }
 0x120   :  { %p702_p7 = pnand %p700_p6, %p697_p5 }
 0x122   :  { %705 = shalt.err (!%p702_p7)
}
 0x123   :  { %520 = dma.vmem_to_hbm [thread:$0]  %s518_s14, 32, %s873_s3, [#allocation3]  }
 0x124   :  { %706 = dma.done.wait [#allocation3], 32  }
 0x125   :  { %707 = vsyncadd [#allocation3], 4294967264 }
 0x126   :  { %524 = vsyncpa [#allocation3], 1 }

</bundles_post_ra>
